<compile_context>
chip_gen: v7x
topology: tpu7x:2x2x1
jax: 0.10.0
libtpu: 0.0.40
codegen_flags: <defaults>
</compile_context>

<pallas_src>
import functools

import jax
import jax.numpy as jnp
from jax.experimental import pallas as pl
from jax.experimental.pallas import tpu as pltpu

EPS = 1e-5
LANE_PAD = 128   # zero halo on each side of the flattened slab (lane-aligned, >= W+1)


def _residual_block_kernel(x_ref, w1_ref, w2_ref, mask_ref,
                           g1_ref, b1_ref, g2_ref, b2_ref, alpha_ref,
                           out_ref, pad_ref, *, W):
    # x_ref   : (C, S) lane-dense input slab, S = N*H*W
    # w*_ref  : (9, C, C) per-tap weight matrices, W_t[co, ci] = w[co, ci, ky, kx]
    # mask_ref: (9, S) f32 tap-validity masks ('same' padding geometry)
    # g*/b*   : (C, 1) BatchNorm affine params (VMEM, broadcast over lanes)
    # alpha   : (1,) shared PReLU slope in SMEM
    # out_ref : (C, S) output slab
    # pad_ref : (C, S + 2*LANE_PAD) VMEM scratch with zero halos
    C, S = x_ref.shape
    inv_n = 1.0 / float(S)                       # BN normalizes over N*H*W per channel

    # Zero only the halo borders once; the interior is fully overwritten (aligned,
    # full-slab store at lane offset LANE_PAD = 128) before every conv.
    border = jnp.zeros((C, LANE_PAD), jnp.float32)
    pad_ref[:, 0:LANE_PAD] = border
    pad_ref[:, LANE_PAD + S:LANE_PAD + S + LANE_PAD] = border

    def conv3x3_bn(src, w_ref, g_ref, b_ref):
        # src: (C, S) activation slab (channels on sublanes, N*H*W on lanes).
        pad_ref[:, LANE_PAD:LANE_PAD + S] = src                    # aligned store
        acc = jnp.zeros((C, S), jnp.float32)
        for t in range(9):                                         # 9 taps -> 9 MXU dots
            dy, dx = t // 3 - 1, t % 3 - 1
            off = dy * W + dx
            tap = pad_ref[:, LANE_PAD + off:LANE_PAD + off + S]    # shifted halo read
            tap = tap * mask_ref[t:t + 1, :]                       # zero out-of-image taps
            acc = acc + jnp.dot(w_ref[t], tap,
                                preferred_element_type=jnp.float32,
                                precision=jax.lax.Precision.HIGHEST)
        # Fused BatchNorm batch statistics: one pass for sum and sum of squares.
        s1 = jnp.sum(acc, axis=1, keepdims=True)                   # (C, 1)
        s2 = jnp.sum(acc * acc, axis=1, keepdims=True)             # (C, 1)
        mu = s1 * inv_n
        var = s2 * inv_n - mu * mu                                 # biased variance
        return (acc - mu) * jax.lax.rsqrt(var + EPS) * g_ref[...] + b_ref[...]

    y = conv3x3_bn(x_ref[...], w1_ref, g1_ref, b1_ref)
    alpha = alpha_ref[0]
    y = jnp.where(y >= 0.0, y, alpha * y)                          # PReLU (shared alpha)
    y = conv3x3_bn(y, w2_ref, g2_ref, b2_ref)
    out_ref[...] = y + x_ref[...]                                  # residual add


def residual_conv_block(x, w1, g1, b1, alpha, w2, g2, b2):
    """x: (N, C, H, W) f32; w1/w2: (C, C, 3, 3) OIHW; g*/b*: (C,); alpha: scalar."""
    N, C, H, W = x.shape
    S = N * H * W
    assert W + 1 <= LANE_PAD, "halo must fit inside the 128-lane border"

    # Layout plumbing (wrapper-side reshape/transpose): lane-dense (C, N*H*W) slab.
    x_slab = jnp.transpose(x, (1, 0, 2, 3)).reshape(C, S)
    # Per-tap (C_out, C_in) weight matrices, tap index t = ky*3 + kx.
    w1_taps = jnp.transpose(w1, (2, 3, 0, 1)).reshape(9, C, C)
    w2_taps = jnp.transpose(w2, (2, 3, 0, 1)).reshape(9, C, C)

    # Static tap-validity masks ('same'-padding geometry constants).
    s_idx = jnp.arange(S, dtype=jnp.int32)
    x_pos = s_idx % W
    y_pos = (s_idx // W) % H
    masks = []
    for t in range(9):
        dy, dx = t // 3 - 1, t % 3 - 1
        valid = ((y_pos + dy >= 0) & (y_pos + dy < H) &
                 (x_pos + dx >= 0) & (x_pos + dx < W))
        masks.append(valid.astype(jnp.float32))
    masks = jnp.stack(masks, axis=0)                               # (9, S)

    vmem = pl.BlockSpec(memory_space=pltpu.MemorySpace.VMEM)
    smem = pl.BlockSpec(memory_space=pltpu.MemorySpace.SMEM)
    kernel = functools.partial(_residual_block_kernel, W=W)

    out_slab = pl.pallas_call(
        kernel,
        out_shape=jax.ShapeDtypeStruct((C, S), jnp.float32),
        in_specs=[vmem] * 8 + [smem],
        out_specs=vmem,
        scratch_shapes=[pltpu.VMEM((C, S + 2 * LANE_PAD), jnp.float32)],
    )(x_slab, w1_taps, w2_taps, masks,
      g1.reshape(C, 1), b1.reshape(C, 1), g2.reshape(C, 1), b2.reshape(C, 1),
      jnp.reshape(alpha, (1,)).astype(jnp.float32))

    return jnp.transpose(out_slab.reshape(C, N, H, W), (1, 0, 2, 3))


def _reference(x, w1, g1, b1, alpha, w2, g2, b2):
    def conv(v, w):
        return jax.lax.conv_general_dilated(
            v, w, window_strides=(1, 1), padding=((1, 1), (1, 1)),
            dimension_numbers=("NCHW", "OIHW", "NCHW"),
            precision=jax.lax.Precision.HIGHEST)

    def bn(v, g, b):
        mu = jnp.mean(v, axis=(0, 2, 3), keepdims=True)
        var = jnp.mean((v - mu) ** 2, axis=(0, 2, 3), keepdims=True)
        return (v - mu) * jax.lax.rsqrt(var + EPS) * g.reshape(1, -1, 1, 1) \
            + b.reshape(1, -1, 1, 1)

    y = bn(conv(x, w1), g1, b1)
    y = jnp.where(y >= 0.0, y, alpha * y)
    y = bn(conv(y, w2), g2, b2)
    return y + x


if __name__ == "__main__":
    N, C, H, W = 2, 4, 16, 16
    key = jax.random.PRNGKey(0)
    kx, k1, k2, k3, k4, k5, k6 = jax.random.split(key, 7)

    x = jax.random.normal(kx, (N, C, H, W), jnp.float32)
    w1 = 0.2 * jax.random.normal(k1, (C, C, 3, 3), jnp.float32)   # Conv2d weight (O,I,3,3)
    w2 = 0.2 * jax.random.normal(k2, (C, C, 3, 3), jnp.float32)
    g1 = 1.0 + 0.1 * jax.random.normal(k3, (C,), jnp.float32)     # BN gamma
    b1 = 0.1 * jax.random.normal(k4, (C,), jnp.float32)           # BN beta
    g2 = 1.0 + 0.1 * jax.random.normal(k5, (C,), jnp.float32)
    b2 = 0.1 * jax.random.normal(k6, (C,), jnp.float32)
    alpha = jnp.float32(0.25)                                     # nn.PReLU() default init

    out = jax.block_until_ready(residual_conv_block(x, w1, g1, b1, alpha, w2, g2, b2))

    ref = _reference(x, w1, g1, b1, alpha, w2, g2, b2)
    err = float(jnp.max(jnp.abs(out - ref)))
    assert out.shape == (N, C, H, W) and out.dtype == jnp.float32
    assert jnp.allclose(out, ref, atol=2e-3, rtol=2e-3), f"max abs err {err}"
    print("KERNEL_OK")
</pallas_src>

<mosaic_0001>
module attributes {stable_mosaic.version = 11 : i64} {
  func.func @_residual_block_kernel(%arg0: memref<4x512xf32, #tpu.memory_space<vmem>>, %arg1: memref<9x4x4xf32, #tpu.memory_space<vmem>>, %arg2: memref<9x4x4xf32, #tpu.memory_space<vmem>>, %arg3: memref<9x512xf32, #tpu.memory_space<vmem>>, %arg4: memref<4x1xf32, #tpu.memory_space<vmem>>, %arg5: memref<4x1xf32, #tpu.memory_space<vmem>>, %arg6: memref<4x1xf32, #tpu.memory_space<vmem>>, %arg7: memref<4x1xf32, #tpu.memory_space<vmem>>, %arg8: memref<1xf32, #tpu.memory_space<smem>>, %arg9: memref<4x512xf32, #tpu.memory_space<vmem>>, %arg10: memref<4x768xf32, #tpu.memory_space<vmem>>) attributes {dimension_semantics = [], scalar_prefetch = 0 : i64, scratch_operands = 1 : i64, tpu.core_type = #tpu.core_type<tc>} {
    %cst = arith.constant 0.000000e+00 : f32
    %0 = vector.broadcast %cst : f32 to vector<4x128xf32>
    %c0 = arith.constant 0 : index
    %c0_0 = arith.constant 0 : index
    %1 = vector.load %arg10[%c0, %c0_0] : memref<4x768xf32, #tpu.memory_space<vmem>>, vector<4x128xf32>
    tpu.vector_store %arg10[%c0, %c0_0], %0 {strides = array<i32>} : memref<4x768xf32, #tpu.memory_space<vmem>>, vector<4x128xf32>,
    %c0_1 = arith.constant 0 : index
    %c640 = arith.constant 640 : index
    %2 = vector.load %arg10[%c0_1, %c640] : memref<4x768xf32, #tpu.memory_space<vmem>>, vector<4x128xf32>
    tpu.vector_store %arg10[%c0_1, %c640], %0 {strides = array<i32>} : memref<4x768xf32, #tpu.memory_space<vmem>>, vector<4x128xf32>,
    %c0_2 = arith.constant 0 : index
    %c0_3 = arith.constant 0 : index
    %3 = vector.load %arg0[%c0_2, %c0_3] : memref<4x512xf32, #tpu.memory_space<vmem>>, vector<4x512xf32>
    %c0_4 = arith.constant 0 : index
    %c128 = arith.constant 128 : index
    %4 = vector.load %arg10[%c0_4, %c128] : memref<4x768xf32, #tpu.memory_space<vmem>>, vector<4x512xf32>
    tpu.vector_store %arg10[%c0_4, %c128], %3 {strides = array<i32>} : memref<4x768xf32, #tpu.memory_space<vmem>>, vector<4x512xf32>,
    %cst_5 = arith.constant 0.000000e+00 : f32
    %5 = vector.broadcast %cst_5 : f32 to vector<4x512xf32>
    %c0_6 = arith.constant 0 : index
    %c111 = arith.constant 111 : index
    %6 = vector.load %arg10[%c0_6, %c111] : memref<4x768xf32, #tpu.memory_space<vmem>>, vector<4x512xf32>
    %c0_7 = arith.constant 0 : index
    %c0_8 = arith.constant 0 : index
    %7 = vector.load %arg3[%c0_7, %c0_8] : memref<9x512xf32, #tpu.memory_space<vmem>>, vector<1x512xf32>
    %8 = vector.broadcast %7 : vector<1x512xf32> to vector<4x512xf32>
    %9 = arith.mulf %6, %8 : vector<4x512xf32>
    %c0_9 = arith.constant 0 : index
    %c0_10 = arith.constant 0 : index
    %c0_11 = arith.constant 0 : index
    %10 = vector.load %arg1[%c0_9, %c0_10, %c0_11] : memref<9x4x4xf32, #tpu.memory_space<vmem>>, vector<1x4x4xf32>
    %11 = vector.shape_cast %10 : vector<1x4x4xf32> to vector<4x4xf32>
    %cst_12 = arith.constant dense<0.000000e+00> : vector<4x512xf32>
    %12 = tpu.matmul %11, %9, %cst_12 {dimension_numbers = #tpu.dot_dimension_numbers<[1], [0], [0], [1], [0, 0, 1, 1], [], []>, precision = #tpu.contract_precision<fp32>} : vector<4x4xf32>, vector<4x512xf32>, vector<4x512xf32> -> vector<4x512xf32>
    %13 = arith.addf %5, %12 : vector<4x512xf32>
    %c0_13 = arith.constant 0 : index
    %c112 = arith.constant 112 : index
    %14 = vector.load %arg10[%c0_13, %c112] : memref<4x768xf32, #tpu.memory_space<vmem>>, vector<4x512xf32>
    %c1 = arith.constant 1 : index
    %c0_14 = arith.constant 0 : index
    %15 = vector.load %arg3[%c1, %c0_14] : memref<9x512xf32, #tpu.memory_space<vmem>>, vector<1x512xf32>
    %16 = vector.broadcast %15 : vector<1x512xf32> to vector<4x512xf32>
    %17 = arith.mulf %14, %16 : vector<4x512xf32>
    %c1_15 = arith.constant 1 : index
    %c0_16 = arith.constant 0 : index
    %c0_17 = arith.constant 0 : index
    %18 = vector.load %arg1[%c1_15, %c0_16, %c0_17] : memref<9x4x4xf32, #tpu.memory_space<vmem>>, vector<1x4x4xf32>
    %19 = vector.shape_cast %18 : vector<1x4x4xf32> to vector<4x4xf32>
    %cst_18 = arith.constant dense<0.000000e+00> : vector<4x512xf32>
    %20 = tpu.matmul %19, %17, %cst_18 {dimension_numbers = #tpu.dot_dimension_numbers<[1], [0], [0], [1], [0, 0, 1, 1], [], []>, precision = #tpu.contract_precision<fp32>} : vector<4x4xf32>, vector<4x512xf32>, vector<4x512xf32> -> vector<4x512xf32>
    %21 = arith.addf %13, %20 : vector<4x512xf32>
    %c0_19 = arith.constant 0 : index
    %c113 = arith.constant 113 : index
    %22 = vector.load %arg10[%c0_19, %c113] : memref<4x768xf32, #tpu.memory_space<vmem>>, vector<4x512xf32>
    %c2 = arith.constant 2 : index
    %c0_20 = arith.constant 0 : index
    %23 = vector.load %arg3[%c2, %c0_20] : memref<9x512xf32, #tpu.memory_space<vmem>>, vector<1x512xf32>
    %24 = vector.broadcast %23 : vector<1x512xf32> to vector<4x512xf32>
    %25 = arith.mulf %22, %24 : vector<4x512xf32>
    %c2_21 = arith.constant 2 : index
    %c0_22 = arith.constant 0 : index
    %c0_23 = arith.constant 0 : index
    %26 = vector.load %arg1[%c2_21, %c0_22, %c0_23] : memref<9x4x4xf32, #tpu.memory_space<vmem>>, vector<1x4x4xf32>
    %27 = vector.shape_cast %26 : vector<1x4x4xf32> to vector<4x4xf32>
    %cst_24 = arith.constant dense<0.000000e+00> : vector<4x512xf32>
    %28 = tpu.matmul %27, %25, %cst_24 {dimension_numbers = #tpu.dot_dimension_numbers<[1], [0], [0], [1], [0, 0, 1, 1], [], []>, precision = #tpu.contract_precision<fp32>} : vector<4x4xf32>, vector<4x512xf32>, vector<4x512xf32> -> vector<4x512xf32>
    %29 = arith.addf %21, %28 : vector<4x512xf32>
    %c0_25 = arith.constant 0 : index
    %c127 = arith.constant 127 : index
    %30 = vector.load %arg10[%c0_25, %c127] : memref<4x768xf32, #tpu.memory_space<vmem>>, vector<4x512xf32>
    %c3 = arith.constant 3 : index
    %c0_26 = arith.constant 0 : index
    %31 = vector.load %arg3[%c3, %c0_26] : memref<9x512xf32, #tpu.memory_space<vmem>>, vector<1x512xf32>
    %32 = vector.broadcast %31 : vector<1x512xf32> to vector<4x512xf32>
    %33 = arith.mulf %30, %32 : vector<4x512xf32>
    %c3_27 = arith.constant 3 : index
    %c0_28 = arith.constant 0 : index
    %c0_29 = arith.constant 0 : index
    %34 = vector.load %arg1[%c3_27, %c0_28, %c0_29] : memref<9x4x4xf32, #tpu.memory_space<vmem>>, vector<1x4x4xf32>
    %35 = vector.shape_cast %34 : vector<1x4x4xf32> to vector<4x4xf32>
    %cst_30 = arith.constant dense<0.000000e+00> : vector<4x512xf32>
    %36 = tpu.matmul %35, %33, %cst_30 {dimension_numbers = #tpu.dot_dimension_numbers<[1], [0], [0], [1], [0, 0, 1, 1], [], []>, precision = #tpu.contract_precision<fp32>} : vector<4x4xf32>, vector<4x512xf32>, vector<4x512xf32> -> vector<4x512xf32>
    %37 = arith.addf %29, %36 : vector<4x512xf32>
    %c0_31 = arith.constant 0 : index
    %c128_32 = arith.constant 128 : index
    %38 = vector.load %arg10[%c0_31, %c128_32] : memref<4x768xf32, #tpu.memory_space<vmem>>, vector<4x512xf32>
    %c4 = arith.constant 4 : index
    %c0_33 = arith.constant 0 : index
    %39 = vector.load %arg3[%c4, %c0_33] : memref<9x512xf32, #tpu.memory_space<vmem>>, vector<1x512xf32>
    %40 = vector.broadcast %39 : vector<1x512xf32> to vector<4x512xf32>
    %41 = arith.mulf %38, %40 : vector<4x512xf32>
    %c4_34 = arith.constant 4 : index
    %c0_35 = arith.constant 0 : index
    %c0_36 = arith.constant 0 : index
    %42 = vector.load %arg1[%c4_34, %c0_35, %c0_36] : memref<9x4x4xf32, #tpu.memory_space<vmem>>, vector<1x4x4xf32>
    %43 = vector.shape_cast %42 : vector<1x4x4xf32> to vector<4x4xf32>
    %cst_37 = arith.constant dense<0.000000e+00> : vector<4x512xf32>
    %44 = tpu.matmul %43, %41, %cst_37 {dimension_numbers = #tpu.dot_dimension_numbers<[1], [0], [0], [1], [0, 0, 1, 1], [], []>, precision = #tpu.contract_precision<fp32>} : vector<4x4xf32>, vector<4x512xf32>, vector<4x512xf32> -> vector<4x512xf32>
    %45 = arith.addf %37, %44 : vector<4x512xf32>
    %c0_38 = arith.constant 0 : index
    %c129 = arith.constant 129 : index
    %46 = vector.load %arg10[%c0_38, %c129] : memref<4x768xf32, #tpu.memory_space<vmem>>, vector<4x512xf32>
    %c5 = arith.constant 5 : index
    %c0_39 = arith.constant 0 : index
    %47 = vector.load %arg3[%c5, %c0_39] : memref<9x512xf32, #tpu.memory_space<vmem>>, vector<1x512xf32>
    %48 = vector.broadcast %47 : vector<1x512xf32> to vector<4x512xf32>
    %49 = arith.mulf %46, %48 : vector<4x512xf32>
    %c5_40 = arith.constant 5 : index
    %c0_41 = arith.constant 0 : index
    %c0_42 = arith.constant 0 : index
    %50 = vector.load %arg1[%c5_40, %c0_41, %c0_42] : memref<9x4x4xf32, #tpu.memory_space<vmem>>, vector<1x4x4xf32>
    %51 = vector.shape_cast %50 : vector<1x4x4xf32> to vector<4x4xf32>
    %cst_43 = arith.constant dense<0.000000e+00> : vector<4x512xf32>
    %52 = tpu.matmul %51, %49, %cst_43 {dimension_numbers = #tpu.dot_dimension_numbers<[1], [0], [0], [1], [0, 0, 1, 1], [], []>, precision = #tpu.contract_precision<fp32>} : vector<4x4xf32>, vector<4x512xf32>, vector<4x512xf32> -> vector<4x512xf32>
    %53 = arith.addf %45, %52 : vector<4x512xf32>
    %c0_44 = arith.constant 0 : index
    %c143 = arith.constant 143 : index
    %54 = vector.load %arg10[%c0_44, %c143] : memref<4x768xf32, #tpu.memory_space<vmem>>, vector<4x512xf32>
    %c6 = arith.constant 6 : index
    %c0_45 = arith.constant 0 : index
    %55 = vector.load %arg3[%c6, %c0_45] : memref<9x512xf32, #tpu.memory_space<vmem>>, vector<1x512xf32>
    %56 = vector.broadcast %55 : vector<1x512xf32> to vector<4x512xf32>
    %57 = arith.mulf %54, %56 : vector<4x512xf32>
    %c6_46 = arith.constant 6 : index
    %c0_47 = arith.constant 0 : index
    %c0_48 = arith.constant 0 : index
    %58 = vector.load %arg1[%c6_46, %c0_47, %c0_48] : memref<9x4x4xf32, #tpu.memory_space<vmem>>, vector<1x4x4xf32>
    %59 = vector.shape_cast %58 : vector<1x4x4xf32> to vector<4x4xf32>
    %cst_49 = arith.constant dense<0.000000e+00> : vector<4x512xf32>
    %60 = tpu.matmul %59, %57, %cst_49 {dimension_numbers = #tpu.dot_dimension_numbers<[1], [0], [0], [1], [0, 0, 1, 1], [], []>, precision = #tpu.contract_precision<fp32>} : vector<4x4xf32>, vector<4x512xf32>, vector<4x512xf32> -> vector<4x512xf32>
    %61 = arith.addf %53, %60 : vector<4x512xf32>
    %c0_50 = arith.constant 0 : index
    %c144 = arith.constant 144 : index
    %62 = vector.load %arg10[%c0_50, %c144] : memref<4x768xf32, #tpu.memory_space<vmem>>, vector<4x512xf32>
    %c7 = arith.constant 7 : index
    %c0_51 = arith.constant 0 : index
    %63 = vector.load %arg3[%c7, %c0_51] : memref<9x512xf32, #tpu.memory_space<vmem>>, vector<1x512xf32>
    %64 = vector.broadcast %63 : vector<1x512xf32> to vector<4x512xf32>
    %65 = arith.mulf %62, %64 : vector<4x512xf32>
    %c7_52 = arith.constant 7 : index
    %c0_53 = arith.constant 0 : index
    %c0_54 = arith.constant 0 : index
    %66 = vector.load %arg1[%c7_52, %c0_53, %c0_54] : memref<9x4x4xf32, #tpu.memory_space<vmem>>, vector<1x4x4xf32>
    %67 = vector.shape_cast %66 : vector<1x4x4xf32> to vector<4x4xf32>
    %cst_55 = arith.constant dense<0.000000e+00> : vector<4x512xf32>
    %68 = tpu.matmul %67, %65, %cst_55 {dimension_numbers = #tpu.dot_dimension_numbers<[1], [0], [0], [1], [0, 0, 1, 1], [], []>, precision = #tpu.contract_precision<fp32>} : vector<4x4xf32>, vector<4x512xf32>, vector<4x512xf32> -> vector<4x512xf32>
    %69 = arith.addf %61, %68 : vector<4x512xf32>
    %c0_56 = arith.constant 0 : index
    %c145 = arith.constant 145 : index
    %70 = vector.load %arg10[%c0_56, %c145] : memref<4x768xf32, #tpu.memory_space<vmem>>, vector<4x512xf32>
    %c8 = arith.constant 8 : index
    %c0_57 = arith.constant 0 : index
    %71 = vector.load %arg3[%c8, %c0_57] : memref<9x512xf32, #tpu.memory_space<vmem>>, vector<1x512xf32>
    %72 = vector.broadcast %71 : vector<1x512xf32> to vector<4x512xf32>
    %73 = arith.mulf %70, %72 : vector<4x512xf32>
    %c8_58 = arith.constant 8 : index
    %c0_59 = arith.constant 0 : index
    %c0_60 = arith.constant 0 : index
    %74 = vector.load %arg1[%c8_58, %c0_59, %c0_60] : memref<9x4x4xf32, #tpu.memory_space<vmem>>, vector<1x4x4xf32>
    %75 = vector.shape_cast %74 : vector<1x4x4xf32> to vector<4x4xf32>
    %cst_61 = arith.constant dense<0.000000e+00> : vector<4x512xf32>
    %76 = tpu.matmul %75, %73, %cst_61 {dimension_numbers = #tpu.dot_dimension_numbers<[1], [0], [0], [1], [0, 0, 1, 1], [], []>, precision = #tpu.contract_precision<fp32>} : vector<4x4xf32>, vector<4x512xf32>, vector<4x512xf32> -> vector<4x512xf32>
    %77 = arith.addf %69, %76 : vector<4x512xf32>
    %cst_62 = arith.constant dense<0.000000e+00> : vector<4xf32>
    %78 = vector.multi_reduction <add>, %77, %cst_62 [1] : vector<4x512xf32> to vector<4xf32>
    %79 = vector.shape_cast %78 : vector<4xf32> to vector<4x1xf32>
    %80 = arith.mulf %77, %77 : vector<4x512xf32>
    %cst_63 = arith.constant dense<0.000000e+00> : vector<4xf32>
    %81 = vector.multi_reduction <add>, %80, %cst_63 [1] : vector<4x512xf32> to vector<4xf32>
    %82 = vector.shape_cast %81 : vector<4xf32> to vector<4x1xf32>
    %cst_64 = arith.constant 0.001953125 : f32
    %83 = vector.broadcast %cst_64 : f32 to vector<4x1xf32>
    %84 = arith.mulf %79, %83 : vector<4x1xf32>
    %cst_65 = arith.constant 0.001953125 : f32
    %85 = vector.broadcast %cst_65 : f32 to vector<4x1xf32>
    %86 = arith.mulf %82, %85 : vector<4x1xf32>
    %87 = arith.mulf %84, %84 : vector<4x1xf32>
    %88 = arith.subf %86, %87 : vector<4x1xf32>
    %89 = vector.broadcast %84 : vector<4x1xf32> to vector<4x512xf32>
    %90 = arith.subf %77, %89 : vector<4x512xf32>
    %cst_66 = arith.constant 9.99999974E-6 : f32
    %91 = vector.broadcast %cst_66 : f32 to vector<4x1xf32>
    %92 = arith.addf %88, %91 : vector<4x1xf32>
    %93 = math.rsqrt %92 : vector<4x1xf32>
    %94 = vector.broadcast %93 : vector<4x1xf32> to vector<4x512xf32>
    %95 = arith.mulf %90, %94 : vector<4x512xf32>
    %c0_67 = arith.constant 0 : index
    %c0_68 = arith.constant 0 : index
    %96 = vector.load %arg4[%c0_67, %c0_68] : memref<4x1xf32, #tpu.memory_space<vmem>>, vector<4x1xf32>
    %97 = vector.broadcast %96 : vector<4x1xf32> to vector<4x512xf32>
    %98 = arith.mulf %95, %97 : vector<4x512xf32>
    %c0_69 = arith.constant 0 : index
    %c0_70 = arith.constant 0 : index
    %99 = vector.load %arg5[%c0_69, %c0_70] : memref<4x1xf32, #tpu.memory_space<vmem>>, vector<4x1xf32>
    %100 = vector.broadcast %99 : vector<4x1xf32> to vector<4x512xf32>
    %101 = arith.addf %98, %100 : vector<4x512xf32>
    %c0_71 = arith.constant 0 : index
    %102 = memref.load %arg8[%c0_71] : memref<1xf32, #tpu.memory_space<smem>>
    %cst_72 = arith.constant 0.000000e+00 : f32
    %103 = vector.broadcast %cst_72 : f32 to vector<4x512xf32>
    %104 = arith.cmpf oge, %101, %103 : vector<4x512xf32>
    %105 = vector.broadcast %102 : f32 to vector<4x512xf32>
    %106 = arith.mulf %105, %101 : vector<4x512xf32>
    %107 = arith.select %104, %101, %106 : vector<4x512xi1>, vector<4x512xf32>
    %c0_73 = arith.constant 0 : index
    %c128_74 = arith.constant 128 : index
    %108 = vector.load %arg10[%c0_73, %c128_74] : memref<4x768xf32, #tpu.memory_space<vmem>>, vector<4x512xf32>
    tpu.vector_store %arg10[%c0_73, %c128_74], %107 {strides = array<i32>} : memref<4x768xf32, #tpu.memory_space<vmem>>, vector<4x512xf32>,
    %cst_75 = arith.constant 0.000000e+00 : f32
    %109 = vector.broadcast %cst_75 : f32 to vector<4x512xf32>
    %c0_76 = arith.constant 0 : index
    %c111_77 = arith.constant 111 : index
    %110 = vector.load %arg10[%c0_76, %c111_77] : memref<4x768xf32, #tpu.memory_space<vmem>>, vector<4x512xf32>
    %c0_78 = arith.constant 0 : index
    %c0_79 = arith.constant 0 : index
    %111 = vector.load %arg3[%c0_78, %c0_79] : memref<9x512xf32, #tpu.memory_space<vmem>>, vector<1x512xf32>
    %112 = vector.broadcast %111 : vector<1x512xf32> to vector<4x512xf32>
    %113 = arith.mulf %110, %112 : vector<4x512xf32>
    %c0_80 = arith.constant 0 : index
    %c0_81 = arith.constant 0 : index
    %c0_82 = arith.constant 0 : index
    %114 = vector.load %arg2[%c0_80, %c0_81, %c0_82] : memref<9x4x4xf32, #tpu.memory_space<vmem>>, vector<1x4x4xf32>
    %115 = vector.shape_cast %114 : vector<1x4x4xf32> to vector<4x4xf32>
    %cst_83 = arith.constant dense<0.000000e+00> : vector<4x512xf32>
    %116 = tpu.matmul %115, %113, %cst_83 {dimension_numbers = #tpu.dot_dimension_numbers<[1], [0], [0], [1], [0, 0, 1, 1], [], []>, precision = #tpu.contract_precision<fp32>} : vector<4x4xf32>, vector<4x512xf32>, vector<4x512xf32> -> vector<4x512xf32>
    %117 = arith.addf %109, %116 : vector<4x512xf32>
    %c0_84 = arith.constant 0 : index
    %c112_85 = arith.constant 112 : index
    %118 = vector.load %arg10[%c0_84, %c112_85] : memref<4x768xf32, #tpu.memory_space<vmem>>, vector<4x512xf32>
    %c1_86 = arith.constant 1 : index
    %c0_87 = arith.constant 0 : index
    %119 = vector.load %arg3[%c1_86, %c0_87] : memref<9x512xf32, #tpu.memory_space<vmem>>, vector<1x512xf32>
    %120 = vector.broadcast %119 : vector<1x512xf32> to vector<4x512xf32>
    %121 = arith.mulf %118, %120 : vector<4x512xf32>
    %c1_88 = arith.constant 1 : index
    %c0_89 = arith.constant 0 : index
    %c0_90 = arith.constant 0 : index
    %122 = vector.load %arg2[%c1_88, %c0_89, %c0_90] : memref<9x4x4xf32, #tpu.memory_space<vmem>>, vector<1x4x4xf32>
    %123 = vector.shape_cast %122 : vector<1x4x4xf32> to vector<4x4xf32>
    %cst_91 = arith.constant dense<0.000000e+00> : vector<4x512xf32>
    %124 = tpu.matmul %123, %121, %cst_91 {dimension_numbers = #tpu.dot_dimension_numbers<[1], [0], [0], [1], [0, 0, 1, 1], [], []>, precision = #tpu.contract_precision<fp32>} : vector<4x4xf32>, vector<4x512xf32>, vector<4x512xf32> -> vector<4x512xf32>
    %125 = arith.addf %117, %124 : vector<4x512xf32>
    %c0_92 = arith.constant 0 : index
    %c113_93 = arith.constant 113 : index
    %126 = vector.load %arg10[%c0_92, %c113_93] : memref<4x768xf32, #tpu.memory_space<vmem>>, vector<4x512xf32>
    %c2_94 = arith.constant 2 : index
    %c0_95 = arith.constant 0 : index
    %127 = vector.load %arg3[%c2_94, %c0_95] : memref<9x512xf32, #tpu.memory_space<vmem>>, vector<1x512xf32>
    %128 = vector.broadcast %127 : vector<1x512xf32> to vector<4x512xf32>
    %129 = arith.mulf %126, %128 : vector<4x512xf32>
    %c2_96 = arith.constant 2 : index
    %c0_97 = arith.constant 0 : index
    %c0_98 = arith.constant 0 : index
    %130 = vector.load %arg2[%c2_96, %c0_97, %c0_98] : memref<9x4x4xf32, #tpu.memory_space<vmem>>, vector<1x4x4xf32>
    %131 = vector.shape_cast %130 : vector<1x4x4xf32> to vector<4x4xf32>
    %cst_99 = arith.constant dense<0.000000e+00> : vector<4x512xf32>
    %132 = tpu.matmul %131, %129, %cst_99 {dimension_numbers = #tpu.dot_dimension_numbers<[1], [0], [0], [1], [0, 0, 1, 1], [], []>, precision = #tpu.contract_precision<fp32>} : vector<4x4xf32>, vector<4x512xf32>, vector<4x512xf32> -> vector<4x512xf32>
    %133 = arith.addf %125, %132 : vector<4x512xf32>
    %c0_100 = arith.constant 0 : index
    %c127_101 = arith.constant 127 : index
    %134 = vector.load %arg10[%c0_100, %c127_101] : memref<4x768xf32, #tpu.memory_space<vmem>>, vector<4x512xf32>
    %c3_102 = arith.constant 3 : index
    %c0_103 = arith.constant 0 : index
    %135 = vector.load %arg3[%c3_102, %c0_103] : memref<9x512xf32, #tpu.memory_space<vmem>>, vector<1x512xf32>
    %136 = vector.broadcast %135 : vector<1x512xf32> to vector<4x512xf32>
    %137 = arith.mulf %134, %136 : vector<4x512xf32>
    %c3_104 = arith.constant 3 : index
    %c0_105 = arith.constant 0 : index
    %c0_106 = arith.constant 0 : index
    %138 = vector.load %arg2[%c3_104, %c0_105, %c0_106] : memref<9x4x4xf32, #tpu.memory_space<vmem>>, vector<1x4x4xf32>
    %139 = vector.shape_cast %138 : vector<1x4x4xf32> to vector<4x4xf32>
    %cst_107 = arith.constant dense<0.000000e+00> : vector<4x512xf32>
    %140 = tpu.matmul %139, %137, %cst_107 {dimension_numbers = #tpu.dot_dimension_numbers<[1], [0], [0], [1], [0, 0, 1, 1], [], []>, precision = #tpu.contract_precision<fp32>} : vector<4x4xf32>, vector<4x512xf32>, vector<4x512xf32> -> vector<4x512xf32>
    %141 = arith.addf %133, %140 : vector<4x512xf32>
    %c0_108 = arith.constant 0 : index
    %c128_109 = arith.constant 128 : index
    %142 = vector.load %arg10[%c0_108, %c128_109] : memref<4x768xf32, #tpu.memory_space<vmem>>, vector<4x512xf32>
    %c4_110 = arith.constant 4 : index
    %c0_111 = arith.constant 0 : index
    %143 = vector.load %arg3[%c4_110, %c0_111] : memref<9x512xf32, #tpu.memory_space<vmem>>, vector<1x512xf32>
    %144 = vector.broadcast %143 : vector<1x512xf32> to vector<4x512xf32>
    %145 = arith.mulf %142, %144 : vector<4x512xf32>
    %c4_112 = arith.constant 4 : index
    %c0_113 = arith.constant 0 : index
    %c0_114 = arith.constant 0 : index
    %146 = vector.load %arg2[%c4_112, %c0_113, %c0_114] : memref<9x4x4xf32, #tpu.memory_space<vmem>>, vector<1x4x4xf32>
    %147 = vector.shape_cast %146 : vector<1x4x4xf32> to vector<4x4xf32>
    %cst_115 = arith.constant dense<0.000000e+00> : vector<4x512xf32>
    %148 = tpu.matmul %147, %145, %cst_115 {dimension_numbers = #tpu.dot_dimension_numbers<[1], [0], [0], [1], [0, 0, 1, 1], [], []>, precision = #tpu.contract_precision<fp32>} : vector<4x4xf32>, vector<4x512xf32>, vector<4x512xf32> -> vector<4x512xf32>
    %149 = arith.addf %141, %148 : vector<4x512xf32>
    %c0_116 = arith.constant 0 : index
    %c129_117 = arith.constant 129 : index
    %150 = vector.load %arg10[%c0_116, %c129_117] : memref<4x768xf32, #tpu.memory_space<vmem>>, vector<4x512xf32>
    %c5_118 = arith.constant 5 : index
    %c0_119 = arith.constant 0 : index
    %151 = vector.load %arg3[%c5_118, %c0_119] : memref<9x512xf32, #tpu.memory_space<vmem>>, vector<1x512xf32>
    %152 = vector.broadcast %151 : vector<1x512xf32> to vector<4x512xf32>
    %153 = arith.mulf %150, %152 : vector<4x512xf32>
    %c5_120 = arith.constant 5 : index
    %c0_121 = arith.constant 0 : index
    %c0_122 = arith.constant 0 : index
    %154 = vector.load %arg2[%c5_120, %c0_121, %c0_122] : memref<9x4x4xf32, #tpu.memory_space<vmem>>, vector<1x4x4xf32>
    %155 = vector.shape_cast %154 : vector<1x4x4xf32> to vector<4x4xf32>
    %cst_123 = arith.constant dense<0.000000e+00> : vector<4x512xf32>
    %156 = tpu.matmul %155, %153, %cst_123 {dimension_numbers = #tpu.dot_dimension_numbers<[1], [0], [0], [1], [0, 0, 1, 1], [], []>, precision = #tpu.contract_precision<fp32>} : vector<4x4xf32>, vector<4x512xf32>, vector<4x512xf32> -> vector<4x512xf32>
    %157 = arith.addf %149, %156 : vector<4x512xf32>
    %c0_124 = arith.constant 0 : index
    %c143_125 = arith.constant 143 : index
    %158 = vector.load %arg10[%c0_124, %c143_125] : memref<4x768xf32, #tpu.memory_space<vmem>>, vector<4x512xf32>
    %c6_126 = arith.constant 6 : index
    %c0_127 = arith.constant 0 : index
    %159 = vector.load %arg3[%c6_126, %c0_127] : memref<9x512xf32, #tpu.memory_space<vmem>>, vector<1x512xf32>
    %160 = vector.broadcast %159 : vector<1x512xf32> to vector<4x512xf32>
    %161 = arith.mulf %158, %160 : vector<4x512xf32>
    %c6_128 = arith.constant 6 : index
    %c0_129 = arith.constant 0 : index
    %c0_130 = arith.constant 0 : index
    %162 = vector.load %arg2[%c6_128, %c0_129, %c0_130] : memref<9x4x4xf32, #tpu.memory_space<vmem>>, vector<1x4x4xf32>
    %163 = vector.shape_cast %162 : vector<1x4x4xf32> to vector<4x4xf32>
    %cst_131 = arith.constant dense<0.000000e+00> : vector<4x512xf32>
    %164 = tpu.matmul %163, %161, %cst_131 {dimension_numbers = #tpu.dot_dimension_numbers<[1], [0], [0], [1], [0, 0, 1, 1], [], []>, precision = #tpu.contract_precision<fp32>} : vector<4x4xf32>, vector<4x512xf32>, vector<4x512xf32> -> vector<4x512xf32>
    %165 = arith.addf %157, %164 : vector<4x512xf32>
    %c0_132 = arith.constant 0 : index
    %c144_133 = arith.constant 144 : index
    %166 = vector.load %arg10[%c0_132, %c144_133] : memref<4x768xf32, #tpu.memory_space<vmem>>, vector<4x512xf32>
    %c7_134 = arith.constant 7 : index
    %c0_135 = arith.constant 0 : index
    %167 = vector.load %arg3[%c7_134, %c0_135] : memref<9x512xf32, #tpu.memory_space<vmem>>, vector<1x512xf32>
    %168 = vector.broadcast %167 : vector<1x512xf32> to vector<4x512xf32>
    %169 = arith.mulf %166, %168 : vector<4x512xf32>
    %c7_136 = arith.constant 7 : index
    %c0_137 = arith.constant 0 : index
    %c0_138 = arith.constant 0 : index
    %170 = vector.load %arg2[%c7_136, %c0_137, %c0_138] : memref<9x4x4xf32, #tpu.memory_space<vmem>>, vector<1x4x4xf32>
    %171 = vector.shape_cast %170 : vector<1x4x4xf32> to vector<4x4xf32>
    %cst_139 = arith.constant dense<0.000000e+00> : vector<4x512xf32>
    %172 = tpu.matmul %171, %169, %cst_139 {dimension_numbers = #tpu.dot_dimension_numbers<[1], [0], [0], [1], [0, 0, 1, 1], [], []>, precision = #tpu.contract_precision<fp32>} : vector<4x4xf32>, vector<4x512xf32>, vector<4x512xf32> -> vector<4x512xf32>
    %173 = arith.addf %165, %172 : vector<4x512xf32>
    %c0_140 = arith.constant 0 : index
    %c145_141 = arith.constant 145 : index
    %174 = vector.load %arg10[%c0_140, %c145_141] : memref<4x768xf32, #tpu.memory_space<vmem>>, vector<4x512xf32>
    %c8_142 = arith.constant 8 : index
    %c0_143 = arith.constant 0 : index
    %175 = vector.load %arg3[%c8_142, %c0_143] : memref<9x512xf32, #tpu.memory_space<vmem>>, vector<1x512xf32>
    %176 = vector.broadcast %175 : vector<1x512xf32> to vector<4x512xf32>
    %177 = arith.mulf %174, %176 : vector<4x512xf32>
    %c8_144 = arith.constant 8 : index
    %c0_145 = arith.constant 0 : index
    %c0_146 = arith.constant 0 : index
    %178 = vector.load %arg2[%c8_144, %c0_145, %c0_146] : memref<9x4x4xf32, #tpu.memory_space<vmem>>, vector<1x4x4xf32>
    %179 = vector.shape_cast %178 : vector<1x4x4xf32> to vector<4x4xf32>
    %cst_147 = arith.constant dense<0.000000e+00> : vector<4x512xf32>
    %180 = tpu.matmul %179, %177, %cst_147 {dimension_numbers = #tpu.dot_dimension_numbers<[1], [0], [0], [1], [0, 0, 1, 1], [], []>, precision = #tpu.contract_precision<fp32>} : vector<4x4xf32>, vector<4x512xf32>, vector<4x512xf32> -> vector<4x512xf32>
    %181 = arith.addf %173, %180 : vector<4x512xf32>
    %cst_148 = arith.constant dense<0.000000e+00> : vector<4xf32>
    %182 = vector.multi_reduction <add>, %181, %cst_148 [1] : vector<4x512xf32> to vector<4xf32>
    %183 = vector.shape_cast %182 : vector<4xf32> to vector<4x1xf32>
    %184 = arith.mulf %181, %181 : vector<4x512xf32>
    %cst_149 = arith.constant dense<0.000000e+00> : vector<4xf32>
    %185 = vector.multi_reduction <add>, %184, %cst_149 [1] : vector<4x512xf32> to vector<4xf32>
    %186 = vector.shape_cast %185 : vector<4xf32> to vector<4x1xf32>
    %cst_150 = arith.constant 0.001953125 : f32
    %187 = vector.broadcast %cst_150 : f32 to vector<4x1xf32>
    %188 = arith.mulf %183, %187 : vector<4x1xf32>
    %cst_151 = arith.constant 0.001953125 : f32
    %189 = vector.broadcast %cst_151 : f32 to vector<4x1xf32>
    %190 = arith.mulf %186, %189 : vector<4x1xf32>
    %191 = arith.mulf %188, %188 : vector<4x1xf32>
    %192 = arith.subf %190, %191 : vector<4x1xf32>
    %193 = vector.broadcast %188 : vector<4x1xf32> to vector<4x512xf32>
    %194 = arith.subf %181, %193 : vector<4x512xf32>
    %cst_152 = arith.constant 9.99999974E-6 : f32
    %195 = vector.broadcast %cst_152 : f32 to vector<4x1xf32>
    %196 = arith.addf %192, %195 : vector<4x1xf32>
    %197 = math.rsqrt %196 : vector<4x1xf32>
    %198 = vector.broadcast %197 : vector<4x1xf32> to vector<4x512xf32>
    %199 = arith.mulf %194, %198 : vector<4x512xf32>
    %c0_153 = arith.constant 0 : index
    %c0_154 = arith.constant 0 : index
    %200 = vector.load %arg6[%c0_153, %c0_154] : memref<4x1xf32, #tpu.memory_space<vmem>>, vector<4x1xf32>
    %201 = vector.broadcast %200 : vector<4x1xf32> to vector<4x512xf32>
    %202 = arith.mulf %199, %201 : vector<4x512xf32>
    %c0_155 = arith.constant 0 : index
    %c0_156 = arith.constant 0 : index
    %203 = vector.load %arg7[%c0_155, %c0_156] : memref<4x1xf32, #tpu.memory_space<vmem>>, vector<4x1xf32>
    %204 = vector.broadcast %203 : vector<4x1xf32> to vector<4x512xf32>
    %205 = arith.addf %202, %204 : vector<4x512xf32>
    %c0_157 = arith.constant 0 : index
    %c0_158 = arith.constant 0 : index
    %206 = vector.load %arg0[%c0_157, %c0_158] : memref<4x512xf32, #tpu.memory_space<vmem>>, vector<4x512xf32>
    %207 = arith.addf %205, %206 : vector<4x512xf32>
    %c0_159 = arith.constant 0 : index
    %c0_160 = arith.constant 0 : index
    %208 = vector.load %arg9[%c0_159, %c0_160] : memref<4x512xf32, #tpu.memory_space<vmem>>, vector<4x512xf32>
    tpu.vector_store %arg9[%c0_159, %c0_160], %207 {strides = array<i32>} : memref<4x512xf32, #tpu.memory_space<vmem>>, vector<4x512xf32>,
    return
  }
}

</mosaic_0001>

<bundles_post_ra>
// kernel: tpu_custom_call.1
= control target key start
LH: loop header
LB: loop body
LE: loop exit
PB: predicated region body
PF: predicated region fallthrough
CT: control target
= control target key end

     0   :  { %v45_v0 = vlaneseq  ;;  %v18723_v3 = vmov 0.0   ;;  %s20682_s0 = inlined_call_operand.vmem [shape: f32[4,512], index: 0, kind: input, shape index: {}]   ;;  %s20683_s1 = inlined_call_operand.vmem [shape: f32[9,4,4], index: 1, kind: input, shape index: {}]   ;;  %s20684_s2 = inlined_call_operand.vmem [shape: f32[9,4,4], index: 2, kind: input, shape index: {}]   ;;  %s20685_s3 = inlined_call_operand.vmem [shape: f32[9,512], index: 3, kind: input, shape index: {}]   ;;  %s20686_s4 = inlined_call_operand.vmem [shape: f32[4,1], index: 4, kind: input, shape index: {}]   ;;  %s20687_s5 = inlined_call_operand.vmem [shape: f32[4,1], index: 5, kind: input, shape index: {}]   ;;  %s20688_s6 = inlined_call_operand.vmem [shape: f32[4,1], index: 6, kind: input, shape index: {}]   ;;  %s20689_s7 = inlined_call_operand.vmem [shape: f32[4,1], index: 7, kind: input, shape index: {}]   ;;  %s20690_s8 = inlined_call_operand.<no memory space> [shape: f32[1], index: 8, kind: input, shape index: {}]   ;;  %s20691_s9 = inlined_call_operand.hbm [shape: f32[4,512], index: 9, kind: output, shape index: {}]  }
   0x1   :  { %v18787_v1 = vld [vmem:[%s20682_s0] sm:$0xff]  ;;  %34 = vst [vmem:[#allocation2] sm:$0xf] %v18723_v3  ;;  %35 = vst [vmem:[#allocation2 + $0x14] sm:$0xf] %v18723_v3  ;;  %v18795_v4 = vld [vmem:[%s20682_s0 + $0x8] sm:$0xff]  ;;  %218 = vmatprep.mubr.f32.mxu0 %v18723_v3  ;;  %683 = vmatprep.mubr.f32.mxu1 %v18723_v3 }
   0x2   :  { %v46_v2 = vshrl.u32 %v45_v0, 7  ;;  %38 = vst [vmem:[#allocation2 + $0x4] sm:$0xff] %v18787_v1 }
   0x3   :  { %15 = vsyncpa [#allocation5], 0  ;;  %v18224_v5 = vld [vmem:[%s20685_s3 + $0x1] ss:$8 sm:$0xf]  ;;  %39 = vst [vmem:[#allocation2 + $0xc] sm:$0xff] %v18795_v4 }
   0x4   :  { %v43_v6 = vld [vmem:[%s20685_s3] ss:$8 sm:$0xf]  ;;  %v18806_v7 = vsub.s32 0, %v46_v2  ;;  %v18808_v8 = vsub.s32 1, %v46_v2  ;;  %v18810_v9 = vsub.s32 2, %v46_v2 }
   0x5   :  { %v18812_v10 = vsub.s32 3, %v46_v2  ;;  %s18724_s17 = smov 112   ;;  %s18725_s18 = smov 111   ;;  %vm108_vm0 = vcmask 916480   ;;  %vm71_vm1 = vcmask 1043456   ;;  %vm69_vm2 = vcmask 908288  }
   0x6   :  { %v87_v11 = vrot.slane %v18224_v5, %v18806_v7  ;;  %v91_v12 = vrot.slane %v18224_v5, %v18808_v8  ;;  %v95_v13 = vrot.slane %v18224_v5, %v18810_v9  ;;  %v48_v15 = vrot.slane %v43_v6, %v18806_v7  ;;  %s18726_s19 = smov 16   ;;  %v18226_v34 = vld [vmem:[%s20685_s3 + $0x2] ss:$8 sm:$0xf]  ;;  %s18727_s22 = smov 113  }
   0x7   :  { %v99_v14 = vrot.slane %v18224_v5, %v18812_v10  ;;  %v52_v16 = vrot.slane %v43_v6, %v18808_v8  ;;  %v56_v17 = vrot.slane %v43_v6, %v18810_v9  ;;  %v60_v18 = vrot.slane %v43_v6, %v18812_v10  ;;  %v18228_v53 = vld [vmem:[%s20685_s3 + $0x3] ss:$8 sm:$0xf]  ;;  %s18728_s25 = smov 17   ;;  %s18729_s26 = smov 127  }
   0x8   :  { %v100_v19 = vcombine.low %v87_v11, %v91_v12  ;;  %v2060_v41 = vrot.slane %v18226_v34, %v18810_v9  ;;  %v2064_v42 = vrot.slane %v18226_v34, %v18812_v10  ;;  %v2052_v43 = vrot.slane %v18226_v34, %v18806_v7  ;;  %v18225_v0 = vld [vmem:[%s20683_s1 + $0x4] sm:$0xf]  ;;  %s18730_s29 = smov 15   ;;  %s18731_s30 = smov 1  }
   0x9   :  { %v61_v20 = vcombine.low %v48_v15, %v52_v16  ;;  %v101_v21 = vcombine.low %v95_v13, %v99_v14  ;;  %v62_v22 = vcombine.low %v56_v17, %v60_v18  ;;  %v18826_v25 = vld [vmem:[#allocation2] sm:$0xff]  ;;  %v2056_v44 = vrot.slane %v18226_v34, %v18808_v8 }
   0xa   :  { %102 = vrot.lane.b32.xlu0 %v100_v19, %s18724_s17  ;;  %v18831_v31 = vld [vmem:[#allocation2 + $0x8] sm:$0xff]  ;;  %v42_v38 = vld [vmem:[#allocation2 + $0x10] sm:$0xf]  ;;  %v2066_v49 = vcombine.low %v2060_v41, %v2064_v42  ;;  %v3059_v56 = vrot.slane %v18228_v53, %v18806_v7  ;;  %v3063_v57 = vrot.slane %v18228_v53, %v18808_v8  ;;  %v3067_v60 = vrot.slane %v18228_v53, %v18810_v9 }
   0xb   :  { %63 = vrot.lane.b32.xlu1 %v61_v20, %s18725_s18  ;;  %v2065_v50 = vcombine.low %v2052_v43, %v2056_v44  ;;  %v3071_v61 = vrot.slane %v18228_v53, %v18812_v10  ;;  %vm140_vm3 = vcmask 31744   ;;  %vm135_vm4 = vcmask 130048  }
   0xc   :  { %v3072_v59 = vcombine.low %v3059_v56, %v3063_v57  ;;  %v142_v2 = vsel %vm140_vm3, %v18225_v0, 0  ;;  %vm2073_vm5 = vcmask 924672   ;;  %vm3080_vm6 = vcmask 1039360  }
   0xd   :  { %v3073_v63 = vcombine.low %v3067_v60, %v3071_v61  ;;  %v18872_v5 = vand.u32 4294901760, %v142_v2  ;;  %vm1097_vm7 = vcmask 138240   ;;  %vm2100_vm8 = vcmask 121856  }
   0xe   :  { %104 = vrot.lane.b32.xlu0 %v101_v21, %s18724_s17  ;;  %vm3107_vm9 = vcmask 7168  }
   0xf   :  { %65 = vrot.lane.b32.xlu1 %v62_v22, %s18725_s18  ;;  %v18875_v6 = vsub.f32 %v142_v2, %v18872_v5  ;;  %v2045_v2 = vld [vmem:[#allocation2 + $0x10] sm:$0xf] }
  0x11   :  { %v18878_v12 = vand.u32 4294901760, %v18875_v6 }
  0x13   :  { %v222_v14 = vsub.f32 %v18875_v6, %v18878_v12 }
  0x7c   :  { %v103_v23 = vpop.permute.xlu0 %102 }
  0x7d   :  { %v106_v24 = vrot.slane %v103_v23, 4  ;;  %v64_v26 = vpop.permute.xlu1 %63 }
  0x7e   :  { %v67_v39 = vrot.slane %v64_v26, 4 }
  0x7f   :  { %v109_v27 = vsel %vm108_vm0, %v106_v24, %v103_v23  ;;  %v223_v23 = vand.u32 4294901760, %v222_v14 }
  0x80   :  { %v105_v28 = vpop.permute.xlu0 %104  ;;  %v115_v29 = vmul.f32 %v109_v27, %v18826_v25  ;;  %v70_v47 = vsel %vm69_vm2, %v67_v39, %v64_v26 }
  0x81   :  { %v107_v30 = vrot.slane %v105_v28, 4  ;;  %v66_v33 = vpop.permute.xlu1 %65  ;;  %v77_v51 = vmul.f32 %v70_v47, %v18826_v25 }
  0x82   :  { %125 = vrot.lane.b32.xlu0 %v115_v29, %s18726_s19  ;;  %v123_v36 = vcombine.high %v115_v29, %v115_v29  ;;  %v68_v40 = vrot.slane %v66_v33, 4 }
  0x83   :  { %v110_v32 = vsel %vm71_vm1, %v106_v24, %v107_v30  ;;  %v117_v45 = vmul.f32 %v107_v30, %v42_v38  ;;  %v1085_v55 = vcombine.high %v77_v51, %v77_v51 }
  0x84   :  { %v111_v35 = vsel %vm108_vm0, %v110_v32, %v105_v28  ;;  %v72_v48 = vsel %vm71_vm1, %v67_v39, %v68_v40  ;;  %v79_v62 = vmul.f32 %v68_v40, %v42_v38 }
  0x85   :  { %v116_v37 = vmul.f32 %v111_v35, %v18831_v31  ;;  %v73_v52 = vsel %vm69_vm2, %v72_v48, %v66_v33 }
  0x86   :  { %127 = vrot.lane.b32.xlu0 %v123_v36, %s18726_s19  ;;  %v78_v54 = vmul.f32 %v73_v52, %v18831_v31 }
  0x87   :  { %129 = vrot.lane.b32.xlu1 %v116_v37, %s18726_s19  ;;  %v124_v46 = vcombine.high %v116_v37, %v116_v37 }
  0x88   :  { %v1086_v58 = vcombine.high %v78_v54, %v78_v54 }
  0x8a   :  { %133 = vrot.lane.b32.xlu0 %v117_v45, %s18726_s19 }
  0x8b   :  { %131 = vrot.lane.b32.xlu1 %v124_v46, %s18726_s19 }
  0x8e   :  { %2069 = vrot.lane.b32.xlu0 %v2066_v49, %s18727_s22 }
  0x8f   :  { %2067 = vrot.lane.b32.xlu1 %v2065_v50, %s18727_s22 }
  0x92   :  { %1091 = vrot.lane.b32.xlu0 %v78_v54, %s18728_s25 }
  0x93   :  { %1089 = vrot.lane.b32.xlu1 %v1085_v55, %s18728_s25 }
  0x96   :  { %1093 = vrot.lane.b32.xlu0 %v1086_v58, %s18728_s25 }
  0x97   :  { %1087 = vrot.lane.b32.xlu1 %v77_v51, %s18728_s25 }
  0x9a   :  { %3074 = vrot.lane.b32.xlu0 %v3072_v59, %s18729_s26 }
  0x9b   :  { %1095 = vrot.lane.b32.xlu1 %v79_v62, %s18728_s25 }
  0x9f   :  { %3076 = vrot.lane.b32.xlu1 %v3073_v63, %s18729_s26 }
  0xf4   :  { %v126_v11 = vpop.permute.xlu0 %125 }
  0xf8   :  { %v128_v13 = vpop.permute.xlu0 %127 }
  0xf9   :  { %v136_v15 = vsel %vm135_vm4, %v126_v11, %v128_v13  ;;  %v130_v16 = vpop.permute.xlu1 %129 }
  0xfa   :  { %v144_v17 = vsel %vm71_vm1, %v136_v15, 0  ;;  %v137_v18 = vsel %vm135_vm4, %v128_v13, %v130_v16 }
  0xfb   :  { %v18885_v19 = vand.u32 4294901760, %v144_v17  ;;  %v146_v20 = vsel %vm71_vm1, %v137_v18, 0 }
  0xfc   :  { %v18888_v21 = vand.u32 4294901760, %v146_v20  ;;  %v134_v22 = vpop.permute.xlu0 %133 }
  0xfd   :  { %v18891_v24 = vsub.f32 %v144_v17, %v18885_v19  ;;  %v132_v26 = vpop.permute.xlu1 %131 }
  0xfe   :  { %v18894_v27 = vsub.f32 %v146_v20, %v18888_v21  ;;  %v138_v28 = vsel %vm135_vm4, %v130_v16, %v132_v26  ;;  %v139_v29 = vsel %vm135_vm4, %v132_v26, %v134_v22  ;;  %153 = vmatprep.subr.mxu0 %v18888_v21 }
  0xff   :  { %v148_v30 = vsel %vm71_vm1, %v138_v28, 0  ;;  %v150_v32 = vsel %vm71_vm1, %v139_v29, 0  ;;  %155 = vmatpush1.msra.mxu0 %v18885_v19  ;;  %v238_v33 = vand.u32 4294901760, %v18891_v24  ;;  %v80_v28 = vld [vmem:[%s20683_s1] sm:$0xf] }
 0x100   :  { %v18903_v34 = vand.u32 4294901760, %v150_v32  ;;  %v18905_v35 = vand.u32 4294901760, %v148_v30  ;;  %224 = vmatmul.mubr.f32.vlgmr.msra.gmra.mrb[0].mxu0 %v223_v23  ;;  %v2070_v36 = vpop.permute.xlu0 %2069  ;;  %v232_v37 = vand.u32 4294901760, %v18894_v27 }
 0x101   :  { %v2072_v38 = vrot.slane %v2070_v36, 4  ;;  %v2068_v39 = vpop.permute.xlu1 %2067  ;;  %v239_v40 = vsub.f32 %v18891_v24, %v238_v33  ;;  %304 = vmatprep.mubr.f32.mxu0 %v18723_v3 }
 0x102   :  { %v18913_v41 = vsub.f32 %v150_v32, %v18903_v34  ;;  %v18916_v42 = vsub.f32 %v148_v30, %v18905_v35  ;;  %v2071_v43 = vrot.slane %v2068_v39, 4  ;;  %618 = vmatprep.subr.mxu1 %v18903_v34  ;;  %v233_v44 = vsub.f32 %v18894_v27, %v232_v37  ;;  %v3052_v30 = vld [vmem:[#allocation2 + $0x10] sm:$0xf] }
 0x103   :  { %620 = vmatpush1.msra.mxu1 %v18905_v35  ;;  %v240_v52 = vand.u32 4294901760, %v239_v40  ;;  %v2082_v15 = vmul.f32 %v2072_v38, %v2045_v2 }
 0x104   :  { %v2074_v45 = vsel %vm2073_vm5, %v2071_v43, %v2068_v39  ;;  %689 = vmatmul.mubr.f32.vlgmr.msra.gmra.mrb[0].mxu1 %v223_v23  ;;  %v18924_v46 = vpop.permute.xlu0 %1091  ;;  %v234_v47 = vand.u32 4294901760, %v233_v44  ;;  %v2075_v48 = vsel %vm71_vm1, %v2071_v43, %v2072_v38  ;;  %v697_v49 = vand.u32 4294901760, %v18913_v41  ;;  %v18232_v23 = vld [vmem:[%s20685_s3 + $0x5] ss:$8 sm:$0xf] }
 0x105   :  { %v2080_v50 = vmul.f32 %v2074_v45, %v18826_v25  ;;  %v18929_v51 = vpop.permute.xlu1 %1089  ;;  %v2076_v53 = vsel %vm2073_vm5, %v2075_v48, %v2070_v36  ;;  %v703_v54 = vand.u32 4294901760, %v18916_v42  ;;  %769 = vmatprep.mubr.f32.mxu1 %v18723_v3  ;;  %v5052_v32 = vrot.slane %v18232_v23, %v18810_v9  ;;  %v18234_v44 = vld [vmem:[%s20685_s3 + $0x6] ss:$8 sm:$0xf] }
 0x106   :  { %235 = vmatprep.subr.mxu0 %v234_v47  ;;  %v2081_v55 = vmul.f32 %v2076_v53, %v18831_v31  ;;  %v698_v56 = vsub.f32 %v18913_v41, %v697_v49  ;;  %v1099_v18 = vsel %vm1097_vm7, %v18929_v51, %v18924_v46  ;;  %v5056_v36 = vrot.slane %v18232_v23, %v18812_v10 }
 0x107   :  { %241 = vmatpush1.msra.mxu0 %v240_v52  ;;  %v2088_v57 = vcombine.high %v2080_v50, %v2080_v50  ;;  %v704_v58 = vsub.f32 %v18916_v42, %v703_v54  ;;  %v1107_v26 = vsel %vm71_vm1, %v1099_v18, 0  ;;  %v1103_v38 = vsel %vm140_vm3, %v80_v28, 0 }
 0x108   :  { %306 = vmatmul.mubr.f32.vlgmr.msra.gmra.mrb[0].mxu0 %v18872_v5  ;;  %314 = vmatprep.subr.mxu0 %v18894_v27  ;;  %v18943_v59 = vpop.permute.xlu0 %1093  ;;  %v699_v60 = vand.u32 4294901760, %v698_v56  ;;  %v2089_v63 = vcombine.high %v2081_v55, %v2081_v55  ;;  %v5058_v47 = vcombine.low %v5052_v32, %v5056_v36  ;;  %v19006_v48 = vand.u32 4294901760, %v1103_v38 }
 0x109   :  { %2094 = vrot.lane.b32.xlu1 %v2081_v55, %s18730_s29  ;;  %2092 = vrot.lane.b32.xlu0 %v2088_v57, %s18730_s29  ;;  %v1088_v61 = vpop.permute.xlu1 %1087  ;;  %v705_v62 = vand.u32 4294901760, %v704_v58  ;;  %v6053_v53 = vrot.slane %v18234_v44, %v18808_v8 }
 0x10a   :  { %317 = vmatpush1.msra.mxu0 %v18891_v24  ;;  %700 = vmatprep.subr.mxu1 %v699_v60  ;;  %v1098_v39 = vsel %vm1097_vm7, %v1088_v61, %v18929_v51  ;;  %v6057_v24 = vrot.slane %v18234_v44, %v18810_v9  ;;  %v1100_v51 = vsel %vm1097_vm7, %v18924_v46, %v18943_v59 }
 0x10b   :  { %390 = vmatprep.subr.mxu0 %v18888_v21  ;;  %706 = vmatpush1.msra.mxu1 %v705_v62  ;;  %v1181_v56 = vsub.f32 %v1103_v38, %v19006_v48  ;;  %v1109_v46 = vsel %vm71_vm1, %v1100_v51, 0 }
 0x10c   :  { %771 = vmatmul.mubr.f32.vlgmr.msra.gmra.mrb[0].mxu1 %v18872_v5  ;;  %779 = vmatprep.subr.mxu1 %v18913_v41  ;;  %v3075_v0 = vpop.permute.xlu0 %3074  ;;  %v5048_v41 = vrot.slane %v18232_v23, %v18808_v8  ;;  %v19042_v58 = vand.u32 4294901760, %v1109_v46 }
 0x10d   :  { %v3078_v11 = vrot.slane %v3075_v0, 4  ;;  %2096 = vrot.lane.b32.xlu1 %v2089_v63, %s18730_s29  ;;  %2090 = vrot.lane.b32.xlu0 %v2080_v50, %s18730_s29  ;;  %v1096_v13 = vpop.permute.xlu1 %1095  ;;  %v1182_v62 = vand.u32 4294901760, %v1181_v56 }
 0x10e   :  { %782 = vmatpush1.msra.mxu1 %v18916_v42  ;;  %380 = vmatprep.mubr.f32.mxu0 %v18723_v3 }
 0x10f   :  { %v3081_v14 = vsel %vm3080_vm6, %v3078_v11, %v3075_v0  ;;  %855 = vmatprep.subr.mxu1 %v18903_v34  ;;  %845 = vmatprep.mubr.f32.mxu1 %v18723_v3 }
 0x110   :  { %v3087_v16 = vmul.f32 %v3081_v14, %v18826_v25  ;;  %383 = vmatmul.mubr.f32.vlgmr.msra.gmra.mrb[0].mxu0 %v18875_v6 }
 0x111   :  { %392 = vmatpush1.msra.mxu0 %v18885_v19  ;;  %2098 = vrot.lane.b32.xlu0 %v2082_v15, %s18730_s29  ;;  %v3077_v17 = vpop.permute.xlu1 %3076 }
 0x112   :  { %468 = vmatprep.subr.mxu0 %v232_v37  ;;  %v3079_v20 = vrot.slane %v3077_v17, 4  ;;  %v3095_v22 = vcombine.high %v3087_v16, %v3087_v16  ;;  %455 = vmatprep.mubr.f32.mxu0 %v18723_v3  ;;  %v18988_v37 = vand.u32 4294901760, %v1107_v26 }
 0x114   :  { %v3082_v25 = vsel %vm71_vm1, %v3078_v11, %v3079_v20  ;;  %848 = vmatmul.mubr.f32.vlgmr.msra.gmra.mrb[0].mxu1 %v18875_v6  ;;  %3099 = vrot.lane.b32.xlu1 %v3095_v22, %s18731_s30  ;;  %v1101_v6 = vsel %vm1097_vm7, %v18943_v59, %v1096_v13  ;;  %v3089_v43 = vmul.f32 %v3079_v20, %v3052_v30 }
 0x115   :  { %v3083_v27 = vsel %vm3080_vm6, %v3082_v25, %v3077_v17  ;;  %857 = vmatpush1.msra.mxu1 %v18905_v35  ;;  %920 = vmatprep.mubr.f32.mxu1 %v18723_v3  ;;  %v1111_v40 = vsel %vm71_vm1, %v1101_v6, 0  ;;  %v1183_v11 = vsub.f32 %v1181_v56, %v1182_v62 }
 0x116   :  { %933 = vmatprep.subr.mxu1 %v697_v49  ;;  %v3088_v29 = vmul.f32 %v3083_v27, %v18831_v31  ;;  %v5044_v31 = vrot.slane %v18232_v23, %v18806_v7  ;;  %v1105_v49 = vsel %vm71_vm1, %v1098_v39, 0  ;;  %v19013_v50 = vand.u32 4294901760, %v1111_v40 }
 0x117   :  { %v19028_v55 = vand.u32 4294901760, %v1105_v49  ;;  %v1184_v15 = vand.u32 4294901760, %v1183_v11 }
 0x118   :  { %459 = vmatmul.mubr.f32.vlgmr.msra.gmra.mrb[0].mxu0 %v18878_v12  ;;  %3097 = vrot.lane.b32.xlu1 %v3087_v16, %s18731_s30  ;;  %v3096_v45 = vcombine.high %v3088_v29, %v3088_v29  ;;  %v5057_v52 = vcombine.low %v5044_v31, %v5048_v41  ;;  %v19033_v42 = vsub.f32 %v1111_v40, %v19013_v50 }
 0x119   :  { %472 = vmatpush1.msra.mxu0 %v238_v33  ;;  %3101 = vrot.lane.b32.xlu0 %v3088_v29, %s18731_s30  ;;  %v19010_v33 = vsub.f32 %v1107_v26, %v18988_v37  ;;  %v1198_v59 = vsub.f32 %v1105_v49, %v19028_v55 }
 0x11a   :  { %544 = vmatprep.subr.mxu0 %v18888_v21  ;;  %535 = vmatprep.mubr.f32.mxu0 %v18723_v3  ;;  %v6061_v21 = vrot.slane %v18234_v44, %v18812_v10  ;;  %v1658_v61 = vand.u32 4294901760, %v19033_v42 }
 0x11b   :  { %v1199_v63 = vand.u32 4294901760, %v1198_v59 }
 0x11c   :  { %924 = vmatmul.mubr.f32.vlgmr.msra.gmra.mrb[0].mxu1 %v18878_v12  ;;  %3105 = vrot.lane.b32.xlu1 %v3089_v43, %s18731_s30  ;;  %v6049_v12 = vrot.slane %v18234_v44, %v18806_v7  ;;  %v1659_v2 = vsub.f32 %v19033_v42, %v1658_v61 }
 0x11d   :  { %937 = vmatpush1.msra.mxu1 %v703_v54  ;;  %3103 = vrot.lane.b32.xlu0 %v3096_v45, %s18731_s30  ;;  %v6063_v54 = vcombine.low %v6057_v24, %v6061_v21 }
 0x11e   :  { %1009 = vmatprep.subr.mxu1 %v18903_v34  ;;  %1000 = vmatprep.mubr.f32.mxu1 %v18723_v3  ;;  %v1193_v34 = vand.u32 4294901760, %v19010_v33  ;;  %v6062_v57 = vcombine.low %v6049_v12, %v6053_v53  ;;  %v1660_v14 = vand.u32 4294901760, %v1659_v2 }
 0x120   :  { %537 = vmatmul.mubr.f32.vlgmr.msra.gmra.mrb[0].mxu0 %v18872_v5  ;;  %5061 = vrot.lane.b32.xlu1 %v5058_v47, %s18731_s30  ;;  %v1194_v60 = vsub.f32 %v19010_v33, %v1193_v34 }
 0x121   :  { %546 = vmatpush1.msra.mxu0 %v18885_v19  ;;  %5059 = vrot.lane.b32.xlu0 %v5057_v52, %s18731_s30  ;;  %v1663_v19 = vsub.f32 %v1109_v46, %v19042_v58 }
 0x122   :  { %1114 = vmatprep.subr.mxu0 %v18988_v37  ;;  %609 = vmatprep.mubr.f32.mxu0 %v18723_v3  ;;  %v1195_v0 = vand.u32 4294901760, %v1194_v60 }
 0x123   :  { %v1664_v13 = vand.u32 4294901760, %v1663_v19 }
 0x124   :  { %1002 = vmatmul.mubr.f32.vlgmr.msra.gmra.mrb[0].mxu1 %v18872_v5  ;;  %6066 = vrot.lane.b32.xlu1 %v6063_v54, %s18730_s29 }
 0x125   :  { %1011 = vmatpush1.msra.mxu1 %v18905_v35  ;;  %1074 = vmatprep.mubr.f32.mxu1 %v18723_v3  ;;  %v1200_v35 = vsub.f32 %v1198_v59, %v1199_v63  ;;  %v1665_v17 = vsub.f32 %v1663_v19, %v1664_v13 }
 0x126   :  { %1579 = vmatprep.subr.mxu1 %v19013_v50  ;;  %6064 = vrot.lane.b32.xlu0 %v6062_v57, %s18730_s29 }
 0x127   :  { %v1201_v16 = vand.u32 4294901760, %v1200_v35  ;;  %v1666_v18 = vand.u32 4294901760, %v1665_v17 }
 0x128   :  { %611 = vmatmul.mubr.f32.vlgmr.msra.gmra.mrb[0].mxu0 %v18872_v5 }
 0x129   :  { %1116 = vmatpush1.msra.mxu0 %v19028_v55  ;;  %1179 = vmatprep.mubr.f32.mxu0 %v18723_v3 }
 0x12a   :  { %1196 = vmatprep.subr.mxu0 %v1195_v0 }
 0x12c   :  { %1076 = vmatmul.mubr.f32.vlgmr.msra.gmra.mrb[0].mxu1 %v18872_v5  ;;  %v18227_v5 = vld [vmem:[%s20683_s1 + $0x8] sm:$0xf] }
 0x12d   :  { %1581 = vmatpush1.msra.mxu1 %v19042_v58  ;;  %1644 = vmatprep.mubr.f32.mxu1 %v18723_v3  ;;  %v2106_v20 = vsel %vm140_vm3, %v18227_v5, 0 }
 0x12e   :  { %1661 = vmatprep.subr.mxu1 %v1660_v14  ;;  %v19093_v22 = vand.u32 4294901760, %v2106_v20 }
 0x130   :  { %1185 = vmatmul.mubr.f32.vlgmr.msra.gmra.mrb[0].mxu0 %v1184_v15  ;;  %v19096_v25 = vsub.f32 %v2106_v20, %v19093_v22 }
 0x131   :  { %1202 = vmatpush1.msra.mxu0 %v1201_v16  ;;  %1265 = vmatprep.mubr.f32.mxu0 %v18723_v3  ;;  %v18236_v16 = vld [vmem:[%s20685_s3 + $0x7] ss:$8 sm:$0xf] }
 0x132   :  { %1275 = vmatprep.subr.mxu0 %v19010_v33  ;;  %v19099_v23 = vand.u32 4294901760, %v19096_v25 }
 0x134   :  { %1650 = vmatmul.mubr.f32.vlgmr.msra.gmra.mrb[0].mxu1 %v1184_v15  ;;  %v2186_v29 = vsub.f32 %v19096_v25, %v19099_v23 }
 0x135   :  { %1667 = vmatpush1.msra.mxu1 %v1666_v18  ;;  %1730 = vmatprep.mubr.f32.mxu1 %v18723_v3 }
 0x136   :  { %1740 = vmatprep.subr.mxu1 %v19033_v42  ;;  %v2187_v41 = vand.u32 4294901760, %v2186_v29 }
 0x138   :  { %1267 = vmatmul.mubr.f32.vlgmr.msra.gmra.mrb[0].mxu0 %v19006_v48 }
 0x139   :  { %1278 = vmatpush1.msra.mxu0 %v1198_v59  ;;  %1341 = vmatprep.mubr.f32.mxu0 %v18723_v3 }
 0x13a   :  { %1351 = vmatprep.subr.mxu0 %v18988_v37 }
 0x13c   :  { %1732 = vmatmul.mubr.f32.vlgmr.msra.gmra.mrb[0].mxu1 %v19006_v48 }
 0x13d   :  { %1743 = vmatpush1.msra.mxu1 %v1663_v19  ;;  %1806 = vmatprep.mubr.f32.mxu1 %v18723_v3 }
 0x13e   :  { %1816 = vmatprep.subr.mxu1 %v19013_v50 }
 0x140   :  { %1344 = vmatmul.mubr.f32.vlgmr.msra.gmra.mrb[0].mxu0 %v1181_v56 }
 0x141   :  { %1353 = vmatpush1.msra.mxu0 %v19028_v55  ;;  %1416 = vmatprep.mubr.f32.mxu0 %v18723_v3 }
 0x142   :  { %1429 = vmatprep.subr.mxu0 %v1193_v34 }
 0x144   :  { %1809 = vmatmul.mubr.f32.vlgmr.msra.gmra.mrb[0].mxu1 %v1181_v56 }
 0x145   :  { %1818 = vmatpush1.msra.mxu1 %v19042_v58  ;;  %1881 = vmatprep.mubr.f32.mxu1 %v18723_v3 }
 0x146   :  { %1894 = vmatprep.subr.mxu1 %v1658_v61 }
 0x148   :  { %1420 = vmatmul.mubr.f32.vlgmr.msra.gmra.mrb[0].mxu0 %v1182_v62 }
 0x149   :  { %1433 = vmatpush1.msra.mxu0 %v1199_v63  ;;  %1496 = vmatprep.mubr.f32.mxu0 %v18723_v3 }
 0x14a   :  { %1505 = vmatprep.subr.mxu0 %v18988_v37 }
 0x14c   :  { %1885 = vmatmul.mubr.f32.vlgmr.msra.gmra.mrb[0].mxu1 %v1182_v62 }
 0x14d   :  { %1898 = vmatpush1.msra.mxu1 %v1664_v13  ;;  %1961 = vmatprep.mubr.f32.mxu1 %v18723_v3 }
 0x14e   :  { %1970 = vmatprep.subr.mxu1 %v19013_v50 }
 0x150   :  { %1498 = vmatmul.mubr.f32.vlgmr.msra.gmra.mrb[0].mxu0 %v19006_v48 }
 0x151   :  { %1507 = vmatpush1.msra.mxu0 %v19028_v55  ;;  %1570 = vmatprep.mubr.f32.mxu0 %v18723_v3 }
 0x154   :  { %1963 = vmatmul.mubr.f32.vlgmr.msra.gmra.mrb[0].mxu1 %v19006_v48 }
 0x155   :  { %1972 = vmatpush1.msra.mxu1 %v19042_v58  ;;  %2035 = vmatprep.mubr.f32.mxu1 %v18723_v3 }
 0x158   :  { %1572 = vmatmul.mubr.f32.vlgmr.msra.gmra.mrb[0].mxu0 %v19006_v48 }
 0x159   :  { %2182 = vmatprep.mubr.f32.mxu0 %v18723_v3 }
 0x15c   :  { %2037 = vmatmul.mubr.f32.vlgmr.msra.gmra.mrb[0].mxu1 %v19006_v48 }
 0x15d   :  { %2647 = vmatprep.mubr.f32.mxu1 %v18723_v3 }
 0x17b   :  { %v2095_v26 = vpop.permute.xlu1 %2094  ;;  %v2093_v27 = vpop.permute.xlu0 %2092 }
 0x17c   :  { %v2102_v28 = vsel %vm2100_vm8, %v2093_v27, %v2095_v26 }
 0x17d   :  { %v2110_v6 = vsel %vm71_vm1, %v2102_v28, 0  ;;  %v7054_v28 = vrot.slane %v18236_v16, %v18806_v7 }
 0x17e   :  { %v19105_v30 = vand.u32 4294901760, %v2110_v6 }
 0x17f   :  { %v2097_v32 = vpop.permute.xlu1 %2096  ;;  %v2091_v36 = vpop.permute.xlu0 %2090 }
 0x180   :  { %v19108_v37 = vsub.f32 %v2110_v6, %v19105_v30  ;;  %v2103_v38 = vsel %vm2100_vm8, %v2095_v26, %v2097_v32  ;;  %v2101_v39 = vsel %vm2100_vm8, %v2091_v36, %v2093_v27  ;;  %2117 = vmatprep.subr.mxu0 %v19105_v30  ;;  %v18229_v26 = vld [vmem:[%s20683_s1 + $0xc] sm:$0xf]  ;;  %v7058_v6 = vrot.slane %v18236_v16, %v18808_v8 }
 0x181   :  { %v2112_v40 = vsel %vm71_vm1, %v2103_v38, 0  ;;  %v2108_v31 = vsel %vm71_vm1, %v2101_v39, 0 }
 0x182   :  { %v19115_v43 = vand.u32 4294901760, %v2112_v40  ;;  %v19117_v44 = vand.u32 4294901760, %v2108_v31  ;;  %v2196_v45 = vand.u32 4294901760, %v19108_v37 }
 0x183   :  { %v2099_v47 = vpop.permute.xlu0 %2098 }
 0x184   :  { %v19121_v48 = vsub.f32 %v2112_v40, %v19115_v43  ;;  %v19124_v24 = vsub.f32 %v2108_v31, %v19117_v44  ;;  %v2104_v33 = vsel %vm2100_vm8, %v2097_v32, %v2099_v47  ;;  %2119 = vmatpush1.msra.mxu0 %v19117_v44  ;;  %v2197_v49 = vsub.f32 %v19108_v37, %v2196_v45  ;;  %v5037_v40 = vld [vmem:[#allocation2 + $0x14] sm:$0xf] }
 0x185   :  { %v2114_v50 = vsel %vm71_vm1, %v2104_v33, 0  ;;  %2188 = vmatmul.mubr.f32.vlgmr.msra.gmra.mrb[0].mxu0 %v2187_v41  ;;  %v7067_v31 = vcombine.low %v7054_v28, %v7058_v6  ;;  %v7062_v47 = vrot.slane %v18236_v16, %v18810_v9  ;;  %v7066_v33 = vrot.slane %v18236_v16, %v18812_v10 }
 0x186   :  { %v2202_v21 = vand.u32 4294901760, %v19124_v24  ;;  %v19131_v51 = vand.u32 4294901760, %v2114_v50  ;;  %v19133_v52 = vpop.permute.xlu1 %3099  ;;  %v2198_v12 = vand.u32 4294901760, %v2197_v49  ;;  %2268 = vmatprep.mubr.f32.mxu0 %v18723_v3  ;;  %v2667_v53 = vand.u32 4294901760, %v19121_v48 }
 0x188   :  { %v2660_v55 = vsub.f32 %v2114_v50, %v19131_v51  ;;  %2199 = vmatprep.subr.mxu0 %v2198_v12  ;;  %2582 = vmatprep.subr.mxu1 %v19131_v51  ;;  %v2203_v56 = vsub.f32 %v19124_v24, %v2202_v21  ;;  %v2668_v57 = vsub.f32 %v19121_v48, %v2667_v53 }
 0x189   :  { %2584 = vmatpush1.msra.mxu1 %v19115_v43 }
 0x18a   :  { %2653 = vmatmul.mubr.f32.vlgmr.msra.gmra.mrb[0].mxu1 %v2187_v41  ;;  %v3098_v46 = vpop.permute.xlu1 %3097  ;;  %v2204_v42 = vand.u32 4294901760, %v2203_v56  ;;  %v2661_v34 = vand.u32 4294901760, %v2660_v55  ;;  %v2669_v62 = vand.u32 4294901760, %v2668_v57 }
 0x18b   :  { %v19143_v54 = vpop.permute.xlu0 %3101  ;;  %2733 = vmatprep.mubr.f32.mxu1 %v18723_v3  ;;  %v3108_v39 = vsel %vm3107_vm9, %v3098_v46, %v19133_v52 }
 0x18c   :  { %2205 = vmatpush1.msra.mxu0 %v2204_v42  ;;  %v2662_v58 = vsub.f32 %v2660_v55, %v2661_v34  ;;  %v3109_v13 = vsel %vm3107_vm9, %v19133_v52, %v19143_v54 }
 0x18d   :  { %2270 = vmatmul.mubr.f32.vlgmr.msra.gmra.mrb[0].mxu0 %v19093_v22  ;;  %2278 = vmatprep.subr.mxu0 %v19108_v37  ;;  %v3117_v27 = vsel %vm71_vm1, %v3109_v13, 0  ;;  %v3113_v37 = vsel %vm140_vm3, %v18229_v26, 0 }
 0x18e   :  { %2281 = vmatpush1.msra.mxu0 %v19124_v24  ;;  %v3106_v59 = vpop.permute.xlu1 %3105  ;;  %v2663_v60 = vand.u32 4294901760, %v2662_v58  ;;  %2344 = vmatprep.mubr.f32.mxu0 %v18723_v3  ;;  %v19205_v49 = vand.u32 4294901760, %v3113_v37 }
 0x18f   :  { %v19153_v61 = vpop.permute.xlu0 %3103  ;;  %2354 = vmatprep.subr.mxu0 %v19105_v30 }
 0x190   :  { %2664 = vmatprep.subr.mxu1 %v2663_v60  ;;  %v3111_v32 = vsel %vm3107_vm9, %v19153_v61, %v3106_v59  ;;  %v19225_v56 = vsub.f32 %v3113_v37, %v19205_v49 }
 0x191   :  { %2670 = vmatpush1.msra.mxu1 %v2669_v62 }
 0x192   :  { %2735 = vmatmul.mubr.f32.vlgmr.msra.gmra.mrb[0].mxu1 %v19093_v22  ;;  %2743 = vmatprep.subr.mxu1 %v2660_v55  ;;  %v5062_v19 = vpop.permute.xlu1 %5061  ;;  %v3110_v55 = vsel %vm3107_vm9, %v19143_v54, %v19153_v61  ;;  %v6042_v61 = vld [vmem:[#allocation2 + $0x14] sm:$0xf] }
 0x193   :  { %v5060_v63 = vpop.permute.xlu0 %5059  ;;  %v5064_v0 = vrot.slane %v5062_v19, 4  ;;  %2746 = vmatpush1.msra.mxu1 %v19121_v48  ;;  %2809 = vmatprep.mubr.f32.mxu1 %v18723_v3 }
 0x194   :  { %v5063_v2 = vrot.slane %v5060_v63, 4  ;;  %2819 = vmatprep.subr.mxu1 %v19131_v51 }
 0x195   :  { %2347 = vmatmul.mubr.f32.vlgmr.msra.gmra.mrb[0].mxu0 %v19096_v25  ;;  %v5073_v52 = vmul.f32 %v5064_v0, %v5037_v40 }
 0x196   :  { %v5065_v11 = vsel %vm3107_vm9, %v5063_v2, %v5060_v63  ;;  %v5066_v35 = vsel %vm71_vm1, %v5063_v2, %v5064_v0  ;;  %2356 = vmatpush1.msra.mxu0 %v19117_v44  ;;  %2419 = vmatprep.mubr.f32.mxu0 %v18723_v3  ;;  %v19184_v29 = vpop.permute.xlu1 %6066 }
 0x197   :  { %v5071_v14 = vmul.f32 %v5065_v11, %v18787_v1  ;;  %v5067_v15 = vsel %vm3107_vm9, %v5066_v35, %v5062_v19  ;;  %2432 = vmatprep.subr.mxu0 %v2196_v45  ;;  %v6069_v41 = vrot.slane %v19184_v29, 4  ;;  %v3121_v45 = vsel %vm71_vm1, %v3111_v32, 0 }
 0x198   :  { %v5072_v17 = vmul.f32 %v5067_v15, %v18795_v4  ;;  %v6065_v18 = vpop.permute.xlu0 %6064  ;;  %v19213_v12 = vand.u32 4294901760, %v3121_v45 }
 0x199   :  { %v5079_v5 = vcombine.high %v5071_v14, %v5071_v14  ;;  %v6068_v20 = vrot.slane %v6065_v18, 4  ;;  %v6078_v35 = vmul.f32 %v6069_v41, %v6042_v61 }
 0x19a   :  { %5085 = vrot.lane.b32.xlu1 %v5072_v17, %s18729_s26  ;;  %2812 = vmatmul.mubr.f32.vlgmr.msra.gmra.mrb[0].mxu1 %v19096_v25  ;;  %v5080_v36 = vcombine.high %v5072_v17, %v5072_v17  ;;  %v19190_v25 = vand.u32 4294901760, %v3117_v27 }
 0x19b   :  { %5083 = vrot.lane.b32.xlu0 %v5079_v5, %s18729_s26  ;;  %2821 = vmatpush1.msra.mxu1 %v19115_v43  ;;  %v6070_v38 = vsel %vm2100_vm8, %v6068_v20, %v6065_v18 }
 0x19c   :  { %2897 = vmatprep.subr.mxu1 %v2661_v34  ;;  %2884 = vmatprep.mubr.f32.mxu1 %v18723_v3  ;;  %v6076_v24 = vmul.f32 %v6070_v38, %v18787_v1  ;;  %v19210_v50 = vsub.f32 %v3117_v27, %v19190_v25  ;;  %v7068_v1 = vcombine.low %v7062_v47, %v7066_v33 }
 0x19d   :  { %2423 = vmatmul.mubr.f32.vlgmr.msra.gmra.mrb[0].mxu0 %v19099_v23  ;;  %v19237_v34 = vsub.f32 %v3121_v45, %v19213_v12 }
 0x19e   :  { %2436 = vmatpush1.msra.mxu0 %v2202_v21  ;;  %5087 = vrot.lane.b32.xlu1 %v5080_v36, %s18729_s26  ;;  %v3115_v21 = vsel %vm71_vm1, %v3108_v39, 0  ;;  %v3203_v42 = vand.u32 4294901760, %v19210_v50  ;;  %v19306_v36 = vld [vmem:[#allocation2 + $0x4] sm:$0xff] }
 0x19f   :  { %5081 = vrot.lane.b32.xlu0 %v5071_v14, %s18729_s26  ;;  %2508 = vmatprep.subr.mxu0 %v19105_v30  ;;  %v6071_v30 = vsel %vm71_vm1, %v6068_v20, %v6069_v41  ;;  %v19227_v46 = vand.u32 4294901760, %v3115_v21  ;;  %v3668_v60 = vand.u32 4294901760, %v19237_v34 }
 0x1a0   :  { %2499 = vmatprep.mubr.f32.mxu0 %v18723_v3  ;;  %v6072_v48 = vsel %vm2100_vm8, %v6071_v30, %v19184_v29  ;;  %v3204_v59 = vsub.f32 %v19210_v50, %v3203_v42 }
 0x1a1   :  { %v19247_v54 = vsub.f32 %v3115_v21, %v19227_v46  ;;  %v6077_v57 = vmul.f32 %v6072_v48, %v18795_v4  ;;  %v3669_v14 = vsub.f32 %v19237_v34, %v3668_v60  ;;  %v18231_v21 = vld [vmem:[%s20683_s1 + $0x10] sm:$0xf] }
 0x1a2   :  { %7069 = vrot.lane.b32.xlu1 %v7067_v31, %s18726_s19  ;;  %2888 = vmatmul.mubr.f32.vlgmr.msra.gmra.mrb[0].mxu1 %v19099_v23  ;;  %v6084_v23 = vcombine.high %v6076_v24, %v6076_v24  ;;  %v3205_v11 = vand.u32 4294901760, %v3204_v59  ;;  %v19315_v31 = vld [vmem:[#allocation2 + $0xc] sm:$0xff] }
 0x1a3   :  { %2901 = vmatpush1.msra.mxu1 %v2667_v53  ;;  %5089 = vrot.lane.b32.xlu0 %v5073_v52, %s18729_s26  ;;  %v3119_v53 = vsel %vm71_vm1, %v3110_v55, 0  ;;  %v3209_v19 = vand.u32 4294901760, %v19247_v54  ;;  %v6085_v63 = vcombine.high %v6077_v57, %v6077_v57  ;;  %v3670_v20 = vand.u32 4294901760, %v3669_v14 }
 0x1a4   :  { %2973 = vmatprep.subr.mxu1 %v19131_v51  ;;  %2964 = vmatprep.mubr.f32.mxu1 %v18723_v3  ;;  %v19244_v51 = vand.u32 4294901760, %v19225_v56  ;;  %v19254_v58 = vand.u32 4294901760, %v3119_v53  ;;  %v4091_v52 = vsel %vm140_vm3, %v18231_v21, 0 }
 0x1a5   :  { %2501 = vmatmul.mubr.f32.vlgmr.msra.gmra.mrb[0].mxu0 %v19093_v22  ;;  %v3210_v15 = vsub.f32 %v19247_v54, %v3209_v19 }
 0x1a6   :  { %2510 = vmatpush1.msra.mxu0 %v19117_v44  ;;  %2573 = vmatprep.mubr.f32.mxu0 %v18723_v3  ;;  %v18238_v44 = vld [vmem:[%s20685_s3 + $0x20] ss:$8 sm:$0xf]  ;;  %v3193_v4 = vsub.f32 %v19225_v56, %v19244_v51 }
 0x1a7   :  { %3124 = vmatprep.subr.mxu0 %v19190_v25  ;;  %7071 = vrot.lane.b32.xlu0 %v7068_v1, %s18726_s19  ;;  %v8059_v62 = vrot.slane %v18238_v44, %v18806_v7  ;;  %v8063_v0 = vrot.slane %v18238_v44, %v18808_v8  ;;  %v8067_v2 = vrot.slane %v18238_v44, %v18810_v9  ;;  %v3211_v26 = vand.u32 4294901760, %v3210_v15 }
 0x1a8   :  { %6088 = vrot.lane.b32.xlu1 %v6084_v23, %s18727_s22  ;;  %v8071_v13 = vrot.slane %v18238_v44, %v18812_v10  ;;  %v3194_v18 = vand.u32 4294901760, %v3193_v4 }
 0x1a9   :  { %v8072_v16 = vcombine.low %v8059_v62, %v8063_v0 }
 0x1aa   :  { %2966 = vmatmul.mubr.f32.vlgmr.msra.gmra.mrb[0].mxu1 %v19093_v22  ;;  %v8073_v5 = vcombine.low %v8067_v2, %v8071_v13 }
 0x1ab   :  { %2975 = vmatpush1.msra.mxu1 %v19115_v43  ;;  %3038 = vmatprep.mubr.f32.mxu1 %v18723_v3  ;;  %v19272_v43 = vsub.f32 %v3119_v53, %v19254_v58 }
 0x1ac   :  { %3589 = vmatprep.subr.mxu1 %v19213_v12  ;;  %6090 = vrot.lane.b32.xlu0 %v6077_v57, %s18727_s22 }
 0x1ad   :  { %2575 = vmatmul.mubr.f32.vlgmr.msra.gmra.mrb[0].mxu0 %v19093_v22  ;;  %6086 = vrot.lane.b32.xlu1 %v6076_v24, %s18727_s22  ;;  %v3674_v17 = vand.u32 4294901760, %v19272_v43 }
 0x1ae   :  { %3126 = vmatpush1.msra.mxu0 %v19227_v46  ;;  %3189 = vmatprep.mubr.f32.mxu0 %v18723_v3 }
 0x1af   :  { %3206 = vmatprep.subr.mxu0 %v3205_v11  ;;  %v3675_v27 = vsub.f32 %v19272_v43, %v3674_v17 }
 0x1b0   :  { %6092 = vrot.lane.b32.xlu0 %v6085_v63, %s18727_s22 }
 0x1b1   :  { %6094 = vrot.lane.b32.xlu1 %v6078_v35, %s18727_s22  ;;  %v3676_v29 = vand.u32 4294901760, %v3675_v27 }
 0x1b2   :  { %3040 = vmatmul.mubr.f32.vlgmr.msra.gmra.mrb[0].mxu1 %v19093_v22  ;;  %v18230_v22 = vld [vmem:[%s20685_s3 + $0x4] ss:$8 sm:$0xf] }
 0x1b3   :  { %3591 = vmatpush1.msra.mxu1 %v19254_v58  ;;  %3654 = vmatprep.mubr.f32.mxu1 %v18723_v3  ;;  %v4065_v28 = vrot.slane %v18230_v22, %v18806_v7  ;;  %v4069_v6 = vrot.slane %v18230_v22, %v18808_v8  ;;  %v4073_v37 = vrot.slane %v18230_v22, %v18810_v9 }
 0x1b4   :  { %3671 = vmatprep.subr.mxu1 %v3670_v20  ;;  %8074 = vrot.lane.b32.xlu0 %v8072_v16, %s18728_s25  ;;  %v4077_v38 = vrot.slane %v18230_v22, %v18812_v10 }
 0x1b5   :  { %3195 = vmatmul.mubr.f32.vlgmr.msra.gmra.mrb[0].mxu0 %v3194_v18  ;;  %8076 = vrot.lane.b32.xlu1 %v8073_v5, %s18728_s25  ;;  %v4078_v32 = vcombine.low %v4065_v28, %v4069_v6 }
 0x1b6   :  { %3212 = vmatpush1.msra.mxu0 %v3211_v26  ;;  %3275 = vmatprep.mubr.f32.mxu0 %v18723_v3  ;;  %v4079_v40 = vcombine.low %v4073_v37, %v4077_v38 }
 0x1b7   :  { %3285 = vmatprep.subr.mxu0 %v19210_v50  ;;  %v4082_v39 = vmul.f32 %v4078_v32, %v19306_v36 }
 0x1b8   :  { %v4083_v45 = vmul.f32 %v4079_v40, %v19315_v31 }
 0x1b9   :  { %v4088_v41 = vcombine.high %v4082_v39, %v4082_v39  ;;  %v4093_v30 = vsel %vm71_vm1, %v4082_v39, 0 }
 0x1ba   :  { %3660 = vmatmul.mubr.f32.vlgmr.msra.gmra.mrb[0].mxu1 %v3194_v18  ;;  %v4089_v33 = vcombine.high %v4083_v45, %v4083_v45  ;;  %v19353_v23 = vand.u32 4294901760, %v4093_v30 }
 0x1bb   :  { %3677 = vmatpush1.msra.mxu1 %v3676_v29  ;;  %3740 = vmatprep.mubr.f32.mxu1 %v18723_v3  ;;  %v4095_v47 = vsel %vm71_vm1, %v4088_v41, 0 }
 0x1bc   :  { %3750 = vmatprep.subr.mxu1 %v19237_v34  ;;  %v19330_v24 = vand.u32 4294901760, %v4095_v47  ;;  %v4099_v50 = vsel %vm71_vm1, %v4089_v33, 0  ;;  %v4186_v34 = vsub.f32 %v4093_v30, %v19353_v23 }
 0x1bd   :  { %3277 = vmatmul.mubr.f32.vlgmr.msra.gmra.mrb[0].mxu0 %v19205_v49  ;;  %v19348_v1 = vand.u32 4294901760, %v4099_v50 }
 0x1be   :  { %3288 = vmatpush1.msra.mxu0 %v19247_v54  ;;  %3351 = vmatprep.mubr.f32.mxu0 %v18723_v3  ;;  %v19346_v55 = vsub.f32 %v4095_v47, %v19330_v24  ;;  %v4187_v44 = vand.u32 4294901760, %v4186_v34 }
 0x1bf   :  { %3361 = vmatprep.subr.mxu0 %v19190_v25  ;;  %v4645_v48 = vsub.f32 %v4099_v50, %v19348_v1 }
 0x1c0   :  { %v4188_v4 = vsub.f32 %v4186_v34, %v4187_v44 }
 0x1c1   :  { %v4646_v54 = vand.u32 4294901760, %v4645_v48 }
 0x1c2   :  { %3742 = vmatmul.mubr.f32.vlgmr.msra.gmra.mrb[0].mxu1 %v19205_v49  ;;  %v4189_v63 = vand.u32 4294901760, %v4188_v4 }
 0x1c3   :  { %3753 = vmatpush1.msra.mxu1 %v19272_v43  ;;  %3816 = vmatprep.mubr.f32.mxu1 %v18723_v3 }
 0x1c4   :  { %3826 = vmatprep.subr.mxu1 %v19213_v12 }
 0x1c5   :  { %3354 = vmatmul.mubr.f32.vlgmr.msra.gmra.mrb[0].mxu0 %v19225_v56 }
 0x1c6   :  { %3363 = vmatpush1.msra.mxu0 %v19227_v46  ;;  %3426 = vmatprep.mubr.f32.mxu0 %v18723_v3 }
 0x1c7   :  { %3439 = vmatprep.subr.mxu0 %v3203_v42  ;;  %v4097_v42 = vsel %vm71_vm1, %v4083_v45, 0 }
 0x1ca   :  { %3819 = vmatmul.mubr.f32.vlgmr.msra.gmra.mrb[0].mxu1 %v19225_v56  ;;  %v19350_v56 = vand.u32 4294901760, %v4091_v52 }
 0x1cb   :  { %3828 = vmatpush1.msra.mxu1 %v19254_v58  ;;  %3891 = vmatprep.mubr.f32.mxu1 %v18723_v3 }
 0x1cc   :  { %3904 = vmatprep.subr.mxu1 %v3668_v60  ;;  %v4169_v53 = vsub.f32 %v4091_v52, %v19350_v56  ;;  %v4647_v60 = vsub.f32 %v4645_v48, %v4646_v54 }
 0x1cd   :  { %3430 = vmatmul.mubr.f32.vlgmr.msra.gmra.mrb[0].mxu0 %v19244_v51 }
 0x1ce   :  { %3443 = vmatpush1.msra.mxu0 %v3209_v19  ;;  %3506 = vmatprep.mubr.f32.mxu0 %v18723_v3  ;;  %v4170_v57 = vand.u32 4294901760, %v4169_v53  ;;  %v4648_v19 = vand.u32 4294901760, %v4647_v60 }
 0x1cf   :  { %3515 = vmatprep.subr.mxu0 %v19190_v25  ;;  %v4181_v25 = vand.u32 4294901760, %v19346_v55 }
 0x1d0   :  { %v4171_v61 = vsub.f32 %v4169_v53, %v4170_v57 }
 0x1d2   :  { %3895 = vmatmul.mubr.f32.vlgmr.msra.gmra.mrb[0].mxu1 %v19244_v51  ;;  %v19368_v51 = vand.u32 4294901760, %v4097_v42 }
 0x1d3   :  { %3908 = vmatpush1.msra.mxu1 %v3674_v17  ;;  %3971 = vmatprep.mubr.f32.mxu1 %v18723_v3 }
 0x1d4   :  { %3980 = vmatprep.subr.mxu1 %v19213_v12  ;;  %v4182_v12 = vsub.f32 %v19346_v55, %v4181_v25 }
 0x1d5   :  { %3508 = vmatmul.mubr.f32.vlgmr.msra.gmra.mrb[0].mxu0 %v19205_v49 }
 0x1d6   :  { %3517 = vmatpush1.msra.mxu0 %v19227_v46  ;;  %3580 = vmatprep.mubr.f32.mxu0 %v18723_v3  ;;  %v4651_v46 = vsub.f32 %v4097_v42, %v19368_v51  ;;  %v4183_v59 = vand.u32 4294901760, %v4182_v12 }
 0x1d7   :  { %4102 = vmatprep.subr.mxu0 %v19330_v24 }
 0x1d8   :  { %v4652_v62 = vand.u32 4294901760, %v4651_v46 }
 0x1da   :  { %3973 = vmatmul.mubr.f32.vlgmr.msra.gmra.mrb[0].mxu1 %v19205_v49  ;;  %v4653_v0 = vsub.f32 %v4651_v46, %v4652_v62 }
 0x1db   :  { %3982 = vmatpush1.msra.mxu1 %v19254_v58  ;;  %4045 = vmatprep.mubr.f32.mxu1 %v18723_v3  ;;  %v4172_v58 = vand.u32 4294901760, %v4171_v61 }
 0x1dc   :  { %4567 = vmatprep.subr.mxu1 %v19348_v1  ;;  %v4654_v2 = vand.u32 4294901760, %v4653_v0 }
 0x1dd   :  { %3582 = vmatmul.mubr.f32.vlgmr.msra.gmra.mrb[0].mxu0 %v19205_v49 }
 0x1de   :  { %4104 = vmatpush1.msra.mxu0 %v19353_v23  ;;  %4167 = vmatprep.mubr.f32.mxu0 %v18723_v3 }
 0x1df   :  { %4184 = vmatprep.subr.mxu0 %v4183_v59 }
 0x1e2   :  { %4047 = vmatmul.mubr.f32.vlgmr.msra.gmra.mrb[0].mxu1 %v19205_v49  ;;  %v18233_v49 = vld [vmem:[%s20683_s1 + $0x14] sm:$0xf] }
 0x1e3   :  { %4569 = vmatpush1.msra.mxu1 %v19368_v51  ;;  %4632 = vmatprep.mubr.f32.mxu1 %v18723_v3  ;;  %v5096_v43 = vsel %vm140_vm3, %v18233_v49, 0 }
 0x1e4   :  { %4649 = vmatprep.subr.mxu1 %v4648_v19  ;;  %v19402_v11 = vand.u32 4294901760, %v5096_v43 }
 0x1e5   :  { %4173 = vmatmul.mubr.f32.vlgmr.msra.gmra.mrb[0].mxu0 %v4172_v58 }
 0x1e6   :  { %4190 = vmatpush1.msra.mxu0 %v4189_v63  ;;  %4253 = vmatprep.mubr.f32.mxu0 %v18723_v3  ;;  %v19409_v35 = vsub.f32 %v5096_v43, %v19402_v11 }
 0x1e7   :  { %4263 = vmatprep.subr.mxu0 %v19346_v55 }
 0x1e8   :  { %v19415_v13 = vand.u32 4294901760, %v19409_v35 }
 0x1ea   :  { %4638 = vmatmul.mubr.f32.vlgmr.msra.gmra.mrb[0].mxu1 %v4172_v58  ;;  %v5176_v18 = vsub.f32 %v19409_v35, %v19415_v13 }
 0x1eb   :  { %4655 = vmatpush1.msra.mxu1 %v4654_v2  ;;  %4718 = vmatprep.mubr.f32.mxu1 %v18723_v3 }
 0x1ec   :  { %4728 = vmatprep.subr.mxu1 %v4645_v48  ;;  %v5177_v37 = vand.u32 4294901760, %v5176_v18 }
 0x1ed   :  { %4255 = vmatmul.mubr.f32.vlgmr.msra.gmra.mrb[0].mxu0 %v19350_v56 }
 0x1ee   :  { %4266 = vmatpush1.msra.mxu0 %v4186_v34  ;;  %4329 = vmatprep.mubr.f32.mxu0 %v18723_v3 }
 0x1ef   :  { %4339 = vmatprep.subr.mxu0 %v19330_v24 }
 0x1f2   :  { %4720 = vmatmul.mubr.f32.vlgmr.msra.gmra.mrb[0].mxu1 %v19350_v56 }
 0x1f3   :  { %4731 = vmatpush1.msra.mxu1 %v4651_v46  ;;  %4794 = vmatprep.mubr.f32.mxu1 %v18723_v3 }
 0x1f4   :  { %4804 = vmatprep.subr.mxu1 %v19348_v1 }
 0x1f5   :  { %4332 = vmatmul.mubr.f32.vlgmr.msra.gmra.mrb[0].mxu0 %v4169_v53 }
 0x1f6   :  { %4341 = vmatpush1.msra.mxu0 %v19353_v23  ;;  %4404 = vmatprep.mubr.f32.mxu0 %v18723_v3 }
 0x1f7   :  { %4417 = vmatprep.subr.mxu0 %v4181_v25 }
 0x1fa   :  { %4797 = vmatmul.mubr.f32.vlgmr.msra.gmra.mrb[0].mxu1 %v4169_v53 }
 0x1fb   :  { %4806 = vmatpush1.msra.mxu1 %v19368_v51  ;;  %4869 = vmatprep.mubr.f32.mxu1 %v18723_v3 }
 0x1fc   :  { %4882 = vmatprep.subr.mxu1 %v4646_v54 }
 0x1fd   :  { %4408 = vmatmul.mubr.f32.vlgmr.msra.gmra.mrb[0].mxu0 %v4170_v57 }
 0x1fe   :  { %4421 = vmatpush1.msra.mxu0 %v4187_v44  ;;  %4484 = vmatprep.mubr.f32.mxu0 %v18723_v3 }
 0x1ff   :  { %4493 = vmatprep.subr.mxu0 %v19330_v24 }
 0x202   :  { %4873 = vmatmul.mubr.f32.vlgmr.msra.gmra.mrb[0].mxu1 %v4170_v57 }
 0x203   :  { %4886 = vmatpush1.msra.mxu1 %v4652_v62  ;;  %4949 = vmatprep.mubr.f32.mxu1 %v18723_v3  ;;  %v7047_v62 = vld [vmem:[#allocation2 + $0x14] sm:$0xf] }
 0x204   :  { %4958 = vmatprep.subr.mxu1 %v19348_v1 }
 0x205   :  { %4486 = vmatmul.mubr.f32.vlgmr.msra.gmra.mrb[0].mxu0 %v19350_v56 }
 0x206   :  { %4495 = vmatpush1.msra.mxu0 %v19353_v23  ;;  %4558 = vmatprep.mubr.f32.mxu0 %v18723_v3 }
 0x20a   :  { %4951 = vmatmul.mubr.f32.vlgmr.msra.gmra.mrb[0].mxu1 %v19350_v56 }
 0x20b   :  { %4960 = vmatpush1.msra.mxu1 %v19368_v51  ;;  %5023 = vmatprep.mubr.f32.mxu1 %v18723_v3 }
 0x20c   :  { %v5086_v14 = vpop.permute.xlu1 %5085 }
 0x20d   :  { %v5084_v15 = vpop.permute.xlu0 %5083  ;;  %4560 = vmatmul.mubr.f32.vlgmr.msra.gmra.mrb[0].mxu0 %v19350_v56 }
 0x20e   :  { %v5092_v16 = vsel %vm3080_vm6, %v5084_v15, %v5086_v14  ;;  %5172 = vmatprep.mubr.f32.mxu0 %v18723_v3 }
 0x20f   :  { %v5100_v17 = vsel %vm71_vm1, %v5092_v16, 0 }
 0x210   :  { %v19423_v5 = vand.u32 4294901760, %v5100_v17  ;;  %v5088_v20 = vpop.permute.xlu1 %5087 }
 0x211   :  { %v5093_v26 = vsel %vm3080_vm6, %v5086_v14, %v5088_v20  ;;  %v5082_v27 = vpop.permute.xlu0 %5081 }
 0x212   :  { %v19427_v22 = vsub.f32 %v5100_v17, %v19423_v5  ;;  %v5102_v28 = vsel %vm71_vm1, %v5093_v26, 0  ;;  %v5091_v6 = vsel %vm3080_vm6, %v5082_v27, %v5084_v15  ;;  %5107 = vmatprep.subr.mxu0 %v19423_v5  ;;  %5025 = vmatmul.mubr.f32.vlgmr.msra.gmra.mrb[0].mxu1 %v19350_v56 }
 0x213   :  { %v19433_v29 = vand.u32 4294901760, %v5102_v28  ;;  %v5098_v32 = vsel %vm71_vm1, %v5091_v6, 0  ;;  %5637 = vmatprep.mubr.f32.mxu1 %v18723_v3 }
 0x214   :  { %v19437_v38 = vand.u32 4294901760, %v5098_v32  ;;  %v7070_v39 = vpop.permute.xlu1 %7069  ;;  %v5186_v40 = vand.u32 4294901760, %v19427_v22 }
 0x215   :  { %v19441_v41 = vsub.f32 %v5102_v28, %v19433_v29  ;;  %v7073_v45 = vrot.slane %v7070_v39, 4  ;;  %v5090_v47 = vpop.permute.xlu0 %5089 }
 0x216   :  { %v19444_v33 = vsub.f32 %v5098_v32, %v19437_v38  ;;  %v5094_v24 = vsel %vm3080_vm6, %v5088_v20, %v5090_v47  ;;  %5109 = vmatpush1.msra.mxu0 %v19437_v38  ;;  %v5187_v21 = vsub.f32 %v19427_v22, %v5186_v40 }
 0x217   :  { %v7075_v50 = vsel %vm135_vm4, %v7073_v45, %v7070_v39  ;;  %v5104_v52 = vsel %vm71_vm1, %v5094_v24, 0  ;;  %5178 = vmatmul.mubr.f32.vlgmr.msra.gmra.mrb[0].mxu0 %v5177_v37  ;;  %v5657_v23 = vand.u32 4294901760, %v19441_v41 }
 0x218   :  { %v5192_v30 = vand.u32 4294901760, %v19444_v33  ;;  %v7081_v55 = vmul.f32 %v7075_v50, %v19306_v36  ;;  %v19455_v1 = vand.u32 4294901760, %v5104_v52  ;;  %v5188_v56 = vand.u32 4294901760, %v5187_v21  ;;  %5258 = vmatprep.mubr.f32.mxu0 %v18723_v3 }
 0x219   :  { %v7072_v25 = vpop.permute.xlu0 %7071  ;;  %v5658_v46 = vsub.f32 %v19441_v41, %v5657_v23 }
 0x21a   :  { %v19460_v42 = vsub.f32 %v5104_v52, %v19455_v1  ;;  %v7074_v48 = vrot.slane %v7072_v25, 4  ;;  %5189 = vmatprep.subr.mxu0 %v5188_v56  ;;  %5572 = vmatprep.subr.mxu1 %v19455_v1  ;;  %v7089_v53 = vcombine.high %v7081_v55, %v7081_v55  ;;  %v5193_v34 = vsub.f32 %v19444_v33, %v5192_v30  ;;  %v19466_v51 = vpop.permute.xlu1 %6088 }
 0x21b   :  { %5574 = vmatpush1.msra.mxu1 %v19433_v29  ;;  %v5659_v58 = vand.u32 4294901760, %v5658_v46 }
 0x21c   :  { %v7076_v12 = vsel %vm71_vm1, %v7073_v45, %v7074_v48  ;;  %5643 = vmatmul.mubr.f32.vlgmr.msra.gmra.mrb[0].mxu1 %v5177_v37  ;;  %7093 = vrot.lane.b32.xlu0 %v7089_v53, %s18724_s17  ;;  %v5194_v54 = vand.u32 4294901760, %v5193_v34  ;;  %v5651_v57 = vand.u32 4294901760, %v19460_v42  ;;  %v7083_v0 = vmul.f32 %v7074_v48, %v7047_v62 }
 0x21d   :  { %v7077_v44 = vsel %vm135_vm4, %v7076_v12, %v7072_v25  ;;  %5723 = vmatprep.mubr.f32.mxu1 %v18723_v3 }
 0x21e   :  { %v7082_v59 = vmul.f32 %v7077_v44, %v19315_v31  ;;  %5195 = vmatpush1.msra.mxu0 %v5194_v54  ;;  %v5652_v60 = vsub.f32 %v19460_v42, %v5651_v57  ;;  %v19479_v61 = vpop.permute.xlu0 %6090 }
 0x21f   :  { %5260 = vmatmul.mubr.f32.vlgmr.msra.gmra.mrb[0].mxu0 %v19402_v11  ;;  %5268 = vmatprep.subr.mxu0 %v19427_v22  ;;  %v6087_v4 = vpop.permute.xlu1 %6086  ;;  %v6097_v14 = vsel %vm2073_vm5, %v19466_v51, %v19479_v61  ;;  %v18235_v22 = vld [vmem:[%s20683_s1 + $0x18] sm:$0xf] }
 0x220   :  { %5271 = vmatpush1.msra.mxu0 %v19444_v33  ;;  %7095 = vrot.lane.b32.xlu1 %v7082_v59, %s18724_s17  ;;  %v5653_v19 = vand.u32 4294901760, %v5652_v60  ;;  %v7090_v2 = vcombine.high %v7082_v59, %v7082_v59  ;;  %v6105_v20 = vsel %vm71_vm1, %v6097_v14, 0  ;;  %v6096_v39 = vsel %vm2073_vm5, %v6087_v4, %v19466_v51 }
 0x221   :  { %7091 = vrot.lane.b32.xlu0 %v7081_v55, %s18724_s17  ;;  %5344 = vmatprep.subr.mxu0 %v19423_v5  ;;  %v19511_v37 = vand.u32 4294901760, %v6105_v20  ;;  %v6103_v33 = vsel %vm71_vm1, %v6096_v39, 0 }
 0x222   :  { %5654 = vmatprep.subr.mxu1 %v5653_v19  ;;  %5334 = vmatprep.mubr.f32.mxu0 %v18723_v3  ;;  %v6093_v63 = vpop.permute.xlu0 %6092 }
 0x223   :  { %5660 = vmatpush1.msra.mxu1 %v5659_v58  ;;  %v6095_v49 = vpop.permute.xlu1 %6094  ;;  %v19528_v45 = vsub.f32 %v6105_v20, %v19511_v37  ;;  %v6098_v52 = vsel %vm2073_vm5, %v19479_v61, %v6093_v63 }
 0x224   :  { %5725 = vmatmul.mubr.f32.vlgmr.msra.gmra.mrb[0].mxu1 %v19402_v11  ;;  %5733 = vmatprep.subr.mxu1 %v19460_v42  ;;  %v6107_v55 = vsel %vm71_vm1, %v6098_v52, 0 }
 0x225   :  { %7097 = vrot.lane.b32.xlu1 %v7090_v2, %s18724_s17  ;;  %7099 = vrot.lane.b32.xlu0 %v7083_v0, %s18724_s17 }
 0x226   :  { %5736 = vmatpush1.msra.mxu1 %v19441_v41  ;;  %5799 = vmatprep.mubr.f32.mxu1 %v18723_v3  ;;  %v8075_v43 = vpop.permute.xlu0 %8074 }
 0x227   :  { %5809 = vmatprep.subr.mxu1 %v19455_v1  ;;  %5337 = vmatmul.mubr.f32.vlgmr.msra.gmra.mrb[0].mxu0 %v19409_v35  ;;  %v8078_v15 = vrot.slane %v8075_v43, 4  ;;  %v8077_v16 = vpop.permute.xlu1 %8076 }
 0x228   :  { %5346 = vmatpush1.msra.mxu0 %v19437_v38  ;;  %5409 = vmatprep.mubr.f32.mxu0 %v18723_v3  ;;  %v8079_v17 = vrot.slane %v8077_v16, 4 }
 0x229   :  { %5422 = vmatprep.subr.mxu0 %v5186_v40  ;;  %v8080_v18 = vsel %vm1097_vm7, %v8078_v15, %v8075_v43  ;;  %v6101_v40 = vsel %vm140_vm3, %v18235_v22, 0 }
 0x22a   :  { %v8086_v26 = vmul.f32 %v8080_v18, %v19306_v36  ;;  %v8081_v27 = vsel %vm71_vm1, %v8078_v15, %v8079_v17  ;;  %v6099_v36 = vsel %vm2073_vm5, %v6093_v63, %v6095_v49  ;;  %v19534_v21 = vand.u32 4294901760, %v6101_v40 }
 0x22b   :  { %v8082_v28 = vsel %vm1097_vm7, %v8081_v27, %v8077_v16  ;;  %v6109_v47 = vsel %vm71_vm1, %v6099_v36, 0 }
 0x22c   :  { %5802 = vmatmul.mubr.f32.vlgmr.msra.gmra.mrb[0].mxu1 %v19409_v35  ;;  %v8087_v6 = vmul.f32 %v8082_v28, %v19315_v31  ;;  %v8094_v32 = vcombine.high %v8086_v26, %v8086_v26  ;;  %v8052_v35 = vld [vmem:[#allocation2 + $0x14] sm:$0xf]  ;;  %v19538_v50 = vand.u32 4294901760, %v6109_v47 }
 0x22d   :  { %5811 = vmatpush1.msra.mxu1 %v19433_v29  ;;  %5874 = vmatprep.mubr.f32.mxu1 %v18723_v3  ;;  %v8088_v24 = vmul.f32 %v8079_v17, %v8052_v35 }
 0x22e   :  { %5887 = vmatprep.subr.mxu1 %v5651_v57  ;;  %8098 = vrot.lane.b32.xlu1 %v8094_v32, %s18725_s18  ;;  %v8095_v31 = vcombine.high %v8087_v6, %v8087_v6  ;;  %v6655_v56 = vsub.f32 %v6109_v47, %v19538_v50 }
 0x22f   :  { %5413 = vmatmul.mubr.f32.vlgmr.msra.gmra.mrb[0].mxu0 %v19415_v13  ;;  %8100 = vrot.lane.b32.xlu0 %v8087_v6, %s18725_s18 }
 0x230   :  { %5426 = vmatpush1.msra.mxu0 %v5192_v30  ;;  %5489 = vmatprep.mubr.f32.mxu0 %v18723_v3  ;;  %v19546_v30 = vand.u32 4294901760, %v6103_v33  ;;  %v6656_v42 = vand.u32 4294901760, %v6655_v56 }
 0x231   :  { %5498 = vmatprep.subr.mxu0 %v19423_v5  ;;  %v6191_v5 = vand.u32 4294901760, %v19528_v45 }
 0x232   :  { %8096 = vrot.lane.b32.xlu1 %v8086_v26, %s18725_s18  ;;  %v6657_v51 = vsub.f32 %v6655_v56, %v6656_v42 }
 0x233   :  { %8102 = vrot.lane.b32.xlu0 %v8095_v31, %s18725_s18  ;;  %v6192_v41 = vsub.f32 %v19528_v45, %v6191_v5 }
 0x234   :  { %5878 = vmatmul.mubr.f32.vlgmr.msra.gmra.mrb[0].mxu1 %v19415_v13  ;;  %v6179_v13 = vsub.f32 %v6101_v40, %v19534_v21 }
 0x235   :  { %5891 = vmatpush1.msra.mxu1 %v5657_v23  ;;  %5954 = vmatprep.mubr.f32.mxu1 %v18723_v3  ;;  %v6578_v23 = vand.u32 4294901760, %v6107_v55  ;;  %v6193_v48 = vand.u32 4294901760, %v6192_v41 }
 0x236   :  { %5963 = vmatprep.subr.mxu1 %v19455_v1  ;;  %8104 = vrot.lane.b32.xlu1 %v8088_v24, %s18725_s18  ;;  %v6196_v1 = vsub.f32 %v6103_v33, %v19546_v30  ;;  %v6180_v25 = vand.u32 4294901760, %v6179_v13 }
 0x237   :  { %5491 = vmatmul.mubr.f32.vlgmr.msra.gmra.mrb[0].mxu0 %v19402_v11 }
 0x238   :  { %5500 = vmatpush1.msra.mxu0 %v19437_v38  ;;  %5563 = vmatprep.mubr.f32.mxu0 %v18723_v3  ;;  %v6197_v53 = vand.u32 4294901760, %v6196_v1  ;;  %v6661_v38 = vsub.f32 %v6107_v55, %v6578_v23  ;;  %v6181_v34 = vsub.f32 %v6179_v13, %v6180_v25 }
 0x239   :  { %6112 = vmatprep.subr.mxu0 %v19511_v37 }
 0x23a   :  { %v6198_v12 = vsub.f32 %v6196_v1, %v6197_v53  ;;  %v6662_v54 = vand.u32 4294901760, %v6661_v38  ;;  %v6182_v57 = vand.u32 4294901760, %v6181_v34 }
 0x23c   :  { %5956 = vmatmul.mubr.f32.vlgmr.msra.gmra.mrb[0].mxu1 %v19402_v11  ;;  %v6199_v44 = vand.u32 4294901760, %v6198_v12  ;;  %v6663_v46 = vsub.f32 %v6661_v38, %v6662_v54 }
 0x23d   :  { %5965 = vmatpush1.msra.mxu1 %v19433_v29  ;;  %6028 = vmatprep.mubr.f32.mxu1 %v18723_v3  ;;  %v6658_v29 = vand.u32 4294901760, %v6657_v51 }
 0x23e   :  { %6577 = vmatprep.subr.mxu1 %v19538_v50  ;;  %v6664_v59 = vand.u32 4294901760, %v6663_v46 }
 0x23f   :  { %5565 = vmatmul.mubr.f32.vlgmr.msra.gmra.mrb[0].mxu0 %v19402_v11 }
 0x240   :  { %6114 = vmatpush1.msra.mxu0 %v19546_v30  ;;  %6177 = vmatprep.mubr.f32.mxu0 %v18723_v3 }
 0x241   :  { %6194 = vmatprep.subr.mxu0 %v6193_v48 }
 0x244   :  { %6030 = vmatmul.mubr.f32.vlgmr.msra.gmra.mrb[0].mxu1 %v19402_v11  ;;  %v18237_v11 = vld [vmem:[%s20683_s1 + $0x1c] sm:$0xf] }
 0x245   :  { %6579 = vmatpush1.msra.mxu1 %v6578_v23  ;;  %6642 = vmatprep.mubr.f32.mxu1 %v18723_v3  ;;  %v7106_v60 = vsel %vm140_vm3, %v18237_v11, 0 }
 0x246   :  { %6659 = vmatprep.subr.mxu1 %v6658_v29  ;;  %v19597_v61 = vand.u32 4294901760, %v7106_v60 }
 0x247   :  { %6183 = vmatmul.mubr.f32.vlgmr.msra.gmra.mrb[0].mxu0 %v6182_v57 }
 0x248   :  { %6200 = vmatpush1.msra.mxu0 %v6199_v44  ;;  %6263 = vmatprep.mubr.f32.mxu0 %v18723_v3  ;;  %v19600_v4 = vsub.f32 %v7106_v60, %v19597_v61 }
 0x249   :  { %6273 = vmatprep.subr.mxu0 %v19528_v45 }
 0x24a   :  { %v19603_v62 = vand.u32 4294901760, %v19600_v4 }
 0x24c   :  { %6648 = vmatmul.mubr.f32.vlgmr.msra.gmra.mrb[0].mxu1 %v6182_v57  ;;  %v7186_v58 = vsub.f32 %v19600_v4, %v19603_v62 }
 0x24d   :  { %6665 = vmatpush1.msra.mxu1 %v6664_v59  ;;  %6728 = vmatprep.mubr.f32.mxu1 %v18723_v3 }
 0x24e   :  { %6738 = vmatprep.subr.mxu1 %v6655_v56  ;;  %v7187_v16 = vand.u32 4294901760, %v7186_v58 }
 0x24f   :  { %6265 = vmatmul.mubr.f32.vlgmr.msra.gmra.mrb[0].mxu0 %v19534_v21 }
 0x250   :  { %6276 = vmatpush1.msra.mxu0 %v6196_v1  ;;  %6339 = vmatprep.mubr.f32.mxu0 %v18723_v3 }
 0x251   :  { %6349 = vmatprep.subr.mxu0 %v19511_v37 }
 0x254   :  { %6730 = vmatmul.mubr.f32.vlgmr.msra.gmra.mrb[0].mxu1 %v19534_v21 }
 0x255   :  { %6741 = vmatpush1.msra.mxu1 %v6661_v38  ;;  %6804 = vmatprep.mubr.f32.mxu1 %v18723_v3  ;;  %v18239_v38 = vld [vmem:[%s20683_s1 + $0x20] sm:$0xf] }
 0x256   :  { %6814 = vmatprep.subr.mxu1 %v19538_v50  ;;  %v8111_v12 = vsel %vm140_vm3, %v18239_v38, 0 }
 0x257   :  { %6342 = vmatmul.mubr.f32.vlgmr.msra.gmra.mrb[0].mxu0 %v6179_v13  ;;  %v19665_v44 = vand.u32 4294901760, %v8111_v12 }
 0x258   :  { %6351 = vmatpush1.msra.mxu0 %v19546_v30  ;;  %6414 = vmatprep.mubr.f32.mxu0 %v18723_v3 }
 0x259   :  { %6427 = vmatprep.subr.mxu0 %v6191_v5 }
 0x25c   :  { %6807 = vmatmul.mubr.f32.vlgmr.msra.gmra.mrb[0].mxu1 %v6179_v13 }
 0x25d   :  { %6816 = vmatpush1.msra.mxu1 %v6578_v23  ;;  %6879 = vmatprep.mubr.f32.mxu1 %v18723_v3 }
 0x25e   :  { %6892 = vmatprep.subr.mxu1 %v6656_v42 }
 0x25f   :  { %6418 = vmatmul.mubr.f32.vlgmr.msra.gmra.mrb[0].mxu0 %v6180_v25 }
 0x260   :  { %6431 = vmatpush1.msra.mxu0 %v6197_v53  ;;  %6494 = vmatprep.mubr.f32.mxu0 %v18723_v3 }
 0x261   :  { %6503 = vmatprep.subr.mxu0 %v19511_v37 }
 0x264   :  { %6883 = vmatmul.mubr.f32.vlgmr.msra.gmra.mrb[0].mxu1 %v6180_v25 }
 0x265   :  { %6896 = vmatpush1.msra.mxu1 %v6662_v54  ;;  %6959 = vmatprep.mubr.f32.mxu1 %v18723_v3 }
 0x266   :  { %6968 = vmatprep.subr.mxu1 %v19538_v50 }
 0x267   :  { %6496 = vmatmul.mubr.f32.vlgmr.msra.gmra.mrb[0].mxu0 %v19534_v21 }
 0x268   :  { %6505 = vmatpush1.msra.mxu0 %v19546_v30  ;;  %6568 = vmatprep.mubr.f32.mxu0 %v18723_v3 }
 0x26c   :  { %6961 = vmatmul.mubr.f32.vlgmr.msra.gmra.mrb[0].mxu1 %v19534_v21 }
 0x26d   :  { %6970 = vmatpush1.msra.mxu1 %v6578_v23  ;;  %7033 = vmatprep.mubr.f32.mxu1 %v18723_v3 }
 0x26f   :  { %6570 = vmatmul.mubr.f32.vlgmr.msra.gmra.mrb[0].mxu0 %v19534_v21 }
 0x270   :  { %7182 = vmatprep.mubr.f32.mxu0 %v18723_v3 }
 0x274   :  { %7035 = vmatmul.mubr.f32.vlgmr.msra.gmra.mrb[0].mxu1 %v19534_v21 }
 0x275   :  { %7647 = vmatprep.mubr.f32.mxu1 %v18723_v3 }
 0x28e   :  { %v7094_v19 = vpop.permute.xlu0 %7093 }
 0x292   :  { %v7096_v63 = vpop.permute.xlu1 %7095 }
 0x293   :  { %v7092_v0 = vpop.permute.xlu0 %7091  ;;  %v7102_v2 = vsel %vm108_vm0, %v7094_v19, %v7096_v63 }
 0x294   :  { %v7101_v49 = vsel %vm108_vm0, %v7092_v0, %v7094_v19  ;;  %v7110_v43 = vsel %vm71_vm1, %v7102_v2, 0 }
 0x295   :  { %v7108_v14 = vsel %vm71_vm1, %v7101_v49, 0  ;;  %v19611_v15 = vand.u32 4294901760, %v7110_v43 }
 0x296   :  { %v19613_v17 = vand.u32 4294901760, %v7108_v14 }
 0x297   :  { %v7195_v18 = vsub.f32 %v7110_v43, %v19611_v15  ;;  %v7100_v20 = vpop.permute.xlu0 %7099  ;;  %v7098_v26 = vpop.permute.xlu1 %7097  ;;  %7117 = vmatprep.subr.mxu0 %v19611_v15 }
 0x298   :  { %v7201_v27 = vsub.f32 %v7108_v14, %v19613_v17  ;;  %v7103_v28 = vsel %vm108_vm0, %v7096_v63, %v7098_v26  ;;  %v7104_v6 = vsel %vm108_vm0, %v7098_v26, %v7100_v20  ;;  %7119 = vmatpush1.msra.mxu0 %v19613_v17 }
 0x299   :  { %v7112_v32 = vsel %vm71_vm1, %v7103_v28, 0  ;;  %v7114_v37 = vsel %vm71_vm1, %v7104_v6, 0  ;;  %7188 = vmatmul.mubr.f32.vlgmr.msra.gmra.mrb[0].mxu0 %v7187_v16  ;;  %v7196_v22 = vand.u32 4294901760, %v7195_v18 }
 0x29a   :  { %v7202_v36 = vand.u32 4294901760, %v7201_v27  ;;  %v19623_v35 = vand.u32 4294901760, %v7114_v37  ;;  %v19625_v31 = vand.u32 4294901760, %v7112_v32  ;;  %7268 = vmatprep.mubr.f32.mxu0 %v18723_v3 }
 0x29b   :  { %v7197_v39 = vsub.f32 %v7195_v18, %v7196_v22 }
 0x29c   :  { %v7660_v40 = vsub.f32 %v7114_v37, %v19623_v35  ;;  %v7666_v45 = vsub.f32 %v7112_v32, %v19625_v31  ;;  %7582 = vmatprep.subr.mxu1 %v19623_v35  ;;  %v7203_v47 = vsub.f32 %v7201_v27, %v7202_v36 }
 0x29d   :  { %7584 = vmatpush1.msra.mxu1 %v19625_v31  ;;  %v7198_v24 = vand.u32 4294901760, %v7197_v39 }
 0x29e   :  { %v7667_v33 = vand.u32 4294901760, %v7666_v45  ;;  %7653 = vmatmul.mubr.f32.vlgmr.msra.gmra.mrb[0].mxu1 %v7187_v16  ;;  %v7204_v21 = vand.u32 4294901760, %v7203_v47  ;;  %v7661_v50 = vand.u32 4294901760, %v7660_v40 }
 0x29f   :  { %7199 = vmatprep.subr.mxu0 %v7198_v24  ;;  %7733 = vmatprep.mubr.f32.mxu1 %v18723_v3 }
 0x2a0   :  { %7205 = vmatpush1.msra.mxu0 %v7204_v21  ;;  %v7662_v52 = vsub.f32 %v7660_v40, %v7661_v50  ;;  %v7668_v5 = vsub.f32 %v7666_v45, %v7667_v33  ;;  %v8099_v30 = vpop.permute.xlu1 %8098 }
 0x2a1   :  { %7270 = vmatmul.mubr.f32.vlgmr.msra.gmra.mrb[0].mxu0 %v19597_v61  ;;  %7278 = vmatprep.subr.mxu0 %v7195_v18  ;;  %v8101_v41 = vpop.permute.xlu0 %8100 }
 0x2a2   :  { %7281 = vmatpush1.msra.mxu0 %v7201_v27  ;;  %v7663_v13 = vand.u32 4294901760, %v7662_v52  ;;  %v7669_v55 = vand.u32 4294901760, %v7668_v5  ;;  %7344 = vmatprep.mubr.f32.mxu0 %v18723_v3  ;;  %v8107_v1 = vsel %vm69_vm2, %v8099_v30, %v8101_v41 }
 0x2a3   :  { %7354 = vmatprep.subr.mxu0 %v19611_v15  ;;  %v8115_v25 = vsel %vm71_vm1, %v8107_v1, 0 }
 0x2a4   :  { %7664 = vmatprep.subr.mxu1 %v7663_v13  ;;  %v8097_v56 = vpop.permute.xlu1 %8096  ;;  %v19648_v53 = vand.u32 4294901760, %v8115_v25 }
 0x2a5   :  { %7670 = vmatpush1.msra.mxu1 %v7669_v55  ;;  %v8103_v42 = vpop.permute.xlu0 %8102  ;;  %v8106_v51 = vsel %vm69_vm2, %v8097_v56, %v8099_v30 }
 0x2a6   :  { %7735 = vmatmul.mubr.f32.vlgmr.msra.gmra.mrb[0].mxu1 %v19597_v61  ;;  %7743 = vmatprep.subr.mxu1 %v7660_v40  ;;  %v19660_v54 = vsub.f32 %v8115_v25, %v19648_v53  ;;  %v8113_v29 = vsel %vm71_vm1, %v8106_v51, 0  ;;  %v8108_v46 = vsel %vm69_vm2, %v8101_v41, %v8103_v42 }
 0x2a7   :  { %7746 = vmatpush1.msra.mxu1 %v7666_v45  ;;  %7809 = vmatprep.mubr.f32.mxu1 %v18723_v3  ;;  %v19672_v11 = vand.u32 4294901760, %v8113_v29  ;;  %v8117_v19 = vsel %vm71_vm1, %v8108_v46, 0 }
 0x2a8   :  { %7819 = vmatprep.subr.mxu1 %v19623_v35  ;;  %v8105_v23 = vpop.permute.xlu1 %8104  ;;  %v8201_v59 = vand.u32 4294901760, %v19660_v54  ;;  %v8588_v0 = vand.u32 4294901760, %v8117_v19 }
 0x2a9   :  { %7347 = vmatmul.mubr.f32.vlgmr.msra.gmra.mrb[0].mxu0 %v19600_v4  ;;  %v8109_v48 = vsel %vm69_vm2, %v8103_v42, %v8105_v23  ;;  %v8206_v58 = vsub.f32 %v8113_v29, %v19672_v11  ;;  %v18240_v23 = vld [vmem:[%s20685_s3 + $0x1] ss:$8 sm:$0xf] }
 0x2aa   :  { %7356 = vmatpush1.msra.mxu0 %v19613_v17  ;;  %7419 = vmatprep.mubr.f32.mxu0 %v18723_v3  ;;  %v8119_v34 = vsel %vm71_vm1, %v8109_v48, 0  ;;  %v9179_v25 = vrot.slane %v18240_v23, %v18806_v7  ;;  %v9183_v42 = vrot.slane %v18240_v23, %v18808_v8  ;;  %v9101_v48 = vld [vmem:[%s20687_s5] sm:$0xf]  ;;  %v9191_v51 = vrot.slane %v18240_v23, %v18812_v10 }
 0x2ab   :  { %7432 = vmatprep.subr.mxu0 %v7196_v22  ;;  %v19662_v57 = vand.u32 4294901760, %v8119_v34  ;;  %v8207_v43 = vand.u32 4294901760, %v8206_v58 }
 0x2ac   :  { %v9192_v38 = vcombine.low %v9179_v25, %v9183_v42 }
 0x2ad   :  { %v8665_v60 = vsub.f32 %v8119_v34, %v19662_v57  ;;  %v8208_v18 = vsub.f32 %v8206_v58, %v8207_v43  ;;  %v9187_v34 = vrot.slane %v18240_v23, %v18810_v9  ;;  %v18242_v23 = vld [vmem:[%s20685_s3 + $0x2] ss:$8 sm:$0xf] }
 0x2ae   :  { %7812 = vmatmul.mubr.f32.vlgmr.msra.gmra.mrb[0].mxu1 %v19600_v4  ;;  %v8189_v4 = vsub.f32 %v8111_v12, %v19665_v44  ;;  %v9138_v12 = vld [vmem:[%s20685_s3] ss:$8 sm:$0xf] }
 0x2af   :  { %7821 = vmatpush1.msra.mxu1 %v19625_v31  ;;  %7884 = vmatprep.mubr.f32.mxu1 %v18723_v3  ;;  %v8666_v63 = vand.u32 4294901760, %v8665_v60  ;;  %v8209_v27 = vand.u32 4294901760, %v8208_v18  ;;  %v9147_v29 = vrot.slane %v9138_v12, %v18808_v8  ;;  %v9151_v46 = vrot.slane %v9138_v12, %v18810_v9 }
 0x2b0   :  { %7897 = vmatprep.subr.mxu1 %v7661_v50  ;;  %v8190_v2 = vand.u32 4294901760, %v8189_v4 }
 0x2b1   :  { %7423 = vmatmul.mubr.f32.vlgmr.msra.gmra.mrb[0].mxu0 %v19603_v62  ;;  %v8667_v14 = vsub.f32 %v8665_v60, %v8666_v63 }
 0x2b2   :  { %7436 = vmatpush1.msra.mxu0 %v7202_v36  ;;  %7499 = vmatprep.mubr.f32.mxu0 %v18723_v3  ;;  %v8191_v16 = vsub.f32 %v8189_v4, %v8190_v2 }
 0x2b3   :  { %7508 = vmatprep.subr.mxu0 %v19611_v15  ;;  %v8671_v15 = vsub.f32 %v8117_v19, %v8588_v0 }
 0x2b4   :  { %v8192_v26 = vand.u32 4294901760, %v8191_v16 }
 0x2b5   :  { %v8672_v20 = vand.u32 4294901760, %v8671_v15 }
 0x2b6   :  { %7888 = vmatmul.mubr.f32.vlgmr.msra.gmra.mrb[0].mxu1 %v19603_v62  ;;  %v8202_v62 = vsub.f32 %v19660_v54, %v8201_v59 }
 0x2b7   :  { %7901 = vmatpush1.msra.mxu1 %v7667_v33  ;;  %7964 = vmatprep.mubr.f32.mxu1 %v18723_v3  ;;  %v8673_v28 = vsub.f32 %v8671_v15, %v8672_v20 }
 0x2b8   :  { %7973 = vmatprep.subr.mxu1 %v19623_v35  ;;  %v8203_v49 = vand.u32 4294901760, %v8202_v62 }
 0x2b9   :  { %7501 = vmatmul.mubr.f32.vlgmr.msra.gmra.mrb[0].mxu0 %v19597_v61  ;;  %v8674_v6 = vand.u32 4294901760, %v8673_v28 }
 0x2ba   :  { %7510 = vmatpush1.msra.mxu0 %v19613_v17  ;;  %7573 = vmatprep.mubr.f32.mxu0 %v18723_v3  ;;  %v8668_v17 = vand.u32 4294901760, %v8667_v14 }
 0x2bb   :  { %8122 = vmatprep.subr.mxu0 %v19648_v53 }
 0x2be   :  { %7966 = vmatmul.mubr.f32.vlgmr.msra.gmra.mrb[0].mxu1 %v19597_v61 }
 0x2bf   :  { %7975 = vmatpush1.msra.mxu1 %v19625_v31  ;;  %8038 = vmatprep.mubr.f32.mxu1 %v18723_v3 }
 0x2c0   :  { %8587 = vmatprep.subr.mxu1 %v19662_v57 }
 0x2c1   :  { %7575 = vmatmul.mubr.f32.vlgmr.msra.gmra.mrb[0].mxu0 %v19597_v61 }
 0x2c2   :  { %8124 = vmatpush1.msra.mxu0 %v19672_v11  ;;  %8187 = vmatprep.mubr.f32.mxu0 %v18723_v3 }
 0x2c3   :  { %8204 = vmatprep.subr.mxu0 %v8203_v49 }
 0x2c6   :  { %8040 = vmatmul.mubr.f32.vlgmr.msra.gmra.mrb[0].mxu1 %v19597_v61  ;;  %v18732_v61 = vmov 0  }
 0x2c7   :  { %8589 = vmatpush1.msra.mxu1 %v8588_v0  ;;  %8652 = vmatprep.mubr.f32.mxu1 %v18723_v3 }
 0x2c8   :  { %8669 = vmatprep.subr.mxu1 %v8668_v17  ;;  %18692 = vset.pattern.permute.xlu1 %v18732_v61 }
 0x2c9   :  { %8193 = vmatmul.mubr.f32.vlgmr.msra.gmra.mrb[0].mxu0 %v8192_v26  ;;  %18691 = vset.pattern.permute.xlu0 %v18732_v61 }
 0x2ca   :  { %8210 = vmatpush1.msra.mxu0 %v8209_v27  ;;  %8273 = vmatprep.mubr.f32.mxu0 %v18723_v3 }
 0x2cb   :  { %8283 = vmatprep.subr.mxu0 %v19660_v54  ;;  %v9193_v54 = vcombine.low %v9187_v34, %v9191_v51 }
 0x2ce   :  { %8658 = vmatmul.mubr.f32.vlgmr.msra.gmra.mrb[0].mxu1 %v8192_v26 }
 0x2cf   :  { %8675 = vmatpush1.msra.mxu1 %v8674_v6  ;;  %8738 = vmatprep.mubr.f32.mxu1 %v18723_v3 }
 0x2d0   :  { %8748 = vmatprep.subr.mxu1 %v8665_v60 }
 0x2d1   :  { %8275 = vmatmul.mubr.f32.vlgmr.msra.gmra.mrb[0].mxu0 %v19665_v44 }
 0x2d2   :  { %8286 = vmatpush1.msra.mxu0 %v8206_v58  ;;  %8349 = vmatprep.mubr.f32.mxu0 %v18723_v3 }
 0x2d3   :  { %8359 = vmatprep.subr.mxu0 %v19648_v53 }
 0x2d6   :  { %8740 = vmatmul.mubr.f32.vlgmr.msra.gmra.mrb[0].mxu1 %v19665_v44 }
 0x2d7   :  { %8751 = vmatpush1.msra.mxu1 %v8671_v15  ;;  %8814 = vmatprep.mubr.f32.mxu1 %v18723_v3 }
 0x2d8   :  { %8824 = vmatprep.subr.mxu1 %v19662_v57 }
 0x2d9   :  { %8352 = vmatmul.mubr.f32.vlgmr.msra.gmra.mrb[0].mxu0 %v8189_v4 }
 0x2da   :  { %8361 = vmatpush1.msra.mxu0 %v19672_v11  ;;  %8424 = vmatprep.mubr.f32.mxu0 %v18723_v3 }
 0x2db   :  { %8437 = vmatprep.subr.mxu0 %v8201_v59  ;;  %v9155_v59 = vrot.slane %v9138_v12, %v18812_v10 }
 0x2de   :  { %8817 = vmatmul.mubr.f32.vlgmr.msra.gmra.mrb[0].mxu1 %v8189_v4 }
 0x2df   :  { %8826 = vmatpush1.msra.mxu1 %v8588_v0  ;;  %8889 = vmatprep.mubr.f32.mxu1 %v18723_v3 }
 0x2e0   :  { %8902 = vmatprep.subr.mxu1 %v8666_v63 }
 0x2e1   :  { %8428 = vmatmul.mubr.f32.vlgmr.msra.gmra.mrb[0].mxu0 %v8190_v2 }
 0x2e2   :  { %8441 = vmatpush1.msra.mxu0 %v8207_v43  ;;  %8504 = vmatprep.mubr.f32.mxu0 %v18723_v3 }
 0x2e3   :  { %8513 = vmatprep.subr.mxu0 %v19648_v53  ;;  %v9091_v53 = vld [vmem:[%s20686_s4] sm:$0xf] }
 0x2e6   :  { %8893 = vmatmul.mubr.f32.vlgmr.msra.gmra.mrb[0].mxu1 %v8190_v2 }
 0x2e7   :  { %8906 = vmatpush1.msra.mxu1 %v8672_v20  ;;  %8969 = vmatprep.mubr.f32.mxu1 %v18723_v3 }
 0x2e8   :  { %8978 = vmatprep.subr.mxu1 %v19662_v57  ;;  %v9143_v57 = vrot.slane %v9138_v12, %v18806_v7 }
 0x2e9   :  { %8506 = vmatmul.mubr.f32.vlgmr.msra.gmra.mrb[0].mxu0 %v19665_v44 }
 0x2ea   :  { %8515 = vmatpush1.msra.mxu0 %v19672_v11  ;;  %8578 = vmatprep.mubr.f32.mxu0 %v18723_v3  ;;  %v9157_v11 = vcombine.low %v9151_v46, %v9155_v59 }
 0x2ee   :  { %8971 = vmatmul.mubr.f32.vlgmr.msra.gmra.mrb[0].mxu1 %v19665_v44 }
 0x2ef   :  { %8980 = vmatpush1.msra.mxu1 %v8588_v0  ;;  %9043 = vmatprep.mubr.f32.mxu1 %v18723_v3 }
 0x2f1   :  { %8580 = vmatmul.mubr.f32.vlgmr.msra.gmra.mrb[0].mxu0 %v19665_v44 }
 0x2f2   :  { %9307 = vmatprep.mubr.f32.mxu0 %v18723_v3 }
 0x2f6   :  { %9045 = vmatmul.mubr.f32.vlgmr.msra.gmra.mrb[0].mxu1 %v19665_v44  ;;  %v9156_v44 = vcombine.low %v9143_v57, %v9147_v29  ;;  %v11151_v57 = vrot.slane %v18242_v23, %v18812_v10 }
 0x2f7   :  { %9772 = vmatprep.mubr.f32.mxu1 %v18723_v3 }
 0x3c4   :  { %v8581_v32 = vpop.f32.mrb[0].mxu0 }
 0x3c5   :  { %v9055_v37 = vsel %vm71_vm1, %v8581_v32, 0.0  ;;  %v9064_v22 = vmul.f32 %v8581_v32, %v8581_v32  ;;  %v8583_v36 = vpop.f32.mrb[1].mxu0 }
 0x3c6   :  { %v9056_v35 = vsel %vm71_vm1, %v8583_v36, 0.0  ;;  %v9065_v31 = vmul.f32 %v8583_v36, %v8583_v36 }
 0x3c7   :  { %v9068_v39 = vsel %vm71_vm1, %v9064_v22, 0.0  ;;  %v9057_v40 = vadd.f32 %v9056_v35, %v9055_v37  ;;  %v9116_v35 = vstv %s20690_s8 }
 0x3c8   :  { %v9069_v45 = vsel %vm71_vm1, %v9065_v31, 0.0 }
 0x3c9   :  { %v9046_v47 = vpop.f32.mrb[0].mxu1  ;;  %v9070_v24 = vadd.f32 %v9069_v45, %v9068_v39 }
 0x3ca   :  { %v9058_v33 = vsel %vm71_vm1, %v9046_v47, 0.0  ;;  %v9066_v21 = vmul.f32 %v9046_v47, %v9046_v47  ;;  %v9048_v50 = vpop.f32.mrb[1].mxu1 }
 0x3cb   :  { %v9067_v52 = vmul.f32 %v9048_v50, %v9048_v50  ;;  %v9059_v5 = vadd.f32 %v9058_v33, %v9057_v40  ;;  %v9060_v30 = vsel %vm71_vm1, %v9048_v50, 0.0 }
 0x3cc   :  { %v9071_v13 = vsel %vm71_vm1, %v9066_v21, 0.0 }
 0x3cd   :  { %v9061_v55 = vadd.f32 %v9060_v30, %v9059_v5  ;;  %v9072_v56 = vadd.f32 %v9071_v13, %v9070_v24  ;;  %v9073_v41 = vsel %vm71_vm1, %v9067_v52, 0.0 }
 0x3cf   :  { %9062 = vadd.xlane.f32.xlu0 %v9061_v55  ;;  %v9074_v1 = vadd.f32 %v9073_v41, %v9072_v56 }
 0x3d1   :  { %9075 = vadd.xlane.f32.xlu1 %v9074_v1 }
 0x3e2   :  { %9104 = vperm.xlu1 %18692, %v9101_v48  }
 0x3e5   :  { %9094 = vperm.xlu0 %18691, %v9091_v53  }
 0x3e6   :  { %9194 = vrot.lane.b32.xlu1 %v9192_v38, %s18724_s17 }
 0x3ea   :  { %9196 = vrot.lane.b32.xlu1 %v9193_v54, %s18724_s17  ;;  %v11147_v54 = vrot.slane %v18242_v23, %v18810_v9 }
 0x3ee   :  { %9158 = vrot.lane.b32.xlu1 %v9156_v44, %s18725_s18 }
 0x3f2   :  { %9160 = vrot.lane.b32.xlu1 %v9157_v11, %s18725_s18  ;;  %v11153_v11 = vcombine.low %v11147_v54, %v11151_v57 }
 0x45c   :  { %v9063_v60 = vpop.xlane.xlu0 %9062 }
 0x45d   :  { %v9077_v4 = vmul.f32 0.001953125, %v9063_v60 }
 0x45e   :  { %v9076_v19 = vpop.xlane.xlu1 %9075 }
 0x45f   :  { %v9078_v62 = vmul.f32 0.001953125, %v9076_v19  ;;  %v9079_v58 = vmul.f32 %v9077_v4, %v9077_v4  ;;  %v9081_v49 = vsub.f32 %v8581_v32, %v9077_v4  ;;  %v9082_v43 = vsub.f32 %v8583_v36, %v9077_v4 }
 0x460   :  { %v9083_v14 = vsub.f32 %v9046_v47, %v9077_v4  ;;  %v9084_v15 = vsub.f32 %v9048_v50, %v9077_v4  ;;  %v11139_v4 = vrot.slane %v18242_v23, %v18806_v7  ;;  %v11143_v19 = vrot.slane %v18242_v23, %v18808_v8 }
 0x461   :  { %v9080_v63 = vsub.f32 %v9078_v62, %v9079_v58 }
 0x462   :  { %v9105_v2 = vpop.permute.xlu1 %9104 }
 0x463   :  { %v9085_v0 = vadd.f32 1e-05, %v9080_v63  ;;  %v11152_v63 = vcombine.low %v11139_v4, %v11143_v19 }
 0x464   :  { %v9095_v17 = vpop.permute.xlu0 %9094 }
 0x465   :  { %18695 = vrsqrt.f32 %v9085_v0  ;;  %v18244_v0 = vld [vmem:[%s20685_s3 + $0x3] ss:$8 sm:$0xf] }
 0x466   :  { %v9195_v28 = vpop.permute.xlu1 %9194 }
 0x467   :  { %v9198_v41 = vrot.slane %v9195_v28, 4 }
 0x469   :  { %v9200_v42 = vsel %vm108_vm0, %v9198_v41, %v9195_v28 }
 0x46a   :  { %v9197_v33 = vpop.permute.xlu1 %9196 }
 0x46b   :  { %v9199_v55 = vrot.slane %v9197_v33, 4 }
 0x46d   :  { %v9201_v1 = vsel %vm71_vm1, %v9198_v41, %v9199_v55 }
 0x46e   :  { %v9159_v56 = vpop.permute.xlu1 %9158  ;;  %v9202_v53 = vsel %vm108_vm0, %v9201_v1, %v9197_v33 }
 0x46f   :  { %v18696_v16 = vpop.eup %18695  ;;  %v9162_v29 = vrot.slane %v9159_v56, 4 }
 0x470   :  { %v9087_v18 = vmul.f32 %v18696_v16, %v9081_v49  ;;  %v9088_v20 = vmul.f32 %v18696_v16, %v9082_v43  ;;  %v9089_v26 = vmul.f32 %v18696_v16, %v9083_v14  ;;  %v9090_v27 = vmul.f32 %v18696_v16, %v9084_v15 }
 0x471   :  { %v9164_v49 = vsel %vm69_vm2, %v9162_v29, %v9159_v56  ;;  %v12143_v43 = vrot.slane %v18244_v0, %v18806_v7  ;;  %v12147_v14 = vrot.slane %v18244_v0, %v18808_v8 }
 0x472   :  { %v9097_v6 = vmul.f32 %v9095_v17, %v9087_v18  ;;  %v9098_v61 = vmul.f32 %v9095_v17, %v9088_v20  ;;  %v9099_v37 = vmul.f32 %v9095_v17, %v9089_v26  ;;  %v9100_v22 = vmul.f32 %v9095_v17, %v9090_v27  ;;  %v9161_v38 = vpop.permute.xlu1 %9160 }
 0x473   :  { %v9163_v44 = vrot.slane %v9161_v38, 4  ;;  %v12156_v17 = vcombine.low %v12143_v43, %v12147_v14  ;;  %v12151_v20 = vrot.slane %v18244_v0, %v18810_v9  ;;  %v12155_v26 = vrot.slane %v18244_v0, %v18812_v10 }
 0x474   :  { %v9107_v31 = vadd.f32 %v9105_v2, %v9097_v6  ;;  %v9108_v32 = vadd.f32 %v9105_v2, %v9098_v61  ;;  %v9109_v36 = vadd.f32 %v9105_v2, %v9099_v37  ;;  %v9110_v39 = vadd.f32 %v9105_v2, %v9100_v22  ;;  %v18241_v6 = vld [vmem:[%s20684_s2 + $0x4] sm:$0xf] }
 0x475   :  { %v9165_v60 = vsel %vm71_vm1, %v9162_v29, %v9163_v44  ;;  %v12157_v28 = vcombine.low %v12151_v20, %v12155_v26  ;;  %v9231_v61 = vsel %vm140_vm3, %v18241_v6, 0 }
 0x476   :  { %vm9112_vm10 = vcmp.ge.f32.partialorder %v9107_v31, 0.0  ;;  %vm9113_vm11 = vcmp.ge.f32.partialorder %v9108_v32, 0.0  ;;  %vm9114_vm12 = vcmp.ge.f32.partialorder %v9109_v36, 0.0  ;;  %vm9115_vm13 = vcmp.ge.f32.partialorder %v9110_v39, 0.0 }
 0x477   :  { %v9117_v40 = vmul.f32 %v9116_v35, %v9107_v31  ;;  %v9118_v45 = vmul.f32 %v9116_v35, %v9108_v32  ;;  %v9119_v47 = vmul.f32 %v9116_v35, %v9109_v36  ;;  %v9120_v24 = vmul.f32 %v9116_v35, %v9110_v39 }
 0x478   :  { %v9166_v58 = vsel %vm69_vm2, %v9165_v60, %v9161_v38  ;;  %v19804_v37 = vand.u32 4294901760, %v9231_v61 }
 0x479   :  { %v9121_v21 = vsel %vm9112_vm10, %v9107_v31, %v9117_v40  ;;  %v9122_v50 = vsel %vm9113_vm11, %v9108_v32, %v9118_v45  ;;  %v9123_v52 = vsel %vm9114_vm12, %v9109_v36, %v9119_v47  ;;  %v9124_v5 = vsel %vm9115_vm13, %v9110_v39, %v9120_v24 }
 0x47a   :  { %v19752_v30 = vcombine.low %v9121_v21, %v9122_v50  ;;  %v19754_v13 = vcombine.low %v9123_v52, %v9124_v5  ;;  %v19807_v22 = vsub.f32 %v9231_v61, %v19804_v37 }
 0x47c   :  { %9133 = vst [vmem:[#allocation2 + $0x4] sm:$0xff] %v19752_v30  ;;  %9134 = vst [vmem:[#allocation2 + $0xc] sm:$0xff] %v19754_v13  ;;  %v19810_v35 = vand.u32 4294901760, %v19807_v22 }
 0x47e   :  { %v9311_v36 = vsub.f32 %v19807_v22, %v19810_v35 }
 0x480   :  { %v9312_v52 = vand.u32 4294901760, %v9311_v36 }
 0x483   :  { %v19762_v25 = vld [vmem:[#allocation2] sm:$0xff]  ;;  %v19765_v48 = vld [vmem:[#allocation2 + $0x8] sm:$0xff]  ;;  %v9137_v12 = vld [vmem:[#allocation2 + $0x10] sm:$0xf] }
 0x484   :  { %v9206_v34 = vmul.f32 %v9200_v42, %v19762_v25  ;;  %v9207_v51 = vmul.f32 %v9202_v53, %v19765_v48  ;;  %v9208_v46 = vmul.f32 %v9199_v55, %v9137_v12  ;;  %v9171_v2 = vmul.f32 %v9166_v58, %v19765_v48 }
 0x485   :  { %v9170_v15 = vmul.f32 %v9164_v49, %v19762_v25  ;;  %v9172_v27 = vmul.f32 %v9163_v44, %v9137_v12 }
 0x486   :  { %9220 = vrot.lane.b32.xlu1 %v9207_v51, %s18726_s19  ;;  %9216 = vrot.lane.b32.xlu0 %v9206_v34, %s18726_s19  ;;  %v9214_v59 = vcombine.high %v9206_v34, %v9206_v34  ;;  %v9215_v62 = vcombine.high %v9207_v51, %v9207_v51  ;;  %v10175_v16 = vcombine.high %v9171_v2, %v9171_v2 }
 0x487   :  { %v10174_v18 = vcombine.high %v9170_v15, %v9170_v15 }
 0x48a   :  { %9224 = vrot.lane.b32.xlu0 %v9208_v46, %s18726_s19  ;;  %9218 = vrot.lane.b32.xlu1 %v9214_v59, %s18726_s19 }
 0x48e   :  { %11156 = vrot.lane.b32.xlu0 %v11153_v11, %s18727_s22  ;;  %9222 = vrot.lane.b32.xlu1 %v9215_v62, %s18726_s19 }
 0x492   :  { %10180 = vrot.lane.b32.xlu0 %v9171_v2, %s18728_s25  ;;  %11154 = vrot.lane.b32.xlu1 %v11152_v63, %s18727_s22 }
 0x496   :  { %10182 = vrot.lane.b32.xlu0 %v10175_v16, %s18728_s25  ;;  %10176 = vrot.lane.b32.xlu1 %v9170_v15, %s18728_s25 }
 0x49a   :  { %12158 = vrot.lane.b32.xlu0 %v12156_v17, %s18729_s26  ;;  %10178 = vrot.lane.b32.xlu1 %v10174_v18, %s18728_s25 }
 0x49e   :  { %10184 = vrot.lane.b32.xlu1 %v9172_v27, %s18728_s25 }
 0x4a2   :  { %12160 = vrot.lane.b32.xlu1 %v12157_v28, %s18729_s26 }
 0x4f8   :  { %v9221_v31 = vpop.permute.xlu1 %9220  ;;  %v9217_v32 = vpop.permute.xlu0 %9216 }
 0x4fc   :  { %v9225_v39 = vpop.permute.xlu0 %9224  ;;  %v9219_v40 = vpop.permute.xlu1 %9218 }
 0x4fd   :  { %v9226_v45 = vsel %vm135_vm4, %v9217_v32, %v9219_v40  ;;  %v9227_v47 = vsel %vm135_vm4, %v9219_v40, %v9221_v31  ;;  %v11133_v32 = vld [vmem:[#allocation2 + $0x10] sm:$0xf] }
 0x4fe   :  { %v9233_v24 = vsel %vm71_vm1, %v9226_v45, 0  ;;  %v9235_v33 = vsel %vm71_vm1, %v9227_v47, 0 }
 0x4ff   :  { %v19818_v21 = vand.u32 4294901760, %v9235_v33  ;;  %v19820_v50 = vand.u32 4294901760, %v9233_v24 }
 0x500   :  { %v19822_v5 = vpop.permute.xlu0 %11156  ;;  %v9223_v55 = vpop.permute.xlu1 %9222 }
 0x501   :  { %v19825_v56 = vsub.f32 %v9235_v33, %v19818_v21  ;;  %v19828_v41 = vsub.f32 %v9233_v24, %v19820_v50  ;;  %v9228_v1 = vsel %vm135_vm4, %v9221_v31, %v9223_v55  ;;  %9242 = vmatprep.subr.mxu0 %v19818_v21  ;;  %v9229_v23 = vsel %vm135_vm4, %v9223_v55, %v9225_v39 }
 0x502   :  { %v9237_v42 = vsel %vm71_vm1, %v9228_v1, 0  ;;  %9244 = vmatpush1.msra.mxu0 %v19820_v50  ;;  %v9239_v38 = vsel %vm71_vm1, %v9229_v23, 0  ;;  %v11159_v29 = vrot.slane %v19822_v5, 4 }
 0x503   :  { %v9327_v53 = vand.u32 4294901760, %v19828_v41  ;;  %v19837_v34 = vand.u32 4294901760, %v9237_v42  ;;  %9313 = vmatmul.mubr.f32.vlgmr.msra.gmra.mrb[2].mxu0 %v9312_v52  ;;  %v19839_v51 = vand.u32 4294901760, %v9239_v38  ;;  %v9321_v57 = vand.u32 4294901760, %v19825_v56 }
 0x504   :  { %v19841_v12 = vpop.permute.xlu0 %10180  ;;  %v11155_v54 = vpop.permute.xlu1 %11154  ;;  %9393 = vmatprep.mubr.f32.mxu0 %v18723_v3  ;;  %v11168_v39 = vmul.f32 %v11159_v29, %v11133_v32 }
 0x505   :  { %v19847_v44 = vsub.f32 %v9237_v42, %v19837_v34  ;;  %v11158_v46 = vrot.slane %v11155_v54, 4  ;;  %v9328_v59 = vsub.f32 %v19828_v41, %v9327_v53  ;;  %v19853_v11 = vsub.f32 %v9239_v38, %v19839_v51  ;;  %9707 = vmatprep.subr.mxu1 %v19839_v51 }
 0x506   :  { %v9322_v60 = vsub.f32 %v19825_v56, %v9321_v57  ;;  %9709 = vmatpush1.msra.mxu1 %v19837_v34 }
 0x507   :  { %v9792_v4 = vand.u32 4294901760, %v19847_v44  ;;  %v11160_v19 = vsel %vm2073_vm5, %v11158_v46, %v11155_v54  ;;  %v11161_v62 = vsel %vm71_vm1, %v11158_v46, %v11159_v29  ;;  %v9329_v58 = vand.u32 4294901760, %v9328_v59  ;;  %9778 = vmatmul.mubr.f32.vlgmr.msra.gmra.mrb[2].mxu1 %v9312_v52  ;;  %v9173_v54 = vld [vmem:[%s20684_s2] sm:$0xf] }
 0x508   :  { %v11166_v63 = vmul.f32 %v11160_v19, %v19762_v25  ;;  %v19864_v0 = vpop.permute.xlu0 %10182  ;;  %v19866_v2 = vpop.permute.xlu1 %10176  ;;  %v9323_v49 = vand.u32 4294901760, %v9322_v60  ;;  %v11162_v43 = vsel %vm2073_vm5, %v11161_v62, %v19822_v5  ;;  %v9786_v14 = vand.u32 4294901760, %v19853_v11  ;;  %9858 = vmatprep.mubr.f32.mxu1 %v18723_v3 }
 0x509   :  { %v11167_v15 = vmul.f32 %v11162_v43, %v19765_v48  ;;  %v9793_v16 = vsub.f32 %v19847_v44, %v9792_v4 }
 0x50a   :  { %9324 = vmatprep.subr.mxu0 %v9323_v49  ;;  %11176 = vrot.lane.b32.xlu0 %v11166_v63, %s18730_s29  ;;  %v9787_v17 = vsub.f32 %v19853_v11, %v9786_v14  ;;  %v11174_v6 = vcombine.high %v11166_v63, %v11166_v63  ;;  %v10191_v63 = vsel %vm140_vm3, %v9173_v54, 0 }
 0x50b   :  { %9330 = vmatpush1.msra.mxu0 %v9329_v58  ;;  %11180 = vrot.lane.b32.xlu1 %v11167_v15, %s18730_s29  ;;  %v9794_v18 = vand.u32 4294901760, %v9793_v16  ;;  %v11175_v31 = vcombine.high %v11167_v15, %v11167_v15  ;;  %v19950_v15 = vand.u32 4294901760, %v10191_v63 }
 0x50c   :  { %9395 = vmatmul.mubr.f32.vlgmr.msra.gmra.mrb[2].mxu0 %v19804_v37  ;;  %9403 = vmatprep.subr.mxu0 %v19825_v56  ;;  %v12159_v20 = vpop.permute.xlu0 %12158  ;;  %v10179_v26 = vpop.permute.xlu1 %10178  ;;  %v9788_v27 = vand.u32 4294901760, %v9787_v17  ;;  %v18250_v56 = vld [vmem:[%s20685_s3 + $0x6] ss:$8 sm:$0xf] }
 0x50d   :  { %v12162_v28 = vrot.slane %v12159_v20, 4  ;;  %9406 = vmatpush1.msra.mxu0 %v19828_v41  ;;  %9469 = vmatprep.mubr.f32.mxu0 %v18723_v3  ;;  %v10187_v24 = vsel %vm1097_vm7, %v10179_v26, %v19841_v12  ;;  %v15140_v60 = vrot.slane %v18250_v56, %v18812_v10  ;;  %v10186_v19 = vsel %vm1097_vm7, %v19866_v2, %v10179_v26 }
 0x50e   :  { %9479 = vmatprep.subr.mxu0 %v19818_v21  ;;  %9789 = vmatprep.subr.mxu1 %v9788_v27  ;;  %v10195_v23 = vsel %vm71_vm1, %v10187_v24, 0  ;;  %v15128_v43 = vrot.slane %v18250_v56, %v18806_v7  ;;  %v15132_v2 = vrot.slane %v18250_v56, %v18808_v8 }
 0x50f   :  { %v12164_v61 = vsel %vm3080_vm6, %v12162_v28, %v12159_v20  ;;  %9795 = vmatpush1.msra.mxu1 %v9794_v18  ;;  %11178 = vrot.lane.b32.xlu0 %v11174_v6, %s18730_s29  ;;  %v19926_v46 = vand.u32 4294901760, %v10195_v23 }
 0x510   :  { %9860 = vmatmul.mubr.f32.vlgmr.msra.gmra.mrb[2].mxu1 %v19804_v37  ;;  %9868 = vmatprep.subr.mxu1 %v19853_v11  ;;  %v10185_v36 = vpop.permute.xlu1 %10184  ;;  %v12170_v40 = vmul.f32 %v12164_v61, %v19762_v25  ;;  %v18248_v25 = vld [vmem:[%s20685_s3 + $0x5] ss:$8 sm:$0xf]  ;;  %v15136_v11 = vrot.slane %v18250_v56, %v18810_v9 }
 0x511   :  { %11182 = vrot.lane.b32.xlu1 %v11175_v31, %s18730_s29  ;;  %9871 = vmatpush1.msra.mxu1 %v19847_v44  ;;  %v14132_v55 = vrot.slane %v18248_v25, %v18810_v9  ;;  %v14136_v1 = vrot.slane %v18248_v25, %v18812_v10  ;;  %v10189_v38 = vsel %vm1097_vm7, %v19864_v0, %v10185_v36 }
 0x512   :  { %9944 = vmatprep.subr.mxu1 %v19839_v51  ;;  %9934 = vmatprep.mubr.f32.mxu1 %v18723_v3  ;;  %v12178_v52 = vcombine.high %v12170_v40, %v12170_v40  ;;  %v14128_v29 = vrot.slane %v18248_v25, %v18808_v8  ;;  %v10199_v62 = vsel %vm71_vm1, %v10189_v38, 0  ;;  %v19945_v41 = vsub.f32 %v10195_v23, %v19926_v46 }
 0x513   :  { %11184 = vrot.lane.b32.xlu0 %v11168_v39, %s18730_s29  ;;  %v14138_v59 = vcombine.low %v14132_v55, %v14136_v1  ;;  %v15142_v16 = vcombine.low %v15136_v11, %v15140_v60  ;;  %v10269_v44 = vsub.f32 %v10191_v63, %v19950_v15 }
 0x514   :  { %9472 = vmatmul.mubr.f32.vlgmr.msra.gmra.mrb[2].mxu0 %v19807_v22  ;;  %v12161_v45 = vpop.permute.xlu1 %12160 }
 0x515   :  { %9481 = vmatpush1.msra.mxu0 %v19820_v50  ;;  %12180 = vrot.lane.b32.xlu1 %v12170_v40, %s18731_s30  ;;  %v12163_v47 = vrot.slane %v12161_v45, 4  ;;  %v10270_v27 = vand.u32 4294901760, %v10269_v44 }
 0x516   :  { %9557 = vmatprep.subr.mxu0 %v9321_v57  ;;  %9544 = vmatprep.mubr.f32.mxu0 %v18723_v3  ;;  %v14124_v57 = vrot.slane %v18248_v25, %v18806_v7 }
 0x517   :  { %v12165_v33 = vsel %vm71_vm1, %v12162_v28, %v12163_v47  ;;  %v10271_v31 = vsub.f32 %v10269_v44, %v10270_v27 }
 0x518   :  { %v12166_v5 = vsel %vm3080_vm6, %v12165_v33, %v12161_v45  ;;  %9937 = vmatmul.mubr.f32.vlgmr.msra.gmra.mrb[2].mxu1 %v19807_v22  ;;  %v12137_v22 = vld [vmem:[#allocation2 + $0x10] sm:$0xf]  ;;  %v14137_v49 = vcombine.low %v14124_v57, %v14128_v29 }
 0x519   :  { %v12171_v42 = vmul.f32 %v12166_v5, %v19765_v48  ;;  %9946 = vmatpush1.msra.mxu1 %v19837_v34  ;;  %12182 = vrot.lane.b32.xlu1 %v12178_v52, %s18731_s30  ;;  %v12172_v48 = vmul.f32 %v12163_v47, %v12137_v22  ;;  %v10272_v39 = vand.u32 4294901760, %v10271_v31 }
 0x51a   :  { %10022 = vmatprep.subr.mxu1 %v9786_v14  ;;  %10009 = vmatprep.mubr.f32.mxu1 %v18723_v3  ;;  %v10193_v14 = vsel %vm71_vm1, %v10186_v19, 0 }
 0x51b   :  { %12184 = vrot.lane.b32.xlu0 %v12171_v42, %s18731_s30  ;;  %v12179_v58 = vcombine.high %v12171_v42, %v12171_v42  ;;  %v19960_v17 = vand.u32 4294901760, %v10193_v14 }
 0x51c   :  { %9548 = vmatmul.mubr.f32.vlgmr.msra.gmra.mrb[2].mxu0 %v19810_v35 }
 0x51d   :  { %9561 = vmatpush1.msra.mxu0 %v9327_v53  ;;  %12188 = vrot.lane.b32.xlu1 %v12172_v48, %s18731_s30  ;;  %v19947_v53 = vand.u32 4294901760, %v10199_v62 }
 0x51e   :  { %9633 = vmatprep.subr.mxu0 %v19818_v21  ;;  %9624 = vmatprep.mubr.f32.mxu0 %v18723_v3  ;;  %v10188_v21 = vsel %vm1097_vm7, %v19841_v12, %v19864_v0  ;;  %v10281_v12 = vand.u32 4294901760, %v19945_v41 }
 0x51f   :  { %12186 = vrot.lane.b32.xlu0 %v12179_v58, %s18731_s30  ;;  %v10197_v18 = vsel %vm71_vm1, %v10188_v21, 0  ;;  %v10745_v20 = vsub.f32 %v10199_v62, %v19947_v53 }
 0x520   :  { %10013 = vmatmul.mubr.f32.vlgmr.msra.gmra.mrb[2].mxu1 %v19810_v35  ;;  %v15141_v35 = vcombine.low %v15128_v43, %v15132_v2  ;;  %v10282_v0 = vsub.f32 %v19945_v41, %v10281_v12 }
 0x521   :  { %10026 = vmatpush1.msra.mxu1 %v9792_v4  ;;  %14141 = vrot.lane.b32.xlu1 %v14138_v59, %s18731_s30  ;;  %v10286_v4 = vsub.f32 %v10193_v14, %v19960_v17  ;;  %v10746_v26 = vand.u32 4294901760, %v10745_v20 }
 0x522   :  { %10098 = vmatprep.subr.mxu1 %v19839_v51  ;;  %10089 = vmatprep.mubr.f32.mxu1 %v18723_v3  ;;  %v19972_v51 = vand.u32 4294901760, %v10197_v18  ;;  %v10283_v6 = vand.u32 4294901760, %v10282_v0 }
 0x523   :  { %14139 = vrot.lane.b32.xlu0 %v14137_v49, %s18731_s30  ;;  %v10287_v28 = vand.u32 4294901760, %v10286_v4  ;;  %v10747_v61 = vsub.f32 %v10745_v20, %v10746_v26 }
 0x524   :  { %9626 = vmatmul.mubr.f32.vlgmr.msra.gmra.mrb[2].mxu0 %v19804_v37 }
 0x525   :  { %9635 = vmatpush1.msra.mxu0 %v19820_v50  ;;  %15145 = vrot.lane.b32.xlu1 %v15142_v16, %s18730_s29  ;;  %v10751_v50 = vsub.f32 %v10197_v18, %v19972_v51  ;;  %v10288_v36 = vsub.f32 %v10286_v4, %v10287_v28 }
 0x526   :  { %10202 = vmatprep.subr.mxu0 %v19926_v46  ;;  %9698 = vmatprep.mubr.f32.mxu0 %v18723_v3 }
 0x527   :  { %15143 = vrot.lane.b32.xlu0 %v15141_v35, %s18730_s29  ;;  %v10752_v32 = vand.u32 4294901760, %v10751_v50  ;;  %v10289_v40 = vand.u32 4294901760, %v10288_v36 }
 0x528   :  { %10091 = vmatmul.mubr.f32.vlgmr.msra.gmra.mrb[2].mxu1 %v19804_v37 }
 0x529   :  { %10100 = vmatpush1.msra.mxu1 %v19837_v34  ;;  %10163 = vmatprep.mubr.f32.mxu1 %v18723_v3  ;;  %v10748_v34 = vand.u32 4294901760, %v10747_v61  ;;  %v10753_v45 = vsub.f32 %v10751_v50, %v10752_v32 }
 0x52a   :  { %10667 = vmatprep.subr.mxu1 %v19947_v53 }
 0x52b   :  { %v10754_v47 = vand.u32 4294901760, %v10753_v45 }
 0x52c   :  { %9700 = vmatmul.mubr.f32.vlgmr.msra.gmra.mrb[2].mxu0 %v19804_v37 }
 0x52d   :  { %10204 = vmatpush1.msra.mxu0 %v19960_v17  ;;  %10267 = vmatprep.mubr.f32.mxu0 %v18723_v3 }
 0x52e   :  { %10284 = vmatprep.subr.mxu0 %v10283_v6 }
 0x530   :  { %10165 = vmatmul.mubr.f32.vlgmr.msra.gmra.mrb[2].mxu1 %v19804_v37  ;;  %v18243_v37 = vld [vmem:[%s20684_s2 + $0x8] sm:$0xf] }
 0x531   :  { %10669 = vmatpush1.msra.mxu1 %v19972_v51  ;;  %10732 = vmatprep.mubr.f32.mxu1 %v18723_v3  ;;  %v11191_v25 = vsel %vm140_vm3, %v18243_v37, 0 }
 0x532   :  { %10749 = vmatprep.subr.mxu1 %v10748_v34  ;;  %v20019_v24 = vand.u32 4294901760, %v11191_v25 }
 0x534   :  { %10273 = vmatmul.mubr.f32.vlgmr.msra.gmra.mrb[2].mxu0 %v10272_v39  ;;  %v20022_v33 = vsub.f32 %v11191_v25, %v20019_v24 }
 0x535   :  { %10290 = vmatpush1.msra.mxu0 %v10289_v40  ;;  %10353 = vmatprep.mubr.f32.mxu0 %v18723_v3 }
 0x536   :  { %10363 = vmatprep.subr.mxu0 %v19945_v41  ;;  %v20025_v5 = vand.u32 4294901760, %v20022_v33 }
 0x538   :  { %10738 = vmatmul.mubr.f32.vlgmr.msra.gmra.mrb[2].mxu1 %v10272_v39  ;;  %v11271_v1 = vsub.f32 %v20022_v33, %v20025_v5  ;;  %v18252_v39 = vld [vmem:[%s20685_s3 + $0x7] ss:$8 sm:$0xf] }
 0x539   :  { %10755 = vmatpush1.msra.mxu1 %v10754_v47  ;;  %10818 = vmatprep.mubr.f32.mxu1 %v18723_v3  ;;  %v16132_v25 = vrot.slane %v18252_v39, %v18806_v7 }
 0x53a   :  { %10828 = vmatprep.subr.mxu1 %v10745_v20 }
 0x53c   :  { %10355 = vmatmul.mubr.f32.vlgmr.msra.gmra.mrb[2].mxu0 %v19950_v15 }
 0x53d   :  { %10366 = vmatpush1.msra.mxu0 %v10286_v4  ;;  %10429 = vmatprep.mubr.f32.mxu0 %v18723_v3 }
 0x53e   :  { %10439 = vmatprep.subr.mxu0 %v19926_v46 }
 0x540   :  { %10820 = vmatmul.mubr.f32.vlgmr.msra.gmra.mrb[2].mxu1 %v19950_v15 }
 0x541   :  { %10831 = vmatpush1.msra.mxu1 %v10751_v50  ;;  %10894 = vmatprep.mubr.f32.mxu1 %v18723_v3 }
 0x542   :  { %10904 = vmatprep.subr.mxu1 %v19947_v53 }
 0x544   :  { %10432 = vmatmul.mubr.f32.vlgmr.msra.gmra.mrb[2].mxu0 %v10269_v44 }
 0x545   :  { %10441 = vmatpush1.msra.mxu0 %v19960_v17  ;;  %10504 = vmatprep.mubr.f32.mxu0 %v18723_v3 }
 0x546   :  { %10517 = vmatprep.subr.mxu0 %v10281_v12 }
 0x548   :  { %10897 = vmatmul.mubr.f32.vlgmr.msra.gmra.mrb[2].mxu1 %v10269_v44 }
 0x549   :  { %10906 = vmatpush1.msra.mxu1 %v19972_v51  ;;  %10969 = vmatprep.mubr.f32.mxu1 %v18723_v3 }
 0x54a   :  { %10982 = vmatprep.subr.mxu1 %v10746_v26 }
 0x54c   :  { %10508 = vmatmul.mubr.f32.vlgmr.msra.gmra.mrb[2].mxu0 %v10270_v27 }
 0x54d   :  { %10521 = vmatpush1.msra.mxu0 %v10287_v28  ;;  %10584 = vmatprep.mubr.f32.mxu0 %v18723_v3 }
 0x54e   :  { %10593 = vmatprep.subr.mxu0 %v19926_v46  ;;  %v11272_v46 = vand.u32 4294901760, %v11271_v1 }
 0x550   :  { %10973 = vmatmul.mubr.f32.vlgmr.msra.gmra.mrb[2].mxu1 %v10270_v27 }
 0x551   :  { %10986 = vmatpush1.msra.mxu1 %v10752_v32  ;;  %11049 = vmatprep.mubr.f32.mxu1 %v18723_v3 }
 0x552   :  { %11058 = vmatprep.subr.mxu1 %v19947_v53 }
 0x554   :  { %10586 = vmatmul.mubr.f32.vlgmr.msra.gmra.mrb[2].mxu0 %v19950_v15 }
 0x555   :  { %10595 = vmatpush1.msra.mxu0 %v19960_v17  ;;  %10658 = vmatprep.mubr.f32.mxu0 %v18723_v3 }
 0x558   :  { %11051 = vmatmul.mubr.f32.vlgmr.msra.gmra.mrb[2].mxu1 %v19950_v15 }
 0x559   :  { %11060 = vmatpush1.msra.mxu1 %v19972_v51  ;;  %11123 = vmatprep.mubr.f32.mxu1 %v18723_v3 }
 0x55c   :  { %10660 = vmatmul.mubr.f32.vlgmr.msra.gmra.mrb[2].mxu0 %v19950_v15 }
 0x55d   :  { %11267 = vmatprep.mubr.f32.mxu0 %v18723_v3 }
 0x560   :  { %11125 = vmatmul.mubr.f32.vlgmr.msra.gmra.mrb[2].mxu1 %v19950_v15 }
 0x561   :  { %11732 = vmatprep.mubr.f32.mxu1 %v18723_v3 }
 0x57c   :  { %v11177_v52 = vpop.permute.xlu0 %11176 }
 0x57d   :  { %v11181_v55 = vpop.permute.xlu1 %11180 }
 0x581   :  { %v11179_v23 = vpop.permute.xlu0 %11178 }
 0x582   :  { %v11186_v42 = vsel %vm2100_vm8, %v11177_v52, %v11179_v23  ;;  %v11187_v56 = vsel %vm2100_vm8, %v11179_v23, %v11181_v55  ;;  %v16136_v52 = vrot.slane %v18252_v39, %v18808_v8 }
 0x583   :  { %v11193_v38 = vsel %vm71_vm1, %v11186_v42, 0  ;;  %v11195_v22 = vsel %vm71_vm1, %v11187_v56, 0  ;;  %v11183_v54 = vpop.permute.xlu1 %11182  ;;  %v14118_v42 = vld [vmem:[#allocation2 + $0x14] sm:$0xf] }
 0x584   :  { %v20033_v48 = vand.u32 4294901760, %v11195_v22  ;;  %v20035_v57 = vand.u32 4294901760, %v11193_v38  ;;  %v11188_v29 = vsel %vm2100_vm8, %v11181_v55, %v11183_v54 }
 0x585   :  { %v11197_v59 = vsel %vm71_vm1, %v11188_v29, 0  ;;  %v11185_v11 = vpop.permute.xlu0 %11184  ;;  %v16144_v29 = vrot.slane %v18252_v39, %v18812_v10 }
 0x586   :  { %v11280_v60 = vsub.f32 %v11195_v22, %v20033_v48  ;;  %v20041_v19 = vsub.f32 %v11193_v38, %v20035_v57  ;;  %v20043_v62 = vand.u32 4294901760, %v11197_v59  ;;  %v11189_v58 = vsel %vm2100_vm8, %v11183_v54, %v11185_v11  ;;  %11202 = vmatprep.subr.mxu0 %v20033_v48 }
 0x587   :  { %v11199_v63 = vsel %vm71_vm1, %v11189_v58, 0  ;;  %v20048_v49 = vpop.permute.xlu1 %12180  ;;  %11204 = vmatpush1.msra.mxu0 %v20035_v57  ;;  %v16140_v54 = vrot.slane %v18252_v39, %v18810_v9 }
 0x588   :  { %v11287_v43 = vand.u32 4294901760, %v20041_v19  ;;  %v20053_v2 = vsub.f32 %v11197_v59, %v20043_v62  ;;  %v20055_v14 = vand.u32 4294901760, %v11199_v63  ;;  %11273 = vmatmul.mubr.f32.vlgmr.msra.gmra.mrb[2].mxu0 %v11272_v46  ;;  %v11281_v41 = vand.u32 4294901760, %v11280_v60 }
 0x589   :  { %11353 = vmatprep.mubr.f32.mxu0 %v18723_v3  ;;  %v16145_v59 = vcombine.low %v16132_v25, %v16136_v52 }
 0x58a   :  { %v11752_v53 = vand.u32 4294901760, %v20053_v2  ;;  %v11745_v15 = vsub.f32 %v11199_v63, %v20055_v14  ;;  %11667 = vmatprep.subr.mxu1 %v20055_v14  ;;  %v11282_v21 = vsub.f32 %v11280_v60, %v11281_v41  ;;  %v11288_v16 = vsub.f32 %v20041_v19, %v11287_v43 }
 0x58b   :  { %v20064_v17 = vpop.permute.xlu1 %12182  ;;  %11669 = vmatpush1.msra.mxu1 %v20043_v62 }
 0x58c   :  { %11738 = vmatmul.mubr.f32.vlgmr.msra.gmra.mrb[2].mxu1 %v11272_v46  ;;  %v11283_v35 = vand.u32 4294901760, %v11282_v21  ;;  %v11289_v18 = vand.u32 4294901760, %v11288_v16  ;;  %v11746_v20 = vand.u32 4294901760, %v11745_v15  ;;  %v11753_v44 = vsub.f32 %v20053_v2, %v11752_v53 }
 0x58d   :  { %v20067_v12 = vpop.permute.xlu0 %12184  ;;  %11818 = vmatprep.mubr.f32.mxu1 %v18723_v3  ;;  %v12190_v11 = vsel %vm3107_vm9, %v20048_v49, %v20064_v17  ;;  %v16146_v21 = vcombine.low %v16140_v54, %v16144_v29  ;;  %v20242_v54 = vld [vmem:[#allocation2 + $0xc] sm:$0xff] }
 0x58e   :  { %11284 = vmatprep.subr.mxu0 %v11283_v35  ;;  %v11747_v51 = vsub.f32 %v11745_v15, %v11746_v20  ;;  %v11754_v27 = vand.u32 4294901760, %v11753_v44  ;;  %v12191_v40 = vsel %vm3107_vm9, %v20064_v17, %v20067_v12  ;;  %v12197_v49 = vsel %vm71_vm1, %v12190_v11, 0  ;;  %v18247_v11 = vld [vmem:[%s20684_s2 + $0x10] sm:$0xf] }
 0x58f   :  { %v12189_v4 = vpop.permute.xlu1 %12188  ;;  %11290 = vmatpush1.msra.mxu0 %v11289_v18  ;;  %v12199_v55 = vsel %vm71_vm1, %v12191_v40, 0  ;;  %v18254_v18 = vld [vmem:[%s20685_s3 + $0x20] ss:$8 sm:$0xf] }
 0x590   :  { %11355 = vmatmul.mubr.f32.vlgmr.msra.gmra.mrb[2].mxu0 %v20019_v24  ;;  %11363 = vmatprep.subr.mxu0 %v11280_v60  ;;  %v11748_v0 = vand.u32 4294901760, %v11747_v51  ;;  %v20116_v46 = vand.u32 4294901760, %v12199_v55  ;;  %v17136_v51 = vrot.slane %v18254_v18, %v18806_v7 }
 0x591   :  { %11366 = vmatpush1.msra.mxu0 %v20041_v19  ;;  %v20075_v26 = vpop.permute.xlu0 %12186  ;;  %11429 = vmatprep.mubr.f32.mxu0 %v18723_v3 }
 0x592   :  { %11439 = vmatprep.subr.mxu0 %v20033_v48  ;;  %11749 = vmatprep.subr.mxu1 %v11748_v0  ;;  %v12193_v23 = vsel %vm3107_vm9, %v20075_v26, %v12189_v4  ;;  %v20134_v16 = vsub.f32 %v12199_v55, %v20116_v46  ;;  %v17140_v4 = vrot.slane %v18254_v18, %v18808_v8 }
 0x593   :  { %11755 = vmatpush1.msra.mxu1 %v11754_v27  ;;  %v14142_v50 = vpop.permute.xlu1 %14141  ;;  %v12203_v60 = vsel %vm71_vm1, %v12193_v23, 0 }
 0x594   :  { %11820 = vmatmul.mubr.f32.vlgmr.msra.gmra.mrb[2].mxu1 %v20019_v24  ;;  %11828 = vmatprep.subr.mxu1 %v11745_v15  ;;  %v14144_v28 = vrot.slane %v14142_v50, 4  ;;  %v20136_v19 = vand.u32 4294901760, %v12203_v60 }
 0x595   :  { %11831 = vmatpush1.msra.mxu1 %v20053_v2  ;;  %v14140_v6 = vpop.permute.xlu0 %14139  ;;  %11894 = vmatprep.mubr.f32.mxu1 %v18723_v3 }
 0x596   :  { %v14143_v61 = vrot.slane %v14140_v6, 4  ;;  %11904 = vmatprep.subr.mxu1 %v20055_v14  ;;  %v14153_v58 = vmul.f32 %v14144_v28, %v14118_v42 }
 0x597   :  { %v20098_v37 = vpop.permute.xlu1 %15145 }
 0x598   :  { %v14145_v31 = vsel %vm3107_vm9, %v14143_v61, %v14140_v6  ;;  %v14146_v32 = vsel %vm71_vm1, %v14143_v61, %v14144_v28  ;;  %11432 = vmatmul.mubr.f32.vlgmr.msra.gmra.mrb[2].mxu0 %v20022_v33  ;;  %v15148_v22 = vrot.slane %v20098_v37, 4 }
 0x599   :  { %v14151_v36 = vmul.f32 %v14145_v31, %v19752_v30  ;;  %v14147_v34 = vsel %vm3107_vm9, %v14146_v32, %v14142_v50  ;;  %11441 = vmatpush1.msra.mxu0 %v20035_v57  ;;  %11504 = vmatprep.mubr.f32.mxu0 %v18723_v3  ;;  %v15144_v47 = vpop.permute.xlu0 %15143 }
 0x59a   :  { %v14152_v45 = vmul.f32 %v14147_v34, %v19754_v13  ;;  %11517 = vmatprep.subr.mxu0 %v11281_v41  ;;  %v15147_v38 = vrot.slane %v15144_v47, 4 }
 0x59b   :  { %14161 = vrot.lane.b32.xlu0 %v14151_v36, %s18729_s26  ;;  %v14159_v1 = vcombine.high %v14151_v36, %v14151_v36  ;;  %v17149_v36 = vcombine.low %v17136_v51, %v17140_v4 }
 0x59c   :  { %11897 = vmatmul.mubr.f32.vlgmr.msra.gmra.mrb[2].mxu1 %v20022_v33  ;;  %14165 = vrot.lane.b32.xlu1 %v14152_v45, %s18729_s26  ;;  %v14160_v56 = vcombine.high %v14152_v45, %v14152_v45  ;;  %v18245_v33 = vld [vmem:[%s20684_s2 + $0xc] sm:$0xf]  ;;  %v15149_v41 = vsel %vm2100_vm8, %v15147_v38, %v15144_v47  ;;  %v15150_v15 = vsel %vm71_vm1, %v15147_v38, %v15148_v22 }
 0x59d   :  { %11906 = vmatpush1.msra.mxu1 %v20043_v62  ;;  %11969 = vmatprep.mubr.f32.mxu1 %v18723_v3  ;;  %v12195_v63 = vsel %vm140_vm3, %v18245_v33, 0  ;;  %v15155_v17 = vmul.f32 %v15149_v41, %v19752_v30  ;;  %v15151_v35 = vsel %vm2100_vm8, %v15150_v15, %v20098_v37  ;;  %v12285_v30 = vand.u32 4294901760, %v20134_v16 }
 0x59e   :  { %11982 = vmatprep.subr.mxu1 %v11746_v20  ;;  %v15122_v20 = vld [vmem:[#allocation2 + $0x14] sm:$0xf] }
 0x59f   :  { %14163 = vrot.lane.b32.xlu0 %v14159_v1, %s18729_s26  ;;  %v15163_v44 = vcombine.high %v15155_v17, %v15155_v17  ;;  %v15157_v27 = vmul.f32 %v15148_v22, %v15122_v20  ;;  %v12286_v50 = vsub.f32 %v20134_v16, %v12285_v30  ;;  %v20235_v22 = vld [vmem:[#allocation2 + $0x4] sm:$0xff] }
 0x5a0   :  { %11508 = vmatmul.mubr.f32.vlgmr.msra.gmra.mrb[2].mxu0 %v20025_v5  ;;  %14167 = vrot.lane.b32.xlu1 %v14160_v56, %s18729_s26 }
 0x5a1   :  { %11521 = vmatpush1.msra.mxu0 %v11287_v43  ;;  %11584 = vmatprep.mubr.f32.mxu0 %v18723_v3  ;;  %v20140_v43 = vand.u32 4294901760, %v12195_v63  ;;  %v12287_v34 = vand.u32 4294901760, %v12286_v50 }
 0x5a2   :  { %11593 = vmatprep.subr.mxu0 %v20033_v48  ;;  %v12192_v48 = vsel %vm3107_vm9, %v20067_v12, %v20075_v26  ;;  %v15156_v12 = vmul.f32 %v15151_v35, %v19754_v13  ;;  %v17144_v13 = vrot.slane %v18254_v18, %v18810_v9 }
 0x5a3   :  { %14169 = vrot.lane.b32.xlu0 %v14153_v58, %s18729_s26  ;;  %v12201_v2 = vsel %vm71_vm1, %v12192_v48, 0 }
 0x5a4   :  { %11973 = vmatmul.mubr.f32.vlgmr.msra.gmra.mrb[2].mxu1 %v20025_v5  ;;  %16147 = vrot.lane.b32.xlu1 %v16145_v59, %s18726_s19  ;;  %v20152_v5 = vand.u32 4294901760, %v12197_v49  ;;  %v20177_v26 = vand.u32 4294901760, %v12201_v2  ;;  %v15164_v61 = vcombine.high %v15156_v12, %v15156_v12 }
 0x5a5   :  { %11986 = vmatpush1.msra.mxu1 %v11752_v53  ;;  %12049 = vmatprep.mubr.f32.mxu1 %v18723_v3  ;;  %v20160_v53 = vsub.f32 %v12203_v60, %v20136_v19 }
 0x5a6   :  { %12058 = vmatprep.subr.mxu1 %v20055_v14  ;;  %v20166_v14 = vsub.f32 %v12195_v63, %v20140_v43  ;;  %v20175_v0 = vsub.f32 %v12197_v49, %v20152_v5  ;;  %v20196_v32 = vsub.f32 %v12201_v2, %v20177_v26  ;;  %v13172_v63 = vsel %vm140_vm3, %v18247_v11, 0 }
 0x5a7   :  { %16149 = vrot.lane.b32.xlu0 %v16146_v21, %s18726_s19  ;;  %v12750_v28 = vand.u32 4294901760, %v20160_v53  ;;  %v20273_v49 = vand.u32 4294901760, %v13172_v63 }
 0x5a8   :  { %11586 = vmatmul.mubr.f32.vlgmr.msra.gmra.mrb[2].mxu0 %v20019_v24  ;;  %15165 = vrot.lane.b32.xlu1 %v15155_v17, %s18727_s22  ;;  %v20189_v6 = vand.u32 4294901760, %v20166_v14  ;;  %v12291_v31 = vand.u32 4294901760, %v20175_v0  ;;  %v12756_v45 = vand.u32 4294901760, %v20196_v32 }
 0x5a9   :  { %11595 = vmatpush1.msra.mxu0 %v20035_v57  ;;  %11658 = vmatprep.mubr.f32.mxu0 %v18723_v3  ;;  %v17148_v57 = vrot.slane %v18254_v18, %v18812_v10  ;;  %v13250_v35 = vsub.f32 %v13172_v63, %v20273_v49 }
 0x5aa   :  { %12206 = vmatprep.subr.mxu0 %v20116_v46  ;;  %v12275_v40 = vsub.f32 %v20166_v14, %v20189_v6  ;;  %v12292_v47 = vsub.f32 %v20175_v0, %v12291_v31  ;;  %v12757_v55 = vsub.f32 %v20196_v32, %v12756_v45 }
 0x5ab   :  { %15169 = vrot.lane.b32.xlu0 %v15156_v12, %s18727_s22  ;;  %v17150_v39 = vcombine.low %v17144_v13, %v17148_v57 }
 0x5ac   :  { %12051 = vmatmul.mubr.f32.vlgmr.msra.gmra.mrb[2].mxu1 %v20019_v24  ;;  %15167 = vrot.lane.b32.xlu1 %v15163_v44, %s18727_s22  ;;  %v12276_v25 = vand.u32 4294901760, %v12275_v40  ;;  %v12293_v52 = vand.u32 4294901760, %v12292_v47  ;;  %v12758_v1 = vand.u32 4294901760, %v12757_v55 }
 0x5ad   :  { %12060 = vmatpush1.msra.mxu1 %v20043_v62  ;;  %12123 = vmatprep.mubr.f32.mxu1 %v18723_v3  ;;  %v12751_v62 = vsub.f32 %v20160_v53, %v12750_v28 }
 0x5ae   :  { %12671 = vmatprep.subr.mxu1 %v20136_v19 }
 0x5af   :  { %15171 = vrot.lane.b32.xlu0 %v15164_v61, %s18727_s22  ;;  %v12752_v37 = vand.u32 4294901760, %v12751_v62 }
 0x5b0   :  { %11660 = vmatmul.mubr.f32.vlgmr.msra.gmra.mrb[2].mxu0 %v20019_v24  ;;  %15173 = vrot.lane.b32.xlu1 %v15157_v27, %s18727_s22 }
 0x5b1   :  { %12208 = vmatpush1.msra.mxu0 %v20152_v5  ;;  %12271 = vmatprep.mubr.f32.mxu0 %v18723_v3 }
 0x5b2   :  { %12288 = vmatprep.subr.mxu0 %v12287_v34 }
 0x5b3   :  { %17151 = vrot.lane.b32.xlu0 %v17149_v36, %s18728_s25 }
 0x5b4   :  { %12125 = vmatmul.mubr.f32.vlgmr.msra.gmra.mrb[2].mxu1 %v20019_v24  ;;  %17153 = vrot.lane.b32.xlu1 %v17150_v39, %s18728_s25  ;;  %v18246_v24 = vld [vmem:[%s20685_s3 + $0x4] ss:$8 sm:$0xf] }
 0x5b5   :  { %12673 = vmatpush1.msra.mxu1 %v20177_v26  ;;  %12736 = vmatprep.mubr.f32.mxu1 %v18723_v3  ;;  %v13146_v23 = vrot.slane %v18246_v24, %v18806_v7  ;;  %v13150_v42 = vrot.slane %v18246_v24, %v18808_v8  ;;  %v13154_v33 = vrot.slane %v18246_v24, %v18810_v9 }
 0x5b6   :  { %12753 = vmatprep.subr.mxu1 %v12752_v37  ;;  %v13158_v38 = vrot.slane %v18246_v24, %v18812_v10 }
 0x5b7   :  { %v13159_v56 = vcombine.low %v13146_v23, %v13150_v42 }
 0x5b8   :  { %12277 = vmatmul.mubr.f32.vlgmr.msra.gmra.mrb[2].mxu0 %v12276_v25  ;;  %v13160_v8 = vcombine.low %v13154_v33, %v13158_v38 }
 0x5b9   :  { %12294 = vmatpush1.msra.mxu0 %v12293_v52  ;;  %12357 = vmatprep.mubr.f32.mxu0 %v18723_v3  ;;  %v13163_v7 = vmul.f32 %v13159_v56, %v20235_v22 }
 0x5ba   :  { %12367 = vmatprep.subr.mxu0 %v20134_v16  ;;  %v13164_v10 = vmul.f32 %v13160_v8, %v20242_v54 }
 0x5bb   :  { %v13169_v9 = vcombine.high %v13163_v7, %v13163_v7  ;;  %v13174_v15 = vsel %vm71_vm1, %v13163_v7, 0 }
 0x5bc   :  { %12742 = vmatmul.mubr.f32.vlgmr.msra.gmra.mrb[2].mxu1 %v12276_v25  ;;  %v13170_v59 = vcombine.high %v13164_v10, %v13164_v10  ;;  %v20279_v16 = vand.u32 4294901760, %v13174_v15  ;;  %v13178_v48 = vsel %vm71_vm1, %v13164_v10, 0 }
 0x5bd   :  { %12759 = vmatpush1.msra.mxu1 %v12758_v1  ;;  %12822 = vmatprep.mubr.f32.mxu1 %v18723_v3  ;;  %v13176_v29 = vsel %vm71_vm1, %v13169_v9, 0 }
 0x5be   :  { %12832 = vmatprep.subr.mxu1 %v20160_v53  ;;  %v20260_v60 = vand.u32 4294901760, %v13176_v29  ;;  %v13180_v58 = vsel %vm71_vm1, %v13170_v59, 0  ;;  %v13267_v18 = vsub.f32 %v13174_v15, %v20279_v16 }
 0x5bf   :  { %v20269_v41 = vand.u32 4294901760, %v13180_v58 }
 0x5c0   :  { %12359 = vmatmul.mubr.f32.vlgmr.msra.gmra.mrb[2].mxu0 %v20140_v43  ;;  %v13261_v21 = vsub.f32 %v13176_v29, %v20260_v60 }
 0x5c1   :  { %12370 = vmatpush1.msra.mxu0 %v20175_v0  ;;  %12433 = vmatprep.mubr.f32.mxu0 %v18723_v3  ;;  %v13726_v17 = vsub.f32 %v13180_v58, %v20269_v41 }
 0x5c2   :  { %12443 = vmatprep.subr.mxu0 %v20116_v46 }
 0x5c3   :  { %v13727_v53 = vand.u32 4294901760, %v13726_v17 }
 0x5c4   :  { %12824 = vmatmul.mubr.f32.vlgmr.msra.gmra.mrb[2].mxu1 %v20140_v43 }
 0x5c5   :  { %12835 = vmatpush1.msra.mxu1 %v20196_v32  ;;  %12898 = vmatprep.mubr.f32.mxu1 %v18723_v3  ;;  %v13728_v12 = vsub.f32 %v13726_v17, %v13727_v53 }
 0x5c6   :  { %12908 = vmatprep.subr.mxu1 %v20136_v19 }
 0x5c7   :  { %v13729_v0 = vand.u32 4294901760, %v13728_v12 }
 0x5c8   :  { %12436 = vmatmul.mubr.f32.vlgmr.msra.gmra.mrb[2].mxu0 %v20166_v14 }
 0x5c9   :  { %12445 = vmatpush1.msra.mxu0 %v20152_v5  ;;  %12508 = vmatprep.mubr.f32.mxu0 %v18723_v3 }
 0x5ca   :  { %12521 = vmatprep.subr.mxu0 %v12285_v30  ;;  %v13251_v30 = vand.u32 4294901760, %v13250_v35 }
 0x5cc   :  { %12901 = vmatmul.mubr.f32.vlgmr.msra.gmra.mrb[2].mxu1 %v20166_v14  ;;  %v13268_v14 = vand.u32 4294901760, %v13267_v18  ;;  %v13252_v44 = vsub.f32 %v13250_v35, %v13251_v30 }
 0x5cd   :  { %12910 = vmatpush1.msra.mxu1 %v20177_v26  ;;  %12973 = vmatprep.mubr.f32.mxu1 %v18723_v3 }
 0x5ce   :  { %12986 = vmatprep.subr.mxu1 %v12750_v28  ;;  %v13269_v51 = vsub.f32 %v13267_v18, %v13268_v14 }
 0x5d0   :  { %12512 = vmatmul.mubr.f32.vlgmr.msra.gmra.mrb[2].mxu0 %v20189_v6  ;;  %v13270_v13 = vand.u32 4294901760, %v13269_v51 }
 0x5d1   :  { %12525 = vmatpush1.msra.mxu0 %v12291_v31  ;;  %12588 = vmatprep.mubr.f32.mxu0 %v18723_v3 }
 0x5d2   :  { %12597 = vmatprep.subr.mxu0 %v20116_v46  ;;  %v13262_v46 = vand.u32 4294901760, %v13261_v21 }
 0x5d4   :  { %12977 = vmatmul.mubr.f32.vlgmr.msra.gmra.mrb[2].mxu1 %v20189_v6  ;;  %v13263_v2 = vsub.f32 %v13261_v21, %v13262_v46 }
 0x5d5   :  { %12990 = vmatpush1.msra.mxu1 %v12756_v45  ;;  %13053 = vmatprep.mubr.f32.mxu1 %v18723_v3 }
 0x5d6   :  { %13062 = vmatprep.subr.mxu1 %v20136_v19  ;;  %v20289_v19 = vand.u32 4294901760, %v13178_v48  ;;  %v13264_v20 = vand.u32 4294901760, %v13263_v2 }
 0x5d8   :  { %12590 = vmatmul.mubr.f32.vlgmr.msra.gmra.mrb[2].mxu0 %v20140_v43 }
 0x5d9   :  { %12599 = vmatpush1.msra.mxu0 %v20152_v5  ;;  %12662 = vmatprep.mubr.f32.mxu0 %v18723_v3  ;;  %v13732_v5 = vsub.f32 %v13178_v48, %v20289_v19 }
 0x5da   :  { %13183 = vmatprep.subr.mxu0 %v20260_v60 }
 0x5db   :  { %v13733_v4 = vand.u32 4294901760, %v13732_v5 }
 0x5dc   :  { %13055 = vmatmul.mubr.f32.vlgmr.msra.gmra.mrb[2].mxu1 %v20140_v43 }
 0x5dd   :  { %13064 = vmatpush1.msra.mxu1 %v20177_v26  ;;  %13127 = vmatprep.mubr.f32.mxu1 %v18723_v3  ;;  %v13253_v26 = vand.u32 4294901760, %v13252_v44  ;;  %v13734_v57 = vsub.f32 %v13732_v5, %v13733_v4 }
 0x5de   :  { %13648 = vmatprep.subr.mxu1 %v20269_v41 }
 0x5df   :  { %v13735_v27 = vand.u32 4294901760, %v13734_v57 }
 0x5e0   :  { %12664 = vmatmul.mubr.f32.vlgmr.msra.gmra.mrb[2].mxu0 %v20140_v43 }
 0x5e1   :  { %13185 = vmatpush1.msra.mxu0 %v20279_v16  ;;  %13248 = vmatprep.mubr.f32.mxu0 %v18723_v3 }
 0x5e2   :  { %13265 = vmatprep.subr.mxu0 %v13264_v20  ;;  %v16126_v20 = vld [vmem:[#allocation2 + $0x14] sm:$0xf] }
 0x5e4   :  { %13129 = vmatmul.mubr.f32.vlgmr.msra.gmra.mrb[2].mxu1 %v20140_v43  ;;  %v18249_v43 = vld [vmem:[%s20684_s2 + $0x14] sm:$0xf] }
 0x5e5   :  { %13650 = vmatpush1.msra.mxu1 %v20289_v19  ;;  %13713 = vmatprep.mubr.f32.mxu1 %v18723_v3  ;;  %v14176_v50 = vsel %vm140_vm3, %v18249_v43, 0 }
 0x5e6   :  { %13730 = vmatprep.subr.mxu1 %v13729_v0  ;;  %v20320_v28 = vand.u32 4294901760, %v14176_v50 }
 0x5e8   :  { %13254 = vmatmul.mubr.f32.vlgmr.msra.gmra.mrb[2].mxu0 %v13253_v26  ;;  %v20326_v6 = vsub.f32 %v14176_v50, %v20320_v28 }
 0x5e9   :  { %13271 = vmatpush1.msra.mxu0 %v13270_v13  ;;  %13334 = vmatprep.mubr.f32.mxu0 %v18723_v3 }
 0x5ea   :  { %13344 = vmatprep.subr.mxu0 %v13261_v21  ;;  %v20332_v61 = vand.u32 4294901760, %v20326_v6 }
 0x5ec   :  { %13719 = vmatmul.mubr.f32.vlgmr.msra.gmra.mrb[2].mxu1 %v13253_v26  ;;  %v14256_v36 = vsub.f32 %v20326_v6, %v20332_v61 }
 0x5ed   :  { %13736 = vmatpush1.msra.mxu1 %v13735_v27  ;;  %13799 = vmatprep.mubr.f32.mxu1 %v18723_v3 }
 0x5ee   :  { %13809 = vmatprep.subr.mxu1 %v13726_v17  ;;  %v14257_v24 = vand.u32 4294901760, %v14256_v36 }
 0x5f0   :  { %13336 = vmatmul.mubr.f32.vlgmr.msra.gmra.mrb[2].mxu0 %v20273_v49 }
 0x5f1   :  { %13347 = vmatpush1.msra.mxu0 %v13267_v18  ;;  %13410 = vmatprep.mubr.f32.mxu0 %v18723_v3 }
 0x5f2   :  { %13420 = vmatprep.subr.mxu0 %v20260_v60 }
 0x5f4   :  { %13801 = vmatmul.mubr.f32.vlgmr.msra.gmra.mrb[2].mxu1 %v20273_v49 }
 0x5f5   :  { %13812 = vmatpush1.msra.mxu1 %v13732_v5  ;;  %13875 = vmatprep.mubr.f32.mxu1 %v18723_v3 }
 0x5f6   :  { %13885 = vmatprep.subr.mxu1 %v20269_v41 }
 0x5f8   :  { %13413 = vmatmul.mubr.f32.vlgmr.msra.gmra.mrb[2].mxu0 %v13250_v35 }
 0x5f9   :  { %13422 = vmatpush1.msra.mxu0 %v20279_v16  ;;  %13485 = vmatprep.mubr.f32.mxu0 %v18723_v3 }
 0x5fa   :  { %13498 = vmatprep.subr.mxu0 %v13262_v46 }
 0x5fc   :  { %13878 = vmatmul.mubr.f32.vlgmr.msra.gmra.mrb[2].mxu1 %v13250_v35 }
 0x5fd   :  { %13887 = vmatpush1.msra.mxu1 %v20289_v19  ;;  %13950 = vmatprep.mubr.f32.mxu1 %v18723_v3 }
 0x5fe   :  { %13963 = vmatprep.subr.mxu1 %v13727_v53 }
 0x600   :  { %13489 = vmatmul.mubr.f32.vlgmr.msra.gmra.mrb[2].mxu0 %v13251_v30 }
 0x601   :  { %13502 = vmatpush1.msra.mxu0 %v13268_v14  ;;  %13565 = vmatprep.mubr.f32.mxu0 %v18723_v3 }
 0x602   :  { %13574 = vmatprep.subr.mxu0 %v20260_v60 }
 0x604   :  { %13954 = vmatmul.mubr.f32.vlgmr.msra.gmra.mrb[2].mxu1 %v13251_v30 }
 0x605   :  { %13967 = vmatpush1.msra.mxu1 %v13733_v4  ;;  %14030 = vmatprep.mubr.f32.mxu1 %v18723_v3 }
 0x606   :  { %14039 = vmatprep.subr.mxu1 %v20269_v41 }
 0x608   :  { %13567 = vmatmul.mubr.f32.vlgmr.msra.gmra.mrb[2].mxu0 %v20273_v49 }
 0x609   :  { %13576 = vmatpush1.msra.mxu0 %v20279_v16  ;;  %13639 = vmatprep.mubr.f32.mxu0 %v18723_v3 }
 0x60c   :  { %14032 = vmatmul.mubr.f32.vlgmr.msra.gmra.mrb[2].mxu1 %v20273_v49 }
 0x60d   :  { %14041 = vmatpush1.msra.mxu1 %v20289_v19  ;;  %v14162_v31 = vpop.permute.xlu0 %14161  ;;  %14104 = vmatprep.mubr.f32.mxu1 %v18723_v3 }
 0x60e   :  { %v14166_v32 = vpop.permute.xlu1 %14165 }
 0x610   :  { %13641 = vmatmul.mubr.f32.vlgmr.msra.gmra.mrb[2].mxu0 %v20273_v49 }
 0x611   :  { %v14164_v34 = vpop.permute.xlu0 %14163  ;;  %14252 = vmatprep.mubr.f32.mxu0 %v18723_v3 }
 0x612   :  { %v14171_v62 = vsel %vm3080_vm6, %v14162_v31, %v14164_v34  ;;  %v14172_v39 = vsel %vm3080_vm6, %v14164_v34, %v14166_v32  ;;  %v14168_v40 = vpop.permute.xlu1 %14167 }
 0x613   :  { %v14178_v45 = vsel %vm71_vm1, %v14171_v62, 0  ;;  %v14180_v47 = vsel %vm71_vm1, %v14172_v39, 0  ;;  %v14173_v37 = vsel %vm3080_vm6, %v14166_v32, %v14168_v40  ;;  %v17130_v39 = vld [vmem:[#allocation2 + $0x14] sm:$0xf] }
 0x614   :  { %v20345_v25 = vand.u32 4294901760, %v14180_v47  ;;  %v20347_v52 = vand.u32 4294901760, %v14178_v45  ;;  %v14182_v55 = vsel %vm71_vm1, %v14173_v37, 0  ;;  %14106 = vmatmul.mubr.f32.vlgmr.msra.gmra.mrb[2].mxu1 %v20273_v49 }
 0x615   :  { %v20351_v1 = vand.u32 4294901760, %v14182_v55  ;;  %v14170_v23 = vpop.permute.xlu0 %14169  ;;  %14717 = vmatprep.mubr.f32.mxu1 %v18723_v3 }
 0x616   :  { %v20355_v42 = vsub.f32 %v14180_v47, %v20345_v25  ;;  %v20358_v56 = vsub.f32 %v14178_v45, %v20347_v52  ;;  %v14174_v33 = vsel %vm3080_vm6, %v14168_v40, %v14170_v23  ;;  %14187 = vmatprep.subr.mxu0 %v20345_v25  ;;  %v16148_v38 = vpop.permute.xlu1 %16147  ;;  %v18251_v45 = vld [vmem:[%s20684_s2 + $0x18] sm:$0xf] }
 0x617   :  { %v20363_v7 = vsub.f32 %v14182_v55, %v20351_v1  ;;  %v14184_v8 = vsel %vm71_vm1, %v14174_v33, 0  ;;  %v16151_v9 = vrot.slane %v16148_v38, 4  ;;  %14189 = vmatpush1.msra.mxu0 %v20347_v52 }
 0x618   :  { %v14272_v10 = vand.u32 4294901760, %v20358_v56  ;;  %v20368_v29 = vand.u32 4294901760, %v14184_v8  ;;  %14258 = vmatmul.mubr.f32.vlgmr.msra.gmra.mrb[2].mxu0 %v14257_v24  ;;  %v14266_v59 = vand.u32 4294901760, %v20355_v42 }
 0x619   :  { %v14737_v11 = vand.u32 4294901760, %v20363_v7  ;;  %v16153_v60 = vsel %vm135_vm4, %v16151_v9, %v16148_v38  ;;  %v16150_v58 = vpop.permute.xlu0 %16149  ;;  %14338 = vmatprep.mubr.f32.mxu0 %v18723_v3 }
 0x61a   :  { %v20375_v63 = vsub.f32 %v14184_v8, %v20368_v29  ;;  %v16159_v41 = vmul.f32 %v16153_v60, %v20235_v22  ;;  %v16152_v15 = vrot.slane %v16150_v58, 4  ;;  %14652 = vmatprep.subr.mxu1 %v20368_v29  ;;  %v20379_v21 = vpop.permute.xlu1 %15165  ;;  %v14267_v49 = vsub.f32 %v20355_v42, %v14266_v59 }
 0x61b   :  { %14654 = vmatpush1.msra.mxu1 %v20351_v1  ;;  %v14273_v16 = vsub.f32 %v20358_v56, %v14272_v10  ;;  %v14738_v30 = vsub.f32 %v20363_v7, %v14737_v11 }
 0x61c   :  { %v16154_v46 = vsel %vm71_vm1, %v16151_v9, %v16152_v15  ;;  %14723 = vmatmul.mubr.f32.vlgmr.msra.gmra.mrb[2].mxu1 %v14257_v24  ;;  %16169 = vrot.lane.b32.xlu0 %v16159_v41, %s18724_s17  ;;  %v14268_v48 = vand.u32 4294901760, %v14267_v49  ;;  %v14731_v19 = vand.u32 4294901760, %v20375_v63  ;;  %v16167_v5 = vcombine.high %v16159_v41, %v16159_v41 }
 0x61d   :  { %v16155_v17 = vsel %vm135_vm4, %v16154_v46, %v16150_v58  ;;  %v20391_v35 = vpop.permute.xlu0 %15169  ;;  %v14274_v18 = vand.u32 4294901760, %v14273_v16  ;;  %14803 = vmatprep.mubr.f32.mxu1 %v18723_v3  ;;  %v14739_v4 = vand.u32 4294901760, %v14738_v30  ;;  %v16161_v0 = vmul.f32 %v16152_v15, %v16126_v20 }
 0x61e   :  { %v16160_v2 = vmul.f32 %v16155_v17, %v20242_v54  ;;  %14269 = vmatprep.subr.mxu0 %v14268_v48  ;;  %v15168_v53 = vpop.permute.xlu1 %15167  ;;  %v14732_v14 = vsub.f32 %v20375_v63, %v14731_v19  ;;  %v15180_v24 = vsel %vm140_vm3, %v18251_v45, 0 }
 0x61f   :  { %14275 = vmatpush1.msra.mxu0 %v14274_v18  ;;  %v15176_v36 = vsel %vm2073_vm5, %v15168_v53, %v20391_v35  ;;  %v20454_v38 = vand.u32 4294901760, %v15180_v24 }
 0x620   :  { %14340 = vmatmul.mubr.f32.vlgmr.msra.gmra.mrb[2].mxu0 %v20320_v28  ;;  %14348 = vmatprep.subr.mxu0 %v20355_v42  ;;  %v14733_v44 = vand.u32 4294901760, %v14732_v14  ;;  %v16168_v26 = vcombine.high %v16160_v2, %v16160_v2 }
 0x621   :  { %16173 = vrot.lane.b32.xlu1 %v16160_v2, %s18724_s17  ;;  %16171 = vrot.lane.b32.xlu0 %v16167_v5, %s18724_s17  ;;  %v15172_v12 = vpop.permute.xlu0 %15171 }
 0x622   :  { %14351 = vmatpush1.msra.mxu0 %v20358_v56  ;;  %v15174_v51 = vpop.permute.xlu1 %15173  ;;  %14414 = vmatprep.mubr.f32.mxu0 %v18723_v3  ;;  %v15177_v8 = vsel %vm2073_vm5, %v20391_v35, %v15172_v12 }
 0x623   :  { %14424 = vmatprep.subr.mxu0 %v20345_v25  ;;  %14734 = vmatprep.subr.mxu1 %v14733_v44 }
 0x624   :  { %14740 = vmatpush1.msra.mxu1 %v14739_v4 }
 0x625   :  { %14805 = vmatmul.mubr.f32.vlgmr.msra.gmra.mrb[2].mxu1 %v20320_v28  ;;  %14813 = vmatprep.subr.mxu1 %v20375_v63  ;;  %v17152_v13 = vpop.permute.xlu0 %17151 }
 0x626   :  { %16175 = vrot.lane.b32.xlu1 %v16168_v26, %s18724_s17  ;;  %16177 = vrot.lane.b32.xlu0 %v16161_v0, %s18724_s17  ;;  %v17155_v57 = vrot.slane %v17152_v13, 4  ;;  %v17154_v27 = vpop.permute.xlu1 %17153 }
 0x627   :  { %14816 = vmatpush1.msra.mxu1 %v20363_v7  ;;  %v17156_v43 = vrot.slane %v17154_v27, 4  ;;  %14879 = vmatprep.mubr.f32.mxu1 %v18723_v3 }
 0x628   :  { %v17157_v50 = vsel %vm1097_vm7, %v17155_v57, %v17152_v13  ;;  %14889 = vmatprep.subr.mxu1 %v20368_v29  ;;  %14417 = vmatmul.mubr.f32.vlgmr.msra.gmra.mrb[2].mxu0 %v20326_v6 }
 0x629   :  { %v17163_v31 = vmul.f32 %v17157_v50, %v20235_v22  ;;  %v17158_v32 = vsel %vm71_vm1, %v17155_v57, %v17156_v43  ;;  %14426 = vmatpush1.msra.mxu0 %v20347_v52  ;;  %14489 = vmatprep.mubr.f32.mxu0 %v18723_v3  ;;  %v15184_v22 = vsel %vm71_vm1, %v15176_v36, 0  ;;  %v17165_v47 = vmul.f32 %v17156_v43, %v17130_v39 }
 0x62a   :  { %v17159_v34 = vsel %vm1097_vm7, %v17158_v32, %v17154_v27  ;;  %14502 = vmatprep.subr.mxu0 %v14266_v59  ;;  %v20437_v55 = vand.u32 4294901760, %v15184_v22 }
 0x62b   :  { %v17164_v62 = vmul.f32 %v17159_v34, %v20242_v54  ;;  %17173 = vrot.lane.b32.xlu1 %v17163_v31, %s18725_s18  ;;  %v17171_v40 = vcombine.high %v17163_v31, %v17163_v31  ;;  %v15178_v54 = vsel %vm2073_vm5, %v15172_v12, %v15174_v51 }
 0x62c   :  { %v15188_v23 = vsel %vm71_vm1, %v15178_v54, 0  ;;  %v20452_v33 = vsub.f32 %v15184_v22, %v20437_v55 }
 0x62d   :  { %14882 = vmatmul.mubr.f32.vlgmr.msra.gmra.mrb[2].mxu1 %v20326_v6  ;;  %17177 = vrot.lane.b32.xlu0 %v17164_v62, %s18725_s18  ;;  %v17172_v37 = vcombine.high %v17164_v62, %v17164_v62  ;;  %v15175_v6 = vsel %vm2073_vm5, %v20379_v21, %v15168_v53  ;;  %v20456_v56 = vand.u32 4294901760, %v15188_v23 }
 0x62e   :  { %14891 = vmatpush1.msra.mxu1 %v20351_v1  ;;  %14954 = vmatprep.mubr.f32.mxu1 %v18723_v3  ;;  %v15182_v42 = vsel %vm71_vm1, %v15175_v6, 0  ;;  %v15270_v9 = vand.u32 4294901760, %v20452_v33 }
 0x62f   :  { %14967 = vmatprep.subr.mxu1 %v14731_v19  ;;  %17175 = vrot.lane.b32.xlu1 %v17171_v40, %s18725_s18  ;;  %v15734_v59 = vsub.f32 %v15188_v23, %v20456_v56 }
 0x630   :  { %14493 = vmatmul.mubr.f32.vlgmr.msra.gmra.mrb[2].mxu0 %v20332_v61 }
 0x631   :  { %14506 = vmatpush1.msra.mxu0 %v14272_v10  ;;  %17179 = vrot.lane.b32.xlu0 %v17172_v37, %s18725_s18  ;;  %v15258_v10 = vsub.f32 %v15180_v24, %v20454_v38  ;;  %v15735_v58 = vand.u32 4294901760, %v15734_v59 }
 0x632   :  { %14578 = vmatprep.subr.mxu0 %v20345_v25  ;;  %14569 = vmatprep.mubr.f32.mxu0 %v18723_v3  ;;  %v20464_v25 = vand.u32 4294901760, %v15182_v42 }
 0x633   :  { %17181 = vrot.lane.b32.xlu1 %v17165_v47, %s18725_s18  ;;  %v15259_v60 = vand.u32 4294901760, %v15258_v10  ;;  %v15736_v21 = vsub.f32 %v15734_v59, %v15735_v58 }
 0x634   :  { %v15275_v7 = vsub.f32 %v15182_v42, %v20464_v25 }
 0x635   :  { %14958 = vmatmul.mubr.f32.vlgmr.msra.gmra.mrb[2].mxu1 %v20332_v61  ;;  %v15186_v61 = vsel %vm71_vm1, %v15177_v8, 0  ;;  %v15260_v15 = vsub.f32 %v15258_v10, %v15259_v60  ;;  %v15737_v46 = vand.u32 4294901760, %v15736_v21 }
 0x636   :  { %14971 = vmatpush1.msra.mxu1 %v14737_v11  ;;  %15034 = vmatprep.mubr.f32.mxu1 %v18723_v3  ;;  %v20476_v11 = vand.u32 4294901760, %v15186_v61  ;;  %v15276_v63 = vand.u32 4294901760, %v15275_v7 }
 0x637   :  { %15043 = vmatprep.subr.mxu1 %v20368_v29  ;;  %v15271_v29 = vsub.f32 %v20452_v33, %v15270_v9 }
 0x638   :  { %14571 = vmatmul.mubr.f32.vlgmr.msra.gmra.mrb[2].mxu0 %v20320_v28  ;;  %v15277_v49 = vsub.f32 %v15275_v7, %v15276_v63 }
 0x639   :  { %14580 = vmatpush1.msra.mxu0 %v20347_v52  ;;  %14643 = vmatprep.mubr.f32.mxu0 %v18723_v3  ;;  %v15740_v52 = vsub.f32 %v15186_v61, %v20476_v11  ;;  %v15272_v41 = vand.u32 4294901760, %v15271_v29 }
 0x63a   :  { %15191 = vmatprep.subr.mxu0 %v20437_v55  ;;  %v15278_v48 = vand.u32 4294901760, %v15277_v49 }
 0x63b   :  { %v15741_v16 = vand.u32 4294901760, %v15740_v52 }
 0x63d   :  { %15036 = vmatmul.mubr.f32.vlgmr.msra.gmra.mrb[2].mxu1 %v20320_v28  ;;  %v15742_v17 = vsub.f32 %v15740_v52, %v15741_v16 }
 0x63e   :  { %15045 = vmatpush1.msra.mxu1 %v20351_v1  ;;  %15108 = vmatprep.mubr.f32.mxu1 %v18723_v3  ;;  %v15261_v1 = vand.u32 4294901760, %v15260_v15 }
 0x63f   :  { %15656 = vmatprep.subr.mxu1 %v20456_v56  ;;  %v15743_v35 = vand.u32 4294901760, %v15742_v17 }
 0x640   :  { %14645 = vmatmul.mubr.f32.vlgmr.msra.gmra.mrb[2].mxu0 %v20320_v28 }
 0x641   :  { %15193 = vmatpush1.msra.mxu0 %v20464_v25  ;;  %15256 = vmatprep.mubr.f32.mxu0 %v18723_v3 }
 0x642   :  { %15273 = vmatprep.subr.mxu0 %v15272_v41 }
 0x645   :  { %15110 = vmatmul.mubr.f32.vlgmr.msra.gmra.mrb[2].mxu1 %v20320_v28  ;;  %v18253_v28 = vld [vmem:[%s20684_s2 + $0x1c] sm:$0xf] }
 0x646   :  { %15658 = vmatpush1.msra.mxu1 %v20476_v11  ;;  %15721 = vmatprep.mubr.f32.mxu1 %v18723_v3  ;;  %v16184_v18 = vsel %vm140_vm3, %v18253_v28, 0 }
 0x647   :  { %15738 = vmatprep.subr.mxu1 %v15737_v46  ;;  %v20521_v19 = vand.u32 4294901760, %v16184_v18 }
 0x648   :  { %15262 = vmatmul.mubr.f32.vlgmr.msra.gmra.mrb[2].mxu0 %v15261_v1 }
 0x649   :  { %15279 = vmatpush1.msra.mxu0 %v15278_v48  ;;  %15342 = vmatprep.mubr.f32.mxu0 %v18723_v3  ;;  %v20524_v2 = vsub.f32 %v16184_v18, %v20521_v19 }
 0x64a   :  { %15352 = vmatprep.subr.mxu0 %v20452_v33 }
 0x64b   :  { %v20527_v30 = vand.u32 4294901760, %v20524_v2 }
 0x64d   :  { %15727 = vmatmul.mubr.f32.vlgmr.msra.gmra.mrb[2].mxu1 %v15261_v1  ;;  %v16264_v5 = vsub.f32 %v20524_v2, %v20527_v30 }
 0x64e   :  { %15744 = vmatpush1.msra.mxu1 %v15743_v35  ;;  %15807 = vmatprep.mubr.f32.mxu1 %v18723_v3 }
 0x64f   :  { %15817 = vmatprep.subr.mxu1 %v15734_v59  ;;  %v16265_v13 = vand.u32 4294901760, %v16264_v5 }
 0x650   :  { %15344 = vmatmul.mubr.f32.vlgmr.msra.gmra.mrb[2].mxu0 %v20454_v38 }
 0x651   :  { %15355 = vmatpush1.msra.mxu0 %v15275_v7  ;;  %15418 = vmatprep.mubr.f32.mxu0 %v18723_v3 }
 0x652   :  { %15428 = vmatprep.subr.mxu0 %v20437_v55 }
 0x655   :  { %15809 = vmatmul.mubr.f32.vlgmr.msra.gmra.mrb[2].mxu1 %v20454_v38 }
 0x656   :  { %15820 = vmatpush1.msra.mxu1 %v15740_v52  ;;  %15883 = vmatprep.mubr.f32.mxu1 %v18723_v3 }
 0x657   :  { %15893 = vmatprep.subr.mxu1 %v20456_v56 }
 0x658   :  { %15421 = vmatmul.mubr.f32.vlgmr.msra.gmra.mrb[2].mxu0 %v15258_v10 }
 0x659   :  { %15430 = vmatpush1.msra.mxu0 %v20464_v25  ;;  %15493 = vmatprep.mubr.f32.mxu0 %v18723_v3 }
 0x65a   :  { %15506 = vmatprep.subr.mxu0 %v15270_v9 }
 0x65d   :  { %15886 = vmatmul.mubr.f32.vlgmr.msra.gmra.mrb[2].mxu1 %v15258_v10 }
 0x65e   :  { %15895 = vmatpush1.msra.mxu1 %v20476_v11  ;;  %15958 = vmatprep.mubr.f32.mxu1 %v18723_v3 }
 0x65f   :  { %15971 = vmatprep.subr.mxu1 %v15735_v58 }
 0x660   :  { %15497 = vmatmul.mubr.f32.vlgmr.msra.gmra.mrb[2].mxu0 %v15259_v60 }
 0x661   :  { %15510 = vmatpush1.msra.mxu0 %v15276_v63  ;;  %15573 = vmatprep.mubr.f32.mxu0 %v18723_v3 }
 0x662   :  { %15582 = vmatprep.subr.mxu0 %v20437_v55 }
 0x665   :  { %15962 = vmatmul.mubr.f32.vlgmr.msra.gmra.mrb[2].mxu1 %v15259_v60 }
 0x666   :  { %15975 = vmatpush1.msra.mxu1 %v15741_v16  ;;  %16038 = vmatprep.mubr.f32.mxu1 %v18723_v3 }
 0x667   :  { %16047 = vmatprep.subr.mxu1 %v20456_v56 }
 0x668   :  { %15575 = vmatmul.mubr.f32.vlgmr.msra.gmra.mrb[2].mxu0 %v20454_v38 }
 0x669   :  { %15584 = vmatpush1.msra.mxu0 %v20464_v25  ;;  %15647 = vmatprep.mubr.f32.mxu0 %v18723_v3 }
 0x66d   :  { %16040 = vmatmul.mubr.f32.vlgmr.msra.gmra.mrb[2].mxu1 %v20454_v38 }
 0x66e   :  { %16049 = vmatpush1.msra.mxu1 %v20476_v11  ;;  %16112 = vmatprep.mubr.f32.mxu1 %v18723_v3  ;;  %v18255_v11 = vld [vmem:[%s20684_s2 + $0x20] sm:$0xf] }
 0x66f   :  { %v17188_v63 = vsel %vm140_vm3, %v18255_v11, 0 }
 0x670   :  { %15649 = vmatmul.mubr.f32.vlgmr.msra.gmra.mrb[2].mxu0 %v20454_v38  ;;  %v20592_v21 = vand.u32 4294901760, %v17188_v63 }
 0x671   :  { %16260 = vmatprep.mubr.f32.mxu0 %v18723_v3 }
 0x672   :  { %v17266_v48 = vsub.f32 %v17188_v63, %v20592_v21  ;;  %v18188_v63 = vld [vmem:[%s20682_s0] sm:$0xff] }
 0x675   :  { %16114 = vmatmul.mubr.f32.vlgmr.msra.gmra.mrb[2].mxu1 %v20454_v38 }
 0x676   :  { %16725 = vmatprep.mubr.f32.mxu1 %v18723_v3 }
 0x68e   :  { %v16170_v53 = vpop.permute.xlu0 %16169 }
 0x693   :  { %v16172_v14 = vpop.permute.xlu0 %16171  ;;  %v16174_v20 = vpop.permute.xlu1 %16173 }
 0x694   :  { %v16179_v12 = vsel %vm108_vm0, %v16170_v53, %v16172_v14  ;;  %v16180_v44 = vsel %vm108_vm0, %v16172_v14, %v16174_v20  ;;  %v17267_v53 = vand.u32 4294901760, %v17266_v48 }
 0x695   :  { %v16186_v51 = vsel %vm71_vm1, %v16179_v12, 0  ;;  %v16188_v4 = vsel %vm71_vm1, %v16180_v44, 0 }
 0x696   :  { %v20535_v0 = vand.u32 4294901760, %v16186_v51  ;;  %v20537_v26 = vand.u32 4294901760, %v16188_v4  ;;  %v17268_v12 = vsub.f32 %v17266_v48, %v17267_v53 }
 0x698   :  { %v20540_v57 = vsub.f32 %v16186_v51, %v20535_v0  ;;  %v16273_v27 = vsub.f32 %v16188_v4, %v20537_v26  ;;  %v16178_v43 = vpop.permute.xlu0 %16177  ;;  %v16176_v50 = vpop.permute.xlu1 %16175  ;;  %16195 = vmatprep.subr.mxu0 %v20537_v26 }
 0x699   :  { %v16181_v31 = vsel %vm108_vm0, %v16174_v20, %v16176_v50  ;;  %v16182_v32 = vsel %vm108_vm0, %v16176_v50, %v16178_v43  ;;  %16197 = vmatpush1.msra.mxu0 %v20535_v0 }
 0x69a   :  { %v16280_v36 = vand.u32 4294901760, %v20540_v57  ;;  %v16190_v34 = vsel %vm71_vm1, %v16181_v31, 0  ;;  %v16192_v62 = vsel %vm71_vm1, %v16182_v32, 0  ;;  %16266 = vmatmul.mubr.f32.vlgmr.msra.gmra.mrb[2].mxu0 %v16265_v13  ;;  %v16274_v39 = vand.u32 4294901760, %v16273_v27 }
 0x69b   :  { %v20550_v22 = vand.u32 4294901760, %v16192_v62  ;;  %v20552_v40 = vand.u32 4294901760, %v16190_v34  ;;  %16346 = vmatprep.mubr.f32.mxu0 %v18723_v3 }
 0x69c   :  { %v16275_v45 = vsub.f32 %v16273_v27, %v16274_v39  ;;  %v16281_v54 = vsub.f32 %v20540_v57, %v16280_v36 }
 0x69d   :  { %v16738_v47 = vsub.f32 %v16192_v62, %v20550_v22  ;;  %v16744_v37 = vsub.f32 %v16190_v34, %v20552_v40  ;;  %16660 = vmatprep.subr.mxu1 %v20550_v22  ;;  %v17174_v38 = vpop.permute.xlu1 %17173 }
 0x69e   :  { %16662 = vmatpush1.msra.mxu1 %v20552_v40  ;;  %v16276_v55 = vand.u32 4294901760, %v16275_v45  ;;  %v16282_v6 = vand.u32 4294901760, %v16281_v54 }
 0x69f   :  { %v16745_v24 = vand.u32 4294901760, %v16744_v37  ;;  %16731 = vmatmul.mubr.f32.vlgmr.msra.gmra.mrb[2].mxu1 %v16265_v13  ;;  %v16739_v23 = vand.u32 4294901760, %v16738_v47  ;;  %v17178_v9 = vpop.permute.xlu0 %17177 }
 0x6a0   :  { %16277 = vmatprep.subr.mxu0 %v16276_v55  ;;  %16811 = vmatprep.mubr.f32.mxu1 %v18723_v3 }
 0x6a1   :  { %16283 = vmatpush1.msra.mxu0 %v16282_v6  ;;  %v16740_v42 = vsub.f32 %v16738_v47, %v16739_v23  ;;  %v16746_v33 = vsub.f32 %v16744_v37, %v16745_v24  ;;  %v17176_v25 = vpop.permute.xlu1 %17175 }
 0x6a2   :  { %16348 = vmatmul.mubr.f32.vlgmr.msra.gmra.mrb[2].mxu0 %v20521_v19  ;;  %16356 = vmatprep.subr.mxu0 %v16273_v27  ;;  %v17184_v10 = vsel %vm69_vm2, %v17176_v25, %v17178_v9  ;;  %v17183_v58 = vsel %vm69_vm2, %v17174_v38, %v17176_v25  ;;  %v18178_v38 = vld [vmem:[%s20689_s7] sm:$0xf] }
 0x6a3   :  { %16359 = vmatpush1.msra.mxu0 %v20540_v57  ;;  %v16741_v56 = vand.u32 4294901760, %v16740_v42  ;;  %v16747_v8 = vand.u32 4294901760, %v16746_v33  ;;  %16422 = vmatprep.mubr.f32.mxu0 %v18723_v3  ;;  %v17192_v59 = vsel %vm71_vm1, %v17184_v10, 0  ;;  %v17180_v7 = vpop.permute.xlu0 %17179  ;;  %v17190_v41 = vsel %vm71_vm1, %v17183_v58, 0 }
 0x6a4   :  { %16432 = vmatprep.subr.mxu0 %v20537_v26  ;;  %v20580_v60 = vand.u32 4294901760, %v17192_v59  ;;  %v17185_v16 = vsel %vm69_vm2, %v17178_v9, %v17180_v7  ;;  %v20599_v1 = vand.u32 4294901760, %v17190_v41 }
 0x6a5   :  { %16742 = vmatprep.subr.mxu1 %v16741_v56  ;;  %v17182_v61 = vpop.permute.xlu1 %17181  ;;  %v17194_v17 = vsel %vm71_vm1, %v17185_v16, 0  ;;  %v18168_v56 = vld [vmem:[%s20688_s6] sm:$0xf]  ;;  %s18733_s6 = smov [#allocation4]  }
 0x6a6   :  { %16748 = vmatpush1.msra.mxu1 %v16747_v8  ;;  %v17186_v29 = vsel %vm69_vm2, %v17180_v7, %v17182_v61  ;;  %v20590_v15 = vsub.f32 %v17192_v59, %v20580_v60  ;;  %v17283_v28 = vsub.f32 %v17190_v41, %v20599_v1  ;;  %v20611_v18 = vand.u32 4294901760, %v17194_v17  ;;  %s18216_s29 = sshll.u32 %s18733_s6, 4  ;;  %s18217_s29 = int_to_ptr.vmem [resolvable:$true] %s18216_s29 }
 0x6a7   :  { %16813 = vmatmul.mubr.f32.vlgmr.msra.gmra.mrb[2].mxu1 %v20521_v19  ;;  %16821 = vmatprep.subr.mxu1 %v16738_v47  ;;  %v17196_v52 = vsel %vm71_vm1, %v17186_v29, 0  ;;  %p18704_p1 = scmp.lt.s32.totalorder %s18217_s29, %s18217_s29 }
 0x6a8   :  { %16824 = vmatpush1.msra.mxu1 %v16744_v37  ;;  %16887 = vmatprep.mubr.f32.mxu1 %v18723_v3  ;;  %v20594_v49 = vand.u32 4294901760, %v17196_v52  ;;  %v17278_v46 = vand.u32 4294901760, %v20590_v15  ;;  %v17284_v5 = vand.u32 4294901760, %v17283_v28  ;;  %v17748_v14 = vsub.f32 %v17194_v17, %v20611_v18 }
 0x6a9   :  { %16897 = vmatprep.subr.mxu1 %v20550_v22 }
 0x6aa   :  { %16425 = vmatmul.mubr.f32.vlgmr.msra.gmra.mrb[2].mxu0 %v20524_v2  ;;  %v17742_v35 = vsub.f32 %v17196_v52, %v20594_v49  ;;  %v17285_v51 = vsub.f32 %v17283_v28, %v17284_v5  ;;  %v17749_v4 = vand.u32 4294901760, %v17748_v14  ;;  %v18189_v52 = vld [vmem:[%s20682_s0 + $0x8] sm:$0xff]  ;;  %s18699_s0 = scalar_lea.vmem %s18217_s29, 256 }
 0x6ab   :  { %16434 = vmatpush1.msra.mxu0 %v20535_v0  ;;  %16497 = vmatprep.mubr.f32.mxu0 %v18723_v3  ;;  %p18700_p0 = scmp.ne.s32.totalorder %s18217_s29, %s18699_s0  ;;  %p18705_p2 = scmp.lt.s32.totalorder %s18699_s0, %s18699_s0 }
 0x6ac   :  { %16510 = vmatprep.subr.mxu0 %v16274_v39  ;;  %v17286_v13 = vand.u32 4294901760, %v17285_v51  ;;  %v17750_v57 = vsub.f32 %v17748_v14, %v17749_v4 }
 0x6ad   :  { %p18706_p3 = por %p18705_p2, %p18704_p1 }
 0x6ae   :  { %v17751_v27 = vand.u32 4294901760, %v17750_v57 }
 0x6af   :  { %16890 = vmatmul.mubr.f32.vlgmr.msra.gmra.mrb[2].mxu1 %v20524_v2  ;;  %v17279_v2 = vsub.f32 %v20590_v15, %v17278_v46  ;;  %p18707_p4 = pnand %p18706_p3, %p18700_p0 }
 0x6b0   :  { %16899 = vmatpush1.msra.mxu1 %v20552_v40  ;;  %16962 = vmatprep.mubr.f32.mxu1 %v18723_v3 }
 0x6b1   :  { %16975 = vmatprep.subr.mxu1 %v16739_v23  ;;  %v17280_v20 = vand.u32 4294901760, %v17279_v2 }
 0x6b2   :  { %16501 = vmatmul.mubr.f32.vlgmr.msra.gmra.mrb[2].mxu0 %v20527_v30 }
 0x6b3   :  { %16514 = vmatpush1.msra.mxu0 %v16280_v36  ;;  %16577 = vmatprep.mubr.f32.mxu0 %v18723_v3 }
 0x6b4   :  { %16586 = vmatprep.subr.mxu0 %v20537_v26 }
 0x6b7   :  { %16966 = vmatmul.mubr.f32.vlgmr.msra.gmra.mrb[2].mxu1 %v20527_v30  ;;  %v17743_v30 = vand.u32 4294901760, %v17742_v35 }
 0x6b8   :  { %16979 = vmatpush1.msra.mxu1 %v16745_v24  ;;  %17042 = vmatprep.mubr.f32.mxu1 %v18723_v3 }
 0x6b9   :  { %17051 = vmatprep.subr.mxu1 %v20550_v22  ;;  %v17744_v44 = vsub.f32 %v17742_v35, %v17743_v30 }
 0x6ba   :  { %16579 = vmatmul.mubr.f32.vlgmr.msra.gmra.mrb[2].mxu0 %v20521_v19 }
 0x6bb   :  { %16588 = vmatpush1.msra.mxu0 %v20535_v0  ;;  %16651 = vmatprep.mubr.f32.mxu0 %v18723_v3  ;;  %v17269_v0 = vand.u32 4294901760, %v17268_v12  ;;  %v17745_v26 = vand.u32 4294901760, %v17744_v44 }
 0x6bc   :  { %17199 = vmatprep.subr.mxu0 %v20580_v60 }
 0x6bf   :  { %17044 = vmatmul.mubr.f32.vlgmr.msra.gmra.mrb[2].mxu1 %v20521_v19 }
 0x6c0   :  { %17053 = vmatpush1.msra.mxu1 %v20552_v40  ;;  %17116 = vmatprep.mubr.f32.mxu1 %v18723_v3 }
 0x6c1   :  { %17664 = vmatprep.subr.mxu1 %v20594_v49 }
 0x6c2   :  { %16653 = vmatmul.mubr.f32.vlgmr.msra.gmra.mrb[2].mxu0 %v20521_v19 }
 0x6c3   :  { %17201 = vmatpush1.msra.mxu0 %v20599_v1  ;;  %17264 = vmatprep.mubr.f32.mxu0 %v18723_v3 }
 0x6c4   :  { %17281 = vmatprep.subr.mxu0 %v17280_v20 }
 0x6c7   :  { %17118 = vmatmul.mubr.f32.vlgmr.msra.gmra.mrb[2].mxu1 %v20521_v19 }
 0x6c8   :  { %17666 = vmatpush1.msra.mxu1 %v20611_v18  ;;  %17729 = vmatprep.mubr.f32.mxu1 %v18723_v3 }
 0x6c9   :  { %17746 = vmatprep.subr.mxu1 %v17745_v26 }
 0x6ca   :  { %17270 = vmatmul.mubr.f32.vlgmr.msra.gmra.mrb[2].mxu0 %v17269_v0 }
 0x6cb   :  { %17287 = vmatpush1.msra.mxu0 %v17286_v13  ;;  %17350 = vmatprep.mubr.f32.mxu0 %v18723_v3 }
 0x6cc   :  { %17360 = vmatprep.subr.mxu0 %v20590_v15 }
 0x6cf   :  { %17735 = vmatmul.mubr.f32.vlgmr.msra.gmra.mrb[2].mxu1 %v17269_v0 }
 0x6d0   :  { %17752 = vmatpush1.msra.mxu1 %v17751_v27  ;;  %17815 = vmatprep.mubr.f32.mxu1 %v18723_v3 }
 0x6d1   :  { %17825 = vmatprep.subr.mxu1 %v17742_v35 }
 0x6d2   :  { %17352 = vmatmul.mubr.f32.vlgmr.msra.gmra.mrb[2].mxu0 %v20592_v21 }
 0x6d3   :  { %17363 = vmatpush1.msra.mxu0 %v17283_v28  ;;  %17426 = vmatprep.mubr.f32.mxu0 %v18723_v3 }
 0x6d4   :  { %17436 = vmatprep.subr.mxu0 %v20580_v60 }
 0x6d7   :  { %17817 = vmatmul.mubr.f32.vlgmr.msra.gmra.mrb[2].mxu1 %v20592_v21 }
 0x6d8   :  { %17828 = vmatpush1.msra.mxu1 %v17748_v14  ;;  %17891 = vmatprep.mubr.f32.mxu1 %v18723_v3 }
 0x6d9   :  { %17901 = vmatprep.subr.mxu1 %v20594_v49 }
 0x6da   :  { %17429 = vmatmul.mubr.f32.vlgmr.msra.gmra.mrb[2].mxu0 %v17266_v48 }
 0x6db   :  { %17438 = vmatpush1.msra.mxu0 %v20599_v1  ;;  %17501 = vmatprep.mubr.f32.mxu0 %v18723_v3 }
 0x6dc   :  { %17514 = vmatprep.subr.mxu0 %v17278_v46  ;;  %v18192_v46 = vcombine.high %v18188_v63, %v18188_v63 }
 0x6df   :  { %17894 = vmatmul.mubr.f32.vlgmr.msra.gmra.mrb[2].mxu1 %v17266_v48  ;;  %v18193_v48 = vcombine.high %v18189_v52, %v18189_v52 }
 0x6e0   :  { %17903 = vmatpush1.msra.mxu1 %v20611_v18  ;;  %17966 = vmatprep.mubr.f32.mxu1 %v18723_v3 }
 0x6e1   :  { %17979 = vmatprep.subr.mxu1 %v17743_v30 }
 0x6e2   :  { %17505 = vmatmul.mubr.f32.vlgmr.msra.gmra.mrb[2].mxu0 %v17267_v53 }
 0x6e3   :  { %17518 = vmatpush1.msra.mxu0 %v17284_v5  ;;  %17581 = vmatprep.mubr.f32.mxu0 %v18723_v3 }
 0x6e4   :  { %17590 = vmatprep.subr.mxu0 %v20580_v60 }
 0x6e7   :  { %17970 = vmatmul.mubr.f32.vlgmr.msra.gmra.mrb[2].mxu1 %v17267_v53 }
 0x6e8   :  { %17983 = vmatpush1.msra.mxu1 %v17749_v4  ;;  %18046 = vmatprep.mubr.f32.mxu1 %v18723_v3 }
 0x6e9   :  { %18055 = vmatprep.subr.mxu1 %v20594_v49 }
 0x6ea   :  { %17583 = vmatmul.mubr.f32.vlgmr.msra.gmra.mrb[2].mxu0 %v20592_v21 }
 0x6eb   :  { %17592 = vmatpush1.msra.mxu0 %v20599_v1  ;;  %17655 = vmatprep.mubr.f32.mxu0 %v18723_v3 }
 0x6ef   :  { %18048 = vmatmul.mubr.f32.vlgmr.msra.gmra.mrb[2].mxu1 %v20592_v21 }
 0x6f0   :  { %18057 = vmatpush1.msra.mxu1 %v20611_v18  ;;  %18120 = vmatprep.mubr.f32.mxu1 %v18723_v3 }
 0x6f2   :  { %17657 = vmatmul.mubr.f32.vlgmr.msra.gmra.mrb[2].mxu0 %v20592_v21 }
 0x6f7   :  { %18122 = vmatmul.mubr.f32.vlgmr.msra.gmra.mrb[2].mxu1 %v20592_v21 }
 0x7c5   :  { %v17658_v19 = vpop.f32.mrb[2].mxu0 }
 0x7c6   :  { %v18132_v43 = vsel %vm71_vm1, %v17658_v19, 0.0  ;;  %v18141_v50 = vmul.f32 %v17658_v19, %v17658_v19  ;;  %v17660_v31 = vpop.f32.mrb[3].mxu0 }
 0x7c7   :  { %v18133_v32 = vsel %vm71_vm1, %v17660_v31, 0.0  ;;  %v18142_v36 = vmul.f32 %v17660_v31, %v17660_v31 }
 0x7c8   :  { %v18145_v34 = vsel %vm71_vm1, %v18141_v50, 0.0  ;;  %v18134_v62 = vadd.f32 %v18133_v32, %v18132_v43 }
 0x7c9   :  { %v18146_v39 = vsel %vm71_vm1, %v18142_v36, 0.0 }
 0x7ca   :  { %v18147_v22 = vadd.f32 %v18146_v39, %v18145_v34  ;;  %v18123_v40 = vpop.f32.mrb[2].mxu1 }
 0x7cb   :  { %v18135_v3 = vsel %vm71_vm1, %v18123_v40, 0.0  ;;  %v18143_v45 = vmul.f32 %v18123_v40, %v18123_v40  ;;  %v18125_v54 = vpop.f32.mrb[3].mxu1 }
 0x7cc   :  { %v18136_v47 = vadd.f32 %v18135_v3, %v18134_v62  ;;  %v18137_v37 = vsel %vm71_vm1, %v18125_v54, 0.0  ;;  %v18144_v55 = vmul.f32 %v18125_v54, %v18125_v54 }
 0x7cd   :  { %v18148_v6 = vsel %vm71_vm1, %v18143_v45, 0.0 }
 0x7ce   :  { %v18138_v24 = vadd.f32 %v18137_v37, %v18136_v47  ;;  %v18150_v23 = vsel %vm71_vm1, %v18144_v55, 0.0  ;;  %v18149_v42 = vadd.f32 %v18148_v6, %v18147_v22 }
 0x7d0   :  { %18139 = vadd.xlane.f32.xlu0 %v18138_v24  ;;  %v18151_v33 = vadd.f32 %v18150_v23, %v18149_v42 }
 0x7d2   :  { %18152 = vadd.xlane.f32.xlu1 %v18151_v33 }
 0x7e3   :  { %18181 = vperm.xlu1 %18692, %v18178_v38  }
 0x7e6   :  { %18171 = vperm.xlu0 %18691, %v18168_v56  }
 0x85d   :  { %v18140_v8 = vpop.xlane.xlu0 %18139 }
 0x85e   :  { %v18154_v25 = vmul.f32 0.001953125, %v18140_v8 }
 0x85f   :  { %v18153_v9 = vpop.xlane.xlu1 %18152 }
 0x860   :  { %v18155_v10 = vmul.f32 0.001953125, %v18153_v9  ;;  %v18156_v61 = vmul.f32 %v18154_v25, %v18154_v25  ;;  %v18158_v11 = vsub.f32 %v17658_v19, %v18154_v25  ;;  %v18159_v29 = vsub.f32 %v17660_v31, %v18154_v25 }
 0x861   :  { %v18160_v60 = vsub.f32 %v18123_v40, %v18154_v25  ;;  %v18161_v58 = vsub.f32 %v18125_v54, %v18154_v25 }
 0x862   :  { %v18157_v59 = vsub.f32 %v18155_v10, %v18156_v61 }
 0x863   :  { %v18182_v2 = vpop.permute.xlu1 %18181 }
 0x864   :  { %v18162_v7 = vadd.f32 1e-05, %v18157_v59 }
 0x865   :  { %v18172_v1 = vpop.permute.xlu0 %18171 }
 0x866   :  { %18697 = vrsqrt.f32 %v18162_v7 }
 0x870   :  { %v18698_v41 = vpop.eup %18697 }
 0x871   :  { %v18164_v15 = vmul.f32 %v18698_v41, %v18158_v11  ;;  %v18165_v21 = vmul.f32 %v18698_v41, %v18159_v29  ;;  %v18166_v49 = vmul.f32 %v18698_v41, %v18160_v60  ;;  %v18167_v16 = vmul.f32 %v18698_v41, %v18161_v58 }
 0x873   :  { %v18174_v17 = vmul.f32 %v18172_v1, %v18164_v15  ;;  %v18175_v35 = vmul.f32 %v18172_v1, %v18165_v21  ;;  %v18176_v28 = vmul.f32 %v18172_v1, %v18166_v49  ;;  %v18177_v18 = vmul.f32 %v18172_v1, %v18167_v16 }
 0x875   :  { %v18184_v53 = vadd.f32 %v18182_v2, %v18174_v17  ;;  %v18185_v30 = vadd.f32 %v18182_v2, %v18175_v35  ;;  %v18186_v5 = vadd.f32 %v18182_v2, %v18176_v28  ;;  %v18187_v14 = vadd.f32 %v18182_v2, %v18177_v18 }
 0x877   :  { %v18196_v20 = vadd.f32 %v18188_v63, %v18184_v53  ;;  %v18197_v12 = vadd.f32 %v18192_v46, %v18185_v30  ;;  %v18198_v44 = vadd.f32 %v18189_v52, %v18186_v5  ;;  %v18199_v51 = vadd.f32 %v18193_v48, %v18187_v14 }
 0x879   :  { %v18204_v4 = vcombine.low %v18196_v20, %v18197_v12  ;;  %v18205_v0 = vcombine.low %v18198_v44, %v18199_v51 }
 0x87b   :  { %18208 = vst [vmem:[#allocation4] sm:$0xff] %v18204_v4  ;;  %18209 = vst [vmem:[#allocation4 + $0x8] sm:$0xff] %v18205_v0 }
 0x87c   :  { %18710 = shalt.err (!%p18707_p4)
}
 0x87d   :  { %s18711_s15 = scalar_lea.hbm %s20691_s9, 256 }
 0x87e   :  { %p18712_p5 = scmp.ne.s32.totalorder %s20691_s9, %s18711_s15  ;;  %p18715_p6 = scmp.lt.u32.totalorder %s18711_s15, %s20691_s9 }
 0x880   :  { %p18717_p7 = pnand %p18715_p6, %p18712_p5 }
 0x882   :  { %18720 = shalt.err (!%p18717_p7)
}
 0x883   :  { %18219 = dma.vmem_to_hbm [thread:$0]  %s18217_s29, 256, %s20691_s9, [#allocation5]  }
 0x884   :  { %18721 = dma.done.wait [#allocation5], 256  }
 0x885   :  { %18722 = vsyncadd [#allocation5], 4294967040 }
 0x886   :  { %18223 = vsyncpa [#allocation5], 1 }

</bundles_post_ra>
